<compile_context>
chip_gen: v5e
topology: v5e:2x2
jax: 0.10.0
libtpu: 0.0.40
codegen_flags: <defaults>
</compile_context>

<pallas_src>
import jax
import jax.numpy as jnp
from jax.experimental import pallas as pl
from jax.experimental.pallas import tpu as pltpu

H = 14          # hidden size
IN = 60         # input size
L = 3           # number of stacked LSTM layers
OUT = 7         # linear output size
G = 128         # lane-padded width of one gate block (vreg lane boundary)
OUT_PAD = 128   # lane-padded width of the linear head output


def _activate(gates, c_prev):
  """LSTM nonlinearity. gates:(1,4*G) in internal order (i,f,o,g); c_prev:(1,H)."""
  s = jax.nn.sigmoid(gates[:, :3 * G])          # one EUP slab for i, f, o
  i = s[:, 0 * G:0 * G + H]                     # lane-boundary-aligned slices
  f = s[:, 1 * G:1 * G + H]
  o = s[:, 2 * G:2 * G + H]
  g = jnp.tanh(gates[:, 3 * G:3 * G + H])
  c_new = f * c_prev + i * g
  h_new = o * jnp.tanh(c_new)
  return h_new, c_new


def incidence_kernel(x_ref,
                     wih0_ref, whh0_ref, b0_ref,
                     wih1_ref, whh1_ref, b1_ref,
                     wih2_ref, whh2_ref, b2_ref,
                     wlin_ref, blin_ref,
                     h0_ref, c0_ref,
                     out_ref, hn_ref, cn_ref):
  """Single-invocation kernel: fully unrolled LSTM over T steps + fused MLP head."""
  T = x_ref.shape[0]

  # Hoisted layer-0 input projection for ALL timesteps: one (T,60)@(60,4G) matmul.
  gx0 = jnp.dot(x_ref[...], wih0_ref[...],
                preferred_element_type=jnp.float32) + b0_ref[...]

  whh = (whh0_ref[...], whh1_ref[...], whh2_ref[...])
  wih = (None, wih1_ref[...], wih2_ref[...])
  b = (None, b1_ref[...], b2_ref[...])

  h = [h0_ref[l:l + 1, :] for l in range(L)]
  c = [c0_ref[l:l + 1, :] for l in range(L)]

  hseq = []
  # TODO(synk): for long sequences, tile T over a 1-D grid ("arbitrary") with h/c
  # carried in VMEM scratch instead of fully unrolling (and HBM-pipelined x/out).
  for t in range(T):
    # Layer 0: only the recurrent dot remains on the dependency chain.
    g0 = gx0[t:t + 1, :] + jnp.dot(h[0], whh[0],
                                   preferred_element_type=jnp.float32)
    h[0], c[0] = _activate(g0, c[0])
    # Layers 1..2: the W_hh dot depends only on previous-step state (scheduler
    # hoists it); only the W_ih dot on the layer-below output is critical.
    for l in (1, 2):
      gl = (jnp.dot(h[l], whh[l], preferred_element_type=jnp.float32)
            + b[l]
            + jnp.dot(h[l - 1], wih[l], preferred_element_type=jnp.float32))
      h[l], c[l] = _activate(gl, c[l])
    hseq.append(h[2])

  # Final hidden / cell state (mirrors self.hn / self.cn update in PyTorch).
  hn_ref[...] = jnp.concatenate(h, axis=0)
  cn_ref[...] = jnp.concatenate(c, axis=0)

  # ReLU -> Linear(14 -> 7, padded to 128 lanes) -> ReLU; one lane-dense store.
  hs = jnp.maximum(jnp.concatenate(hseq, axis=0), 0.0)        # (T, H)
  y = jnp.dot(hs, wlin_ref[...],
              preferred_element_type=jnp.float32) + blin_ref[...]
  out_ref[...] = jnp.maximum(y, 0.0)                           # (T, OUT_PAD)


def pack_params(params):
  """Canonical (PyTorch-layout) params -> padded kernel layout.

  Canonical gate order along 4H is (i, f, g, o); the kernel uses (i, f, o, g)
  with each gate padded to G=128 lanes (lane-aligned gate slicing).
  """
  perm = (0, 1, 3, 2)   # canonical gate index for internal gate slots 0..3

  def pad_gates(w):     # (rows, 4H) -> (rows, 4G)
    out = jnp.zeros((w.shape[0], 4 * G), jnp.float32)
    for j, k in enumerate(perm):
      out = out.at[:, j * G:j * G + H].set(w[:, k * H:(k + 1) * H])
    return out

  packed = {}
  for l in range(L):
    packed[f"wih{l}"] = pad_gates(params[f"wih{l}"])
    packed[f"whh{l}"] = pad_gates(params[f"whh{l}"])
    packed[f"b{l}"] = pad_gates(params[f"b{l}"])
  packed["wlin"] = jnp.zeros((H, OUT_PAD), jnp.float32).at[:, :OUT].set(params["wlin"])
  packed["blin"] = jnp.zeros((1, OUT_PAD), jnp.float32).at[:, :OUT].set(params["blin"])
  return packed


@jax.jit
def incidence_guesser_forward(x, packed, hn, cn):
  """Equivalent of incidenceGuesser.forward: returns (out, hn_new, cn_new)."""
  x2 = x.reshape(-1, IN).astype(jnp.float32)   # x.view(-1, 1, 60), batch==1 squeezed
  T = x2.shape[0]

  vmem = pl.BlockSpec(memory_space=pltpu.MemorySpace.VMEM)
  flat = (x2,
          packed["wih0"], packed["whh0"], packed["b0"],
          packed["wih1"], packed["whh1"], packed["b1"],
          packed["wih2"], packed["whh2"], packed["b2"],
          packed["wlin"], packed["blin"],
          hn, cn)

  out_pad, hn_new, cn_new = pl.pallas_call(
      incidence_kernel,
      out_shape=(jax.ShapeDtypeStruct((T, OUT_PAD), jnp.float32),
                 jax.ShapeDtypeStruct((L, H), jnp.float32),
                 jax.ShapeDtypeStruct((L, H), jnp.float32)),
      in_specs=[vmem] * len(flat),
      out_specs=(vmem, vmem, vmem),
  )(*flat)
  return out_pad[:, :OUT], hn_new, cn_new


# ----------------------------- reference & init -----------------------------

def _lstm_cell_ref(x, h, c, wih_t, whh_t, b):
  """torch.nn.LSTM cell semantics: gate order (i, f, g, o), combined bias."""
  gates = x @ wih_t + h @ whh_t + b
  i = jax.nn.sigmoid(gates[:, 0 * H:1 * H])
  f = jax.nn.sigmoid(gates[:, 1 * H:2 * H])
  g = jnp.tanh(gates[:, 2 * H:3 * H])
  o = jax.nn.sigmoid(gates[:, 3 * H:4 * H])
  c_new = f * c + i * g
  return o * jnp.tanh(c_new), c_new


def forward_ref(x, params, hn, cn):
  """Pure-JAX reference matching the PyTorch module."""
  x2 = x.reshape(-1, IN).astype(jnp.float32)
  T = x2.shape[0]
  wih = [params[f"wih{l}"] for l in range(L)]
  whh = [params[f"whh{l}"] for l in range(L)]
  bs = [params[f"b{l}"] for l in range(L)]
  h = [hn[l:l + 1, :] for l in range(L)]
  c = [cn[l:l + 1, :] for l in range(L)]
  outs = []
  for t in range(T):
    inp = x2[t:t + 1, :]
    for l in range(L):
      h[l], c[l] = _lstm_cell_ref(inp, h[l], c[l], wih[l], whh[l], bs[l])
      inp = h[l]
    hseq_t = h[-1]
    outs.append(hseq_t)
  hseq = jnp.concatenate(outs, axis=0)                  # (T, 14)
  y = jnp.maximum(hseq, 0.0) @ params["wlin"] + params["blin"]
  return jnp.maximum(y, 0.0), jnp.concatenate(h, 0), jnp.concatenate(c, 0)


def init_params(key):
  """Deterministic canonical params (PyTorch-style uniform(-1/sqrt(H), 1/sqrt(H)))."""
  bound = 1.0 / jnp.sqrt(jnp.float32(H))
  keys = jax.random.split(key, 16)
  u = lambda k, shape: jax.random.uniform(k, shape, jnp.float32, -bound, bound)
  params = {}
  in_sizes = [IN, H, H]
  ki = 0
  for l in range(L):
    # Stored pre-transposed: (in, 4H) / (H, 4H); combined bias (1,4H)=b_ih+b_hh.
    params[f"wih{l}"] = u(keys[ki], (in_sizes[l], 4 * H)); ki += 1
    params[f"whh{l}"] = u(keys[ki], (H, 4 * H)); ki += 1
    params[f"b{l}"] = u(keys[ki], (1, 4 * H)) + u(keys[ki + 1], (1, 4 * H)); ki += 2
  params["wlin"] = u(keys[ki], (H, OUT)); ki += 1
  params["blin"] = u(keys[ki], (1, OUT)); ki += 1
  return params


if __name__ == "__main__":
  key = jax.random.PRNGKey(0)
  kp, kh, kc, kx = jax.random.split(key, 4)

  params = init_params(kp)
  packed = pack_params(params)

  # Persistent LSTM state, equivalent to torch.rand(3, 1, 14) with batch squeezed.
  hn = jax.random.uniform(kh, (L, H), jnp.float32)
  cn = jax.random.uniform(kc, (L, H), jnp.float32)

  # Input: any shape whose numel is divisible by 60; forward views it as (-1, 1, 60).
  T = 8
  x = jax.random.normal(kx, (T, IN), jnp.float32)

  out, hn_new, cn_new = incidence_guesser_forward(x, packed, hn, cn)
  jax.block_until_ready((out, hn_new, cn_new))

  out_r, hn_r, cn_r = forward_ref(x, params, hn, cn)
  assert out.shape == (T, OUT)
  assert jnp.allclose(out, out_r, atol=1e-4, rtol=1e-4), "output mismatch"
  assert jnp.allclose(hn_new, hn_r, atol=1e-4, rtol=1e-4), "hn mismatch"
  assert jnp.allclose(cn_new, cn_r, atol=1e-4, rtol=1e-4), "cn mismatch"

  print("KERNEL_OK")
</pallas_src>

<mosaic_0001>
module attributes {stable_mosaic.version = 11 : i64} {
  func.func @incidence_kernel(%arg0: memref<8x60xf32, #tpu.memory_space<vmem>>, %arg1: memref<60x512xf32, #tpu.memory_space<vmem>>, %arg2: memref<14x512xf32, #tpu.memory_space<vmem>>, %arg3: memref<1x512xf32, #tpu.memory_space<vmem>>, %arg4: memref<14x512xf32, #tpu.memory_space<vmem>>, %arg5: memref<14x512xf32, #tpu.memory_space<vmem>>, %arg6: memref<1x512xf32, #tpu.memory_space<vmem>>, %arg7: memref<14x512xf32, #tpu.memory_space<vmem>>, %arg8: memref<14x512xf32, #tpu.memory_space<vmem>>, %arg9: memref<1x512xf32, #tpu.memory_space<vmem>>, %arg10: memref<14x128xf32, #tpu.memory_space<vmem>>, %arg11: memref<1x128xf32, #tpu.memory_space<vmem>>, %arg12: memref<3x14xf32, #tpu.memory_space<vmem>>, %arg13: memref<3x14xf32, #tpu.memory_space<vmem>>, %arg14: memref<8x128xf32, #tpu.memory_space<vmem>>, %arg15: memref<3x14xf32, #tpu.memory_space<vmem>>, %arg16: memref<3x14xf32, #tpu.memory_space<vmem>>) attributes {dimension_semantics = [], scalar_prefetch = 0 : i64, scratch_operands = 0 : i64, tpu.core_type = #tpu.core_type<tc>} {
    %c0 = arith.constant 0 : index
    %c0_0 = arith.constant 0 : index
    %0 = vector.load %arg0[%c0, %c0_0] : memref<8x60xf32, #tpu.memory_space<vmem>>, vector<8x60xf32>
    %c0_1 = arith.constant 0 : index
    %c0_2 = arith.constant 0 : index
    %1 = vector.load %arg1[%c0_1, %c0_2] : memref<60x512xf32, #tpu.memory_space<vmem>>, vector<60x512xf32>
    %cst = arith.constant dense<0.000000e+00> : vector<8x512xf32>
    %2 = tpu.matmul %0, %1, %cst {dimension_numbers = #tpu.dot_dimension_numbers<[1], [0], [0], [1], [0, 0, 1, 1], [], []>} : vector<8x60xf32>, vector<60x512xf32>, vector<8x512xf32> -> vector<8x512xf32>
    %c0_3 = arith.constant 0 : index
    %c0_4 = arith.constant 0 : index
    %3 = vector.load %arg3[%c0_3, %c0_4] : memref<1x512xf32, #tpu.memory_space<vmem>>, vector<1x512xf32>
    %4 = vector.broadcast %3 : vector<1x512xf32> to vector<8x512xf32>
    %5 = arith.addf %2, %4 : vector<8x512xf32>
    %c0_5 = arith.constant 0 : index
    %c0_6 = arith.constant 0 : index
    %6 = vector.load %arg2[%c0_5, %c0_6] : memref<14x512xf32, #tpu.memory_space<vmem>>, vector<14x512xf32>
    %c0_7 = arith.constant 0 : index
    %c0_8 = arith.constant 0 : index
    %7 = vector.load %arg5[%c0_7, %c0_8] : memref<14x512xf32, #tpu.memory_space<vmem>>, vector<14x512xf32>
    %c0_9 = arith.constant 0 : index
    %c0_10 = arith.constant 0 : index
    %8 = vector.load %arg8[%c0_9, %c0_10] : memref<14x512xf32, #tpu.memory_space<vmem>>, vector<14x512xf32>
    %c0_11 = arith.constant 0 : index
    %c0_12 = arith.constant 0 : index
    %9 = vector.load %arg4[%c0_11, %c0_12] : memref<14x512xf32, #tpu.memory_space<vmem>>, vector<14x512xf32>
    %c0_13 = arith.constant 0 : index
    %c0_14 = arith.constant 0 : index
    %10 = vector.load %arg7[%c0_13, %c0_14] : memref<14x512xf32, #tpu.memory_space<vmem>>, vector<14x512xf32>
    %c0_15 = arith.constant 0 : index
    %c0_16 = arith.constant 0 : index
    %11 = vector.load %arg6[%c0_15, %c0_16] : memref<1x512xf32, #tpu.memory_space<vmem>>, vector<1x512xf32>
    %c0_17 = arith.constant 0 : index
    %c0_18 = arith.constant 0 : index
    %12 = vector.load %arg9[%c0_17, %c0_18] : memref<1x512xf32, #tpu.memory_space<vmem>>, vector<1x512xf32>
    %c0_19 = arith.constant 0 : index
    %c0_20 = arith.constant 0 : index
    %13 = vector.load %arg12[%c0_19, %c0_20] : memref<3x14xf32, #tpu.memory_space<vmem>>, vector<1x14xf32>
    %c1 = arith.constant 1 : index
    %c0_21 = arith.constant 0 : index
    %14 = vector.load %arg12[%c1, %c0_21] : memref<3x14xf32, #tpu.memory_space<vmem>>, vector<1x14xf32>
    %c2 = arith.constant 2 : index
    %c0_22 = arith.constant 0 : index
    %15 = vector.load %arg12[%c2, %c0_22] : memref<3x14xf32, #tpu.memory_space<vmem>>, vector<1x14xf32>
    %c0_23 = arith.constant 0 : index
    %c0_24 = arith.constant 0 : index
    %16 = vector.load %arg13[%c0_23, %c0_24] : memref<3x14xf32, #tpu.memory_space<vmem>>, vector<1x14xf32>
    %c1_25 = arith.constant 1 : index
    %c0_26 = arith.constant 0 : index
    %17 = vector.load %arg13[%c1_25, %c0_26] : memref<3x14xf32, #tpu.memory_space<vmem>>, vector<1x14xf32>
    %c2_27 = arith.constant 2 : index
    %c0_28 = arith.constant 0 : index
    %18 = vector.load %arg13[%c2_27, %c0_28] : memref<3x14xf32, #tpu.memory_space<vmem>>, vector<1x14xf32>
    %19 = vector.extract_strided_slice %5 {offsets = [0, 0], sizes = [1, 512], strides = [1, 1]} : vector<8x512xf32> to vector<1x512xf32>
    %cst_29 = arith.constant dense<0.000000e+00> : vector<1x512xf32>
    %20 = tpu.matmul %13, %6, %cst_29 {dimension_numbers = #tpu.dot_dimension_numbers<[1], [0], [0], [1], [0, 0, 1, 1], [], []>} : vector<1x14xf32>, vector<14x512xf32>, vector<1x512xf32> -> vector<1x512xf32>
    %21 = arith.addf %19, %20 : vector<1x512xf32>
    %22 = vector.extract_strided_slice %21 {offsets = [0, 0], sizes = [1, 384], strides = [1, 1]} : vector<1x512xf32> to vector<1x384xf32>
    %23 = arith.negf %22 : vector<1x384xf32>
    %24 = math.exp %23 : vector<1x384xf32>
    %cst_30 = arith.constant 1.000000e+00 : f32
    %25 = vector.broadcast %cst_30 : f32 to vector<1x384xf32>
    %26 = arith.addf %25, %24 : vector<1x384xf32>
    %27 = arith.divf %25, %26 : vector<1x384xf32>
    %28 = vector.extract_strided_slice %27 {offsets = [0, 0], sizes = [1, 14], strides = [1, 1]} : vector<1x384xf32> to vector<1x14xf32>
    %29 = vector.extract_strided_slice %27 {offsets = [0, 128], sizes = [1, 14], strides = [1, 1]} : vector<1x384xf32> to vector<1x14xf32>
    %30 = vector.extract_strided_slice %27 {offsets = [0, 256], sizes = [1, 14], strides = [1, 1]} : vector<1x384xf32> to vector<1x14xf32>
    %31 = vector.extract_strided_slice %21 {offsets = [0, 384], sizes = [1, 14], strides = [1, 1]} : vector<1x512xf32> to vector<1x14xf32>
    %32 = math.tanh %31 : vector<1x14xf32>
    %33 = arith.mulf %29, %16 : vector<1x14xf32>
    %34 = arith.mulf %28, %32 : vector<1x14xf32>
    %35 = arith.addf %33, %34 : vector<1x14xf32>
    %36 = math.tanh %35 : vector<1x14xf32>
    %37 = arith.mulf %30, %36 : vector<1x14xf32>
    %cst_31 = arith.constant dense<0.000000e+00> : vector<1x512xf32>
    %38 = tpu.matmul %14, %7, %cst_31 {dimension_numbers = #tpu.dot_dimension_numbers<[1], [0], [0], [1], [0, 0, 1, 1], [], []>} : vector<1x14xf32>, vector<14x512xf32>, vector<1x512xf32> -> vector<1x512xf32>
    %39 = arith.addf %38, %11 : vector<1x512xf32>
    %cst_32 = arith.constant dense<0.000000e+00> : vector<1x512xf32>
    %40 = tpu.matmul %37, %9, %cst_32 {dimension_numbers = #tpu.dot_dimension_numbers<[1], [0], [0], [1], [0, 0, 1, 1], [], []>} : vector<1x14xf32>, vector<14x512xf32>, vector<1x512xf32> -> vector<1x512xf32>
    %41 = arith.addf %39, %40 : vector<1x512xf32>
    %42 = vector.extract_strided_slice %41 {offsets = [0, 0], sizes = [1, 384], strides = [1, 1]} : vector<1x512xf32> to vector<1x384xf32>
    %43 = arith.negf %42 : vector<1x384xf32>
    %44 = math.exp %43 : vector<1x384xf32>
    %cst_33 = arith.constant 1.000000e+00 : f32
    %45 = vector.broadcast %cst_33 : f32 to vector<1x384xf32>
    %46 = arith.addf %45, %44 : vector<1x384xf32>
    %47 = arith.divf %45, %46 : vector<1x384xf32>
    %48 = vector.extract_strided_slice %47 {offsets = [0, 0], sizes = [1, 14], strides = [1, 1]} : vector<1x384xf32> to vector<1x14xf32>
    %49 = vector.extract_strided_slice %47 {offsets = [0, 128], sizes = [1, 14], strides = [1, 1]} : vector<1x384xf32> to vector<1x14xf32>
    %50 = vector.extract_strided_slice %47 {offsets = [0, 256], sizes = [1, 14], strides = [1, 1]} : vector<1x384xf32> to vector<1x14xf32>
    %51 = vector.extract_strided_slice %41 {offsets = [0, 384], sizes = [1, 14], strides = [1, 1]} : vector<1x512xf32> to vector<1x14xf32>
    %52 = math.tanh %51 : vector<1x14xf32>
    %53 = arith.mulf %49, %17 : vector<1x14xf32>
    %54 = arith.mulf %48, %52 : vector<1x14xf32>
    %55 = arith.addf %53, %54 : vector<1x14xf32>
    %56 = math.tanh %55 : vector<1x14xf32>
    %57 = arith.mulf %50, %56 : vector<1x14xf32>
    %cst_34 = arith.constant dense<0.000000e+00> : vector<1x512xf32>
    %58 = tpu.matmul %15, %8, %cst_34 {dimension_numbers = #tpu.dot_dimension_numbers<[1], [0], [0], [1], [0, 0, 1, 1], [], []>} : vector<1x14xf32>, vector<14x512xf32>, vector<1x512xf32> -> vector<1x512xf32>
    %59 = arith.addf %58, %12 : vector<1x512xf32>
    %cst_35 = arith.constant dense<0.000000e+00> : vector<1x512xf32>
    %60 = tpu.matmul %57, %10, %cst_35 {dimension_numbers = #tpu.dot_dimension_numbers<[1], [0], [0], [1], [0, 0, 1, 1], [], []>} : vector<1x14xf32>, vector<14x512xf32>, vector<1x512xf32> -> vector<1x512xf32>
    %61 = arith.addf %59, %60 : vector<1x512xf32>
    %62 = vector.extract_strided_slice %61 {offsets = [0, 0], sizes = [1, 384], strides = [1, 1]} : vector<1x512xf32> to vector<1x384xf32>
    %63 = arith.negf %62 : vector<1x384xf32>
    %64 = math.exp %63 : vector<1x384xf32>
    %cst_36 = arith.constant 1.000000e+00 : f32
    %65 = vector.broadcast %cst_36 : f32 to vector<1x384xf32>
    %66 = arith.addf %65, %64 : vector<1x384xf32>
    %67 = arith.divf %65, %66 : vector<1x384xf32>
    %68 = vector.extract_strided_slice %67 {offsets = [0, 0], sizes = [1, 14], strides = [1, 1]} : vector<1x384xf32> to vector<1x14xf32>
    %69 = vector.extract_strided_slice %67 {offsets = [0, 128], sizes = [1, 14], strides = [1, 1]} : vector<1x384xf32> to vector<1x14xf32>
    %70 = vector.extract_strided_slice %67 {offsets = [0, 256], sizes = [1, 14], strides = [1, 1]} : vector<1x384xf32> to vector<1x14xf32>
    %71 = vector.extract_strided_slice %61 {offsets = [0, 384], sizes = [1, 14], strides = [1, 1]} : vector<1x512xf32> to vector<1x14xf32>
    %72 = math.tanh %71 : vector<1x14xf32>
    %73 = arith.mulf %69, %18 : vector<1x14xf32>
    %74 = arith.mulf %68, %72 : vector<1x14xf32>
    %75 = arith.addf %73, %74 : vector<1x14xf32>
    %76 = math.tanh %75 : vector<1x14xf32>
    %77 = arith.mulf %70, %76 : vector<1x14xf32>
    %78 = vector.extract_strided_slice %5 {offsets = [1, 0], sizes = [1, 512], strides = [1, 1]} : vector<8x512xf32> to vector<1x512xf32>
    %cst_37 = arith.constant dense<0.000000e+00> : vector<1x512xf32>
    %79 = tpu.matmul %37, %6, %cst_37 {dimension_numbers = #tpu.dot_dimension_numbers<[1], [0], [0], [1], [0, 0, 1, 1], [], []>} : vector<1x14xf32>, vector<14x512xf32>, vector<1x512xf32> -> vector<1x512xf32>
    %80 = arith.addf %78, %79 : vector<1x512xf32>
    %81 = vector.extract_strided_slice %80 {offsets = [0, 0], sizes = [1, 384], strides = [1, 1]} : vector<1x512xf32> to vector<1x384xf32>
    %82 = arith.negf %81 : vector<1x384xf32>
    %83 = math.exp %82 : vector<1x384xf32>
    %cst_38 = arith.constant 1.000000e+00 : f32
    %84 = vector.broadcast %cst_38 : f32 to vector<1x384xf32>
    %85 = arith.addf %84, %83 : vector<1x384xf32>
    %86 = arith.divf %84, %85 : vector<1x384xf32>
    %87 = vector.extract_strided_slice %86 {offsets = [0, 0], sizes = [1, 14], strides = [1, 1]} : vector<1x384xf32> to vector<1x14xf32>
    %88 = vector.extract_strided_slice %86 {offsets = [0, 128], sizes = [1, 14], strides = [1, 1]} : vector<1x384xf32> to vector<1x14xf32>
    %89 = vector.extract_strided_slice %86 {offsets = [0, 256], sizes = [1, 14], strides = [1, 1]} : vector<1x384xf32> to vector<1x14xf32>
    %90 = vector.extract_strided_slice %80 {offsets = [0, 384], sizes = [1, 14], strides = [1, 1]} : vector<1x512xf32> to vector<1x14xf32>
    %91 = math.tanh %90 : vector<1x14xf32>
    %92 = arith.mulf %88, %35 : vector<1x14xf32>
    %93 = arith.mulf %87, %91 : vector<1x14xf32>
    %94 = arith.addf %92, %93 : vector<1x14xf32>
    %95 = math.tanh %94 : vector<1x14xf32>
    %96 = arith.mulf %89, %95 : vector<1x14xf32>
    %cst_39 = arith.constant dense<0.000000e+00> : vector<1x512xf32>
    %97 = tpu.matmul %57, %7, %cst_39 {dimension_numbers = #tpu.dot_dimension_numbers<[1], [0], [0], [1], [0, 0, 1, 1], [], []>} : vector<1x14xf32>, vector<14x512xf32>, vector<1x512xf32> -> vector<1x512xf32>
    %98 = arith.addf %97, %11 : vector<1x512xf32>
    %cst_40 = arith.constant dense<0.000000e+00> : vector<1x512xf32>
    %99 = tpu.matmul %96, %9, %cst_40 {dimension_numbers = #tpu.dot_dimension_numbers<[1], [0], [0], [1], [0, 0, 1, 1], [], []>} : vector<1x14xf32>, vector<14x512xf32>, vector<1x512xf32> -> vector<1x512xf32>
    %100 = arith.addf %98, %99 : vector<1x512xf32>
    %101 = vector.extract_strided_slice %100 {offsets = [0, 0], sizes = [1, 384], strides = [1, 1]} : vector<1x512xf32> to vector<1x384xf32>
    %102 = arith.negf %101 : vector<1x384xf32>
    %103 = math.exp %102 : vector<1x384xf32>
    %cst_41 = arith.constant 1.000000e+00 : f32
    %104 = vector.broadcast %cst_41 : f32 to vector<1x384xf32>
    %105 = arith.addf %104, %103 : vector<1x384xf32>
    %106 = arith.divf %104, %105 : vector<1x384xf32>
    %107 = vector.extract_strided_slice %106 {offsets = [0, 0], sizes = [1, 14], strides = [1, 1]} : vector<1x384xf32> to vector<1x14xf32>
    %108 = vector.extract_strided_slice %106 {offsets = [0, 128], sizes = [1, 14], strides = [1, 1]} : vector<1x384xf32> to vector<1x14xf32>
    %109 = vector.extract_strided_slice %106 {offsets = [0, 256], sizes = [1, 14], strides = [1, 1]} : vector<1x384xf32> to vector<1x14xf32>
    %110 = vector.extract_strided_slice %100 {offsets = [0, 384], sizes = [1, 14], strides = [1, 1]} : vector<1x512xf32> to vector<1x14xf32>
    %111 = math.tanh %110 : vector<1x14xf32>
    %112 = arith.mulf %108, %55 : vector<1x14xf32>
    %113 = arith.mulf %107, %111 : vector<1x14xf32>
    %114 = arith.addf %112, %113 : vector<1x14xf32>
    %115 = math.tanh %114 : vector<1x14xf32>
    %116 = arith.mulf %109, %115 : vector<1x14xf32>
    %cst_42 = arith.constant dense<0.000000e+00> : vector<1x512xf32>
    %117 = tpu.matmul %77, %8, %cst_42 {dimension_numbers = #tpu.dot_dimension_numbers<[1], [0], [0], [1], [0, 0, 1, 1], [], []>} : vector<1x14xf32>, vector<14x512xf32>, vector<1x512xf32> -> vector<1x512xf32>
    %118 = arith.addf %117, %12 : vector<1x512xf32>
    %cst_43 = arith.constant dense<0.000000e+00> : vector<1x512xf32>
    %119 = tpu.matmul %116, %10, %cst_43 {dimension_numbers = #tpu.dot_dimension_numbers<[1], [0], [0], [1], [0, 0, 1, 1], [], []>} : vector<1x14xf32>, vector<14x512xf32>, vector<1x512xf32> -> vector<1x512xf32>
    %120 = arith.addf %118, %119 : vector<1x512xf32>
    %121 = vector.extract_strided_slice %120 {offsets = [0, 0], sizes = [1, 384], strides = [1, 1]} : vector<1x512xf32> to vector<1x384xf32>
    %122 = arith.negf %121 : vector<1x384xf32>
    %123 = math.exp %122 : vector<1x384xf32>
    %cst_44 = arith.constant 1.000000e+00 : f32
    %124 = vector.broadcast %cst_44 : f32 to vector<1x384xf32>
    %125 = arith.addf %124, %123 : vector<1x384xf32>
    %126 = arith.divf %124, %125 : vector<1x384xf32>
    %127 = vector.extract_strided_slice %126 {offsets = [0, 0], sizes = [1, 14], strides = [1, 1]} : vector<1x384xf32> to vector<1x14xf32>
    %128 = vector.extract_strided_slice %126 {offsets = [0, 128], sizes = [1, 14], strides = [1, 1]} : vector<1x384xf32> to vector<1x14xf32>
    %129 = vector.extract_strided_slice %126 {offsets = [0, 256], sizes = [1, 14], strides = [1, 1]} : vector<1x384xf32> to vector<1x14xf32>
    %130 = vector.extract_strided_slice %120 {offsets = [0, 384], sizes = [1, 14], strides = [1, 1]} : vector<1x512xf32> to vector<1x14xf32>
    %131 = math.tanh %130 : vector<1x14xf32>
    %132 = arith.mulf %128, %75 : vector<1x14xf32>
    %133 = arith.mulf %127, %131 : vector<1x14xf32>
    %134 = arith.addf %132, %133 : vector<1x14xf32>
    %135 = math.tanh %134 : vector<1x14xf32>
    %136 = arith.mulf %129, %135 : vector<1x14xf32>
    %137 = vector.extract_strided_slice %5 {offsets = [2, 0], sizes = [1, 512], strides = [1, 1]} : vector<8x512xf32> to vector<1x512xf32>
    %cst_45 = arith.constant dense<0.000000e+00> : vector<1x512xf32>
    %138 = tpu.matmul %96, %6, %cst_45 {dimension_numbers = #tpu.dot_dimension_numbers<[1], [0], [0], [1], [0, 0, 1, 1], [], []>} : vector<1x14xf32>, vector<14x512xf32>, vector<1x512xf32> -> vector<1x512xf32>
    %139 = arith.addf %137, %138 : vector<1x512xf32>
    %140 = vector.extract_strided_slice %139 {offsets = [0, 0], sizes = [1, 384], strides = [1, 1]} : vector<1x512xf32> to vector<1x384xf32>
    %141 = arith.negf %140 : vector<1x384xf32>
    %142 = math.exp %141 : vector<1x384xf32>
    %cst_46 = arith.constant 1.000000e+00 : f32
    %143 = vector.broadcast %cst_46 : f32 to vector<1x384xf32>
    %144 = arith.addf %143, %142 : vector<1x384xf32>
    %145 = arith.divf %143, %144 : vector<1x384xf32>
    %146 = vector.extract_strided_slice %145 {offsets = [0, 0], sizes = [1, 14], strides = [1, 1]} : vector<1x384xf32> to vector<1x14xf32>
    %147 = vector.extract_strided_slice %145 {offsets = [0, 128], sizes = [1, 14], strides = [1, 1]} : vector<1x384xf32> to vector<1x14xf32>
    %148 = vector.extract_strided_slice %145 {offsets = [0, 256], sizes = [1, 14], strides = [1, 1]} : vector<1x384xf32> to vector<1x14xf32>
    %149 = vector.extract_strided_slice %139 {offsets = [0, 384], sizes = [1, 14], strides = [1, 1]} : vector<1x512xf32> to vector<1x14xf32>
    %150 = math.tanh %149 : vector<1x14xf32>
    %151 = arith.mulf %147, %94 : vector<1x14xf32>
    %152 = arith.mulf %146, %150 : vector<1x14xf32>
    %153 = arith.addf %151, %152 : vector<1x14xf32>
    %154 = math.tanh %153 : vector<1x14xf32>
    %155 = arith.mulf %148, %154 : vector<1x14xf32>
    %cst_47 = arith.constant dense<0.000000e+00> : vector<1x512xf32>
    %156 = tpu.matmul %116, %7, %cst_47 {dimension_numbers = #tpu.dot_dimension_numbers<[1], [0], [0], [1], [0, 0, 1, 1], [], []>} : vector<1x14xf32>, vector<14x512xf32>, vector<1x512xf32> -> vector<1x512xf32>
    %157 = arith.addf %156, %11 : vector<1x512xf32>
    %cst_48 = arith.constant dense<0.000000e+00> : vector<1x512xf32>
    %158 = tpu.matmul %155, %9, %cst_48 {dimension_numbers = #tpu.dot_dimension_numbers<[1], [0], [0], [1], [0, 0, 1, 1], [], []>} : vector<1x14xf32>, vector<14x512xf32>, vector<1x512xf32> -> vector<1x512xf32>
    %159 = arith.addf %157, %158 : vector<1x512xf32>
    %160 = vector.extract_strided_slice %159 {offsets = [0, 0], sizes = [1, 384], strides = [1, 1]} : vector<1x512xf32> to vector<1x384xf32>
    %161 = arith.negf %160 : vector<1x384xf32>
    %162 = math.exp %161 : vector<1x384xf32>
    %cst_49 = arith.constant 1.000000e+00 : f32
    %163 = vector.broadcast %cst_49 : f32 to vector<1x384xf32>
    %164 = arith.addf %163, %162 : vector<1x384xf32>
    %165 = arith.divf %163, %164 : vector<1x384xf32>
    %166 = vector.extract_strided_slice %165 {offsets = [0, 0], sizes = [1, 14], strides = [1, 1]} : vector<1x384xf32> to vector<1x14xf32>
    %167 = vector.extract_strided_slice %165 {offsets = [0, 128], sizes = [1, 14], strides = [1, 1]} : vector<1x384xf32> to vector<1x14xf32>
    %168 = vector.extract_strided_slice %165 {offsets = [0, 256], sizes = [1, 14], strides = [1, 1]} : vector<1x384xf32> to vector<1x14xf32>
    %169 = vector.extract_strided_slice %159 {offsets = [0, 384], sizes = [1, 14], strides = [1, 1]} : vector<1x512xf32> to vector<1x14xf32>
    %170 = math.tanh %169 : vector<1x14xf32>
    %171 = arith.mulf %167, %114 : vector<1x14xf32>
    %172 = arith.mulf %166, %170 : vector<1x14xf32>
    %173 = arith.addf %171, %172 : vector<1x14xf32>
    %174 = math.tanh %173 : vector<1x14xf32>
    %175 = arith.mulf %168, %174 : vector<1x14xf32>
    %cst_50 = arith.constant dense<0.000000e+00> : vector<1x512xf32>
    %176 = tpu.matmul %136, %8, %cst_50 {dimension_numbers = #tpu.dot_dimension_numbers<[1], [0], [0], [1], [0, 0, 1, 1], [], []>} : vector<1x14xf32>, vector<14x512xf32>, vector<1x512xf32> -> vector<1x512xf32>
    %177 = arith.addf %176, %12 : vector<1x512xf32>
    %cst_51 = arith.constant dense<0.000000e+00> : vector<1x512xf32>
    %178 = tpu.matmul %175, %10, %cst_51 {dimension_numbers = #tpu.dot_dimension_numbers<[1], [0], [0], [1], [0, 0, 1, 1], [], []>} : vector<1x14xf32>, vector<14x512xf32>, vector<1x512xf32> -> vector<1x512xf32>
    %179 = arith.addf %177, %178 : vector<1x512xf32>
    %180 = vector.extract_strided_slice %179 {offsets = [0, 0], sizes = [1, 384], strides = [1, 1]} : vector<1x512xf32> to vector<1x384xf32>
    %181 = arith.negf %180 : vector<1x384xf32>
    %182 = math.exp %181 : vector<1x384xf32>
    %cst_52 = arith.constant 1.000000e+00 : f32
    %183 = vector.broadcast %cst_52 : f32 to vector<1x384xf32>
    %184 = arith.addf %183, %182 : vector<1x384xf32>
    %185 = arith.divf %183, %184 : vector<1x384xf32>
    %186 = vector.extract_strided_slice %185 {offsets = [0, 0], sizes = [1, 14], strides = [1, 1]} : vector<1x384xf32> to vector<1x14xf32>
    %187 = vector.extract_strided_slice %185 {offsets = [0, 128], sizes = [1, 14], strides = [1, 1]} : vector<1x384xf32> to vector<1x14xf32>
    %188 = vector.extract_strided_slice %185 {offsets = [0, 256], sizes = [1, 14], strides = [1, 1]} : vector<1x384xf32> to vector<1x14xf32>
    %189 = vector.extract_strided_slice %179 {offsets = [0, 384], sizes = [1, 14], strides = [1, 1]} : vector<1x512xf32> to vector<1x14xf32>
    %190 = math.tanh %189 : vector<1x14xf32>
    %191 = arith.mulf %187, %134 : vector<1x14xf32>
    %192 = arith.mulf %186, %190 : vector<1x14xf32>
    %193 = arith.addf %191, %192 : vector<1x14xf32>
    %194 = math.tanh %193 : vector<1x14xf32>
    %195 = arith.mulf %188, %194 : vector<1x14xf32>
    %196 = vector.extract_strided_slice %5 {offsets = [3, 0], sizes = [1, 512], strides = [1, 1]} : vector<8x512xf32> to vector<1x512xf32>
    %cst_53 = arith.constant dense<0.000000e+00> : vector<1x512xf32>
    %197 = tpu.matmul %155, %6, %cst_53 {dimension_numbers = #tpu.dot_dimension_numbers<[1], [0], [0], [1], [0, 0, 1, 1], [], []>} : vector<1x14xf32>, vector<14x512xf32>, vector<1x512xf32> -> vector<1x512xf32>
    %198 = arith.addf %196, %197 : vector<1x512xf32>
    %199 = vector.extract_strided_slice %198 {offsets = [0, 0], sizes = [1, 384], strides = [1, 1]} : vector<1x512xf32> to vector<1x384xf32>
    %200 = arith.negf %199 : vector<1x384xf32>
    %201 = math.exp %200 : vector<1x384xf32>
    %cst_54 = arith.constant 1.000000e+00 : f32
    %202 = vector.broadcast %cst_54 : f32 to vector<1x384xf32>
    %203 = arith.addf %202, %201 : vector<1x384xf32>
    %204 = arith.divf %202, %203 : vector<1x384xf32>
    %205 = vector.extract_strided_slice %204 {offsets = [0, 0], sizes = [1, 14], strides = [1, 1]} : vector<1x384xf32> to vector<1x14xf32>
    %206 = vector.extract_strided_slice %204 {offsets = [0, 128], sizes = [1, 14], strides = [1, 1]} : vector<1x384xf32> to vector<1x14xf32>
    %207 = vector.extract_strided_slice %204 {offsets = [0, 256], sizes = [1, 14], strides = [1, 1]} : vector<1x384xf32> to vector<1x14xf32>
    %208 = vector.extract_strided_slice %198 {offsets = [0, 384], sizes = [1, 14], strides = [1, 1]} : vector<1x512xf32> to vector<1x14xf32>
    %209 = math.tanh %208 : vector<1x14xf32>
    %210 = arith.mulf %206, %153 : vector<1x14xf32>
    %211 = arith.mulf %205, %209 : vector<1x14xf32>
    %212 = arith.addf %210, %211 : vector<1x14xf32>
    %213 = math.tanh %212 : vector<1x14xf32>
    %214 = arith.mulf %207, %213 : vector<1x14xf32>
    %cst_55 = arith.constant dense<0.000000e+00> : vector<1x512xf32>
    %215 = tpu.matmul %175, %7, %cst_55 {dimension_numbers = #tpu.dot_dimension_numbers<[1], [0], [0], [1], [0, 0, 1, 1], [], []>} : vector<1x14xf32>, vector<14x512xf32>, vector<1x512xf32> -> vector<1x512xf32>
    %216 = arith.addf %215, %11 : vector<1x512xf32>
    %cst_56 = arith.constant dense<0.000000e+00> : vector<1x512xf32>
    %217 = tpu.matmul %214, %9, %cst_56 {dimension_numbers = #tpu.dot_dimension_numbers<[1], [0], [0], [1], [0, 0, 1, 1], [], []>} : vector<1x14xf32>, vector<14x512xf32>, vector<1x512xf32> -> vector<1x512xf32>
    %218 = arith.addf %216, %217 : vector<1x512xf32>
    %219 = vector.extract_strided_slice %218 {offsets = [0, 0], sizes = [1, 384], strides = [1, 1]} : vector<1x512xf32> to vector<1x384xf32>
    %220 = arith.negf %219 : vector<1x384xf32>
    %221 = math.exp %220 : vector<1x384xf32>
    %cst_57 = arith.constant 1.000000e+00 : f32
    %222 = vector.broadcast %cst_57 : f32 to vector<1x384xf32>
    %223 = arith.addf %222, %221 : vector<1x384xf32>
    %224 = arith.divf %222, %223 : vector<1x384xf32>
    %225 = vector.extract_strided_slice %224 {offsets = [0, 0], sizes = [1, 14], strides = [1, 1]} : vector<1x384xf32> to vector<1x14xf32>
    %226 = vector.extract_strided_slice %224 {offsets = [0, 128], sizes = [1, 14], strides = [1, 1]} : vector<1x384xf32> to vector<1x14xf32>
    %227 = vector.extract_strided_slice %224 {offsets = [0, 256], sizes = [1, 14], strides = [1, 1]} : vector<1x384xf32> to vector<1x14xf32>
    %228 = vector.extract_strided_slice %218 {offsets = [0, 384], sizes = [1, 14], strides = [1, 1]} : vector<1x512xf32> to vector<1x14xf32>
    %229 = math.tanh %228 : vector<1x14xf32>
    %230 = arith.mulf %226, %173 : vector<1x14xf32>
    %231 = arith.mulf %225, %229 : vector<1x14xf32>
    %232 = arith.addf %230, %231 : vector<1x14xf32>
    %233 = math.tanh %232 : vector<1x14xf32>
    %234 = arith.mulf %227, %233 : vector<1x14xf32>
    %cst_58 = arith.constant dense<0.000000e+00> : vector<1x512xf32>
    %235 = tpu.matmul %195, %8, %cst_58 {dimension_numbers = #tpu.dot_dimension_numbers<[1], [0], [0], [1], [0, 0, 1, 1], [], []>} : vector<1x14xf32>, vector<14x512xf32>, vector<1x512xf32> -> vector<1x512xf32>
    %236 = arith.addf %235, %12 : vector<1x512xf32>
    %cst_59 = arith.constant dense<0.000000e+00> : vector<1x512xf32>
    %237 = tpu.matmul %234, %10, %cst_59 {dimension_numbers = #tpu.dot_dimension_numbers<[1], [0], [0], [1], [0, 0, 1, 1], [], []>} : vector<1x14xf32>, vector<14x512xf32>, vector<1x512xf32> -> vector<1x512xf32>
    %238 = arith.addf %236, %237 : vector<1x512xf32>
    %239 = vector.extract_strided_slice %238 {offsets = [0, 0], sizes = [1, 384], strides = [1, 1]} : vector<1x512xf32> to vector<1x384xf32>
    %240 = arith.negf %239 : vector<1x384xf32>
    %241 = math.exp %240 : vector<1x384xf32>
    %cst_60 = arith.constant 1.000000e+00 : f32
    %242 = vector.broadcast %cst_60 : f32 to vector<1x384xf32>
    %243 = arith.addf %242, %241 : vector<1x384xf32>
    %244 = arith.divf %242, %243 : vector<1x384xf32>
    %245 = vector.extract_strided_slice %244 {offsets = [0, 0], sizes = [1, 14], strides = [1, 1]} : vector<1x384xf32> to vector<1x14xf32>
    %246 = vector.extract_strided_slice %244 {offsets = [0, 128], sizes = [1, 14], strides = [1, 1]} : vector<1x384xf32> to vector<1x14xf32>
    %247 = vector.extract_strided_slice %244 {offsets = [0, 256], sizes = [1, 14], strides = [1, 1]} : vector<1x384xf32> to vector<1x14xf32>
    %248 = vector.extract_strided_slice %238 {offsets = [0, 384], sizes = [1, 14], strides = [1, 1]} : vector<1x512xf32> to vector<1x14xf32>
    %249 = math.tanh %248 : vector<1x14xf32>
    %250 = arith.mulf %246, %193 : vector<1x14xf32>
    %251 = arith.mulf %245, %249 : vector<1x14xf32>
    %252 = arith.addf %250, %251 : vector<1x14xf32>
    %253 = math.tanh %252 : vector<1x14xf32>
    %254 = arith.mulf %247, %253 : vector<1x14xf32>
    %255 = vector.extract_strided_slice %5 {offsets = [4, 0], sizes = [1, 512], strides = [1, 1]} : vector<8x512xf32> to vector<1x512xf32>
    %cst_61 = arith.constant dense<0.000000e+00> : vector<1x512xf32>
    %256 = tpu.matmul %214, %6, %cst_61 {dimension_numbers = #tpu.dot_dimension_numbers<[1], [0], [0], [1], [0, 0, 1, 1], [], []>} : vector<1x14xf32>, vector<14x512xf32>, vector<1x512xf32> -> vector<1x512xf32>
    %257 = arith.addf %255, %256 : vector<1x512xf32>
    %258 = vector.extract_strided_slice %257 {offsets = [0, 0], sizes = [1, 384], strides = [1, 1]} : vector<1x512xf32> to vector<1x384xf32>
    %259 = arith.negf %258 : vector<1x384xf32>
    %260 = math.exp %259 : vector<1x384xf32>
    %cst_62 = arith.constant 1.000000e+00 : f32
    %261 = vector.broadcast %cst_62 : f32 to vector<1x384xf32>
    %262 = arith.addf %261, %260 : vector<1x384xf32>
    %263 = arith.divf %261, %262 : vector<1x384xf32>
    %264 = vector.extract_strided_slice %263 {offsets = [0, 0], sizes = [1, 14], strides = [1, 1]} : vector<1x384xf32> to vector<1x14xf32>
    %265 = vector.extract_strided_slice %263 {offsets = [0, 128], sizes = [1, 14], strides = [1, 1]} : vector<1x384xf32> to vector<1x14xf32>
    %266 = vector.extract_strided_slice %263 {offsets = [0, 256], sizes = [1, 14], strides = [1, 1]} : vector<1x384xf32> to vector<1x14xf32>
    %267 = vector.extract_strided_slice %257 {offsets = [0, 384], sizes = [1, 14], strides = [1, 1]} : vector<1x512xf32> to vector<1x14xf32>
    %268 = math.tanh %267 : vector<1x14xf32>
    %269 = arith.mulf %265, %212 : vector<1x14xf32>
    %270 = arith.mulf %264, %268 : vector<1x14xf32>
    %271 = arith.addf %269, %270 : vector<1x14xf32>
    %272 = math.tanh %271 : vector<1x14xf32>
    %273 = arith.mulf %266, %272 : vector<1x14xf32>
    %cst_63 = arith.constant dense<0.000000e+00> : vector<1x512xf32>
    %274 = tpu.matmul %234, %7, %cst_63 {dimension_numbers = #tpu.dot_dimension_numbers<[1], [0], [0], [1], [0, 0, 1, 1], [], []>} : vector<1x14xf32>, vector<14x512xf32>, vector<1x512xf32> -> vector<1x512xf32>
    %275 = arith.addf %274, %11 : vector<1x512xf32>
    %cst_64 = arith.constant dense<0.000000e+00> : vector<1x512xf32>
    %276 = tpu.matmul %273, %9, %cst_64 {dimension_numbers = #tpu.dot_dimension_numbers<[1], [0], [0], [1], [0, 0, 1, 1], [], []>} : vector<1x14xf32>, vector<14x512xf32>, vector<1x512xf32> -> vector<1x512xf32>
    %277 = arith.addf %275, %276 : vector<1x512xf32>
    %278 = vector.extract_strided_slice %277 {offsets = [0, 0], sizes = [1, 384], strides = [1, 1]} : vector<1x512xf32> to vector<1x384xf32>
    %279 = arith.negf %278 : vector<1x384xf32>
    %280 = math.exp %279 : vector<1x384xf32>
    %cst_65 = arith.constant 1.000000e+00 : f32
    %281 = vector.broadcast %cst_65 : f32 to vector<1x384xf32>
    %282 = arith.addf %281, %280 : vector<1x384xf32>
    %283 = arith.divf %281, %282 : vector<1x384xf32>
    %284 = vector.extract_strided_slice %283 {offsets = [0, 0], sizes = [1, 14], strides = [1, 1]} : vector<1x384xf32> to vector<1x14xf32>
    %285 = vector.extract_strided_slice %283 {offsets = [0, 128], sizes = [1, 14], strides = [1, 1]} : vector<1x384xf32> to vector<1x14xf32>
    %286 = vector.extract_strided_slice %283 {offsets = [0, 256], sizes = [1, 14], strides = [1, 1]} : vector<1x384xf32> to vector<1x14xf32>
    %287 = vector.extract_strided_slice %277 {offsets = [0, 384], sizes = [1, 14], strides = [1, 1]} : vector<1x512xf32> to vector<1x14xf32>
    %288 = math.tanh %287 : vector<1x14xf32>
    %289 = arith.mulf %285, %232 : vector<1x14xf32>
    %290 = arith.mulf %284, %288 : vector<1x14xf32>
    %291 = arith.addf %289, %290 : vector<1x14xf32>
    %292 = math.tanh %291 : vector<1x14xf32>
    %293 = arith.mulf %286, %292 : vector<1x14xf32>
    %cst_66 = arith.constant dense<0.000000e+00> : vector<1x512xf32>
    %294 = tpu.matmul %254, %8, %cst_66 {dimension_numbers = #tpu.dot_dimension_numbers<[1], [0], [0], [1], [0, 0, 1, 1], [], []>} : vector<1x14xf32>, vector<14x512xf32>, vector<1x512xf32> -> vector<1x512xf32>
    %295 = arith.addf %294, %12 : vector<1x512xf32>
    %cst_67 = arith.constant dense<0.000000e+00> : vector<1x512xf32>
    %296 = tpu.matmul %293, %10, %cst_67 {dimension_numbers = #tpu.dot_dimension_numbers<[1], [0], [0], [1], [0, 0, 1, 1], [], []>} : vector<1x14xf32>, vector<14x512xf32>, vector<1x512xf32> -> vector<1x512xf32>
    %297 = arith.addf %295, %296 : vector<1x512xf32>
    %298 = vector.extract_strided_slice %297 {offsets = [0, 0], sizes = [1, 384], strides = [1, 1]} : vector<1x512xf32> to vector<1x384xf32>
    %299 = arith.negf %298 : vector<1x384xf32>
    %300 = math.exp %299 : vector<1x384xf32>
    %cst_68 = arith.constant 1.000000e+00 : f32
    %301 = vector.broadcast %cst_68 : f32 to vector<1x384xf32>
    %302 = arith.addf %301, %300 : vector<1x384xf32>
    %303 = arith.divf %301, %302 : vector<1x384xf32>
    %304 = vector.extract_strided_slice %303 {offsets = [0, 0], sizes = [1, 14], strides = [1, 1]} : vector<1x384xf32> to vector<1x14xf32>
    %305 = vector.extract_strided_slice %303 {offsets = [0, 128], sizes = [1, 14], strides = [1, 1]} : vector<1x384xf32> to vector<1x14xf32>
    %306 = vector.extract_strided_slice %303 {offsets = [0, 256], sizes = [1, 14], strides = [1, 1]} : vector<1x384xf32> to vector<1x14xf32>
    %307 = vector.extract_strided_slice %297 {offsets = [0, 384], sizes = [1, 14], strides = [1, 1]} : vector<1x512xf32> to vector<1x14xf32>
    %308 = math.tanh %307 : vector<1x14xf32>
    %309 = arith.mulf %305, %252 : vector<1x14xf32>
    %310 = arith.mulf %304, %308 : vector<1x14xf32>
    %311 = arith.addf %309, %310 : vector<1x14xf32>
    %312 = math.tanh %311 : vector<1x14xf32>
    %313 = arith.mulf %306, %312 : vector<1x14xf32>
    %314 = vector.extract_strided_slice %5 {offsets = [5, 0], sizes = [1, 512], strides = [1, 1]} : vector<8x512xf32> to vector<1x512xf32>
    %cst_69 = arith.constant dense<0.000000e+00> : vector<1x512xf32>
    %315 = tpu.matmul %273, %6, %cst_69 {dimension_numbers = #tpu.dot_dimension_numbers<[1], [0], [0], [1], [0, 0, 1, 1], [], []>} : vector<1x14xf32>, vector<14x512xf32>, vector<1x512xf32> -> vector<1x512xf32>
    %316 = arith.addf %314, %315 : vector<1x512xf32>
    %317 = vector.extract_strided_slice %316 {offsets = [0, 0], sizes = [1, 384], strides = [1, 1]} : vector<1x512xf32> to vector<1x384xf32>
    %318 = arith.negf %317 : vector<1x384xf32>
    %319 = math.exp %318 : vector<1x384xf32>
    %cst_70 = arith.constant 1.000000e+00 : f32
    %320 = vector.broadcast %cst_70 : f32 to vector<1x384xf32>
    %321 = arith.addf %320, %319 : vector<1x384xf32>
    %322 = arith.divf %320, %321 : vector<1x384xf32>
    %323 = vector.extract_strided_slice %322 {offsets = [0, 0], sizes = [1, 14], strides = [1, 1]} : vector<1x384xf32> to vector<1x14xf32>
    %324 = vector.extract_strided_slice %322 {offsets = [0, 128], sizes = [1, 14], strides = [1, 1]} : vector<1x384xf32> to vector<1x14xf32>
    %325 = vector.extract_strided_slice %322 {offsets = [0, 256], sizes = [1, 14], strides = [1, 1]} : vector<1x384xf32> to vector<1x14xf32>
    %326 = vector.extract_strided_slice %316 {offsets = [0, 384], sizes = [1, 14], strides = [1, 1]} : vector<1x512xf32> to vector<1x14xf32>
    %327 = math.tanh %326 : vector<1x14xf32>
    %328 = arith.mulf %324, %271 : vector<1x14xf32>
    %329 = arith.mulf %323, %327 : vector<1x14xf32>
    %330 = arith.addf %328, %329 : vector<1x14xf32>
    %331 = math.tanh %330 : vector<1x14xf32>
    %332 = arith.mulf %325, %331 : vector<1x14xf32>
    %cst_71 = arith.constant dense<0.000000e+00> : vector<1x512xf32>
    %333 = tpu.matmul %293, %7, %cst_71 {dimension_numbers = #tpu.dot_dimension_numbers<[1], [0], [0], [1], [0, 0, 1, 1], [], []>} : vector<1x14xf32>, vector<14x512xf32>, vector<1x512xf32> -> vector<1x512xf32>
    %334 = arith.addf %333, %11 : vector<1x512xf32>
    %cst_72 = arith.constant dense<0.000000e+00> : vector<1x512xf32>
    %335 = tpu.matmul %332, %9, %cst_72 {dimension_numbers = #tpu.dot_dimension_numbers<[1], [0], [0], [1], [0, 0, 1, 1], [], []>} : vector<1x14xf32>, vector<14x512xf32>, vector<1x512xf32> -> vector<1x512xf32>
    %336 = arith.addf %334, %335 : vector<1x512xf32>
    %337 = vector.extract_strided_slice %336 {offsets = [0, 0], sizes = [1, 384], strides = [1, 1]} : vector<1x512xf32> to vector<1x384xf32>
    %338 = arith.negf %337 : vector<1x384xf32>
    %339 = math.exp %338 : vector<1x384xf32>
    %cst_73 = arith.constant 1.000000e+00 : f32
    %340 = vector.broadcast %cst_73 : f32 to vector<1x384xf32>
    %341 = arith.addf %340, %339 : vector<1x384xf32>
    %342 = arith.divf %340, %341 : vector<1x384xf32>
    %343 = vector.extract_strided_slice %342 {offsets = [0, 0], sizes = [1, 14], strides = [1, 1]} : vector<1x384xf32> to vector<1x14xf32>
    %344 = vector.extract_strided_slice %342 {offsets = [0, 128], sizes = [1, 14], strides = [1, 1]} : vector<1x384xf32> to vector<1x14xf32>
    %345 = vector.extract_strided_slice %342 {offsets = [0, 256], sizes = [1, 14], strides = [1, 1]} : vector<1x384xf32> to vector<1x14xf32>
    %346 = vector.extract_strided_slice %336 {offsets = [0, 384], sizes = [1, 14], strides = [1, 1]} : vector<1x512xf32> to vector<1x14xf32>
    %347 = math.tanh %346 : vector<1x14xf32>
    %348 = arith.mulf %344, %291 : vector<1x14xf32>
    %349 = arith.mulf %343, %347 : vector<1x14xf32>
    %350 = arith.addf %348, %349 : vector<1x14xf32>
    %351 = math.tanh %350 : vector<1x14xf32>
    %352 = arith.mulf %345, %351 : vector<1x14xf32>
    %cst_74 = arith.constant dense<0.000000e+00> : vector<1x512xf32>
    %353 = tpu.matmul %313, %8, %cst_74 {dimension_numbers = #tpu.dot_dimension_numbers<[1], [0], [0], [1], [0, 0, 1, 1], [], []>} : vector<1x14xf32>, vector<14x512xf32>, vector<1x512xf32> -> vector<1x512xf32>
    %354 = arith.addf %353, %12 : vector<1x512xf32>
    %cst_75 = arith.constant dense<0.000000e+00> : vector<1x512xf32>
    %355 = tpu.matmul %352, %10, %cst_75 {dimension_numbers = #tpu.dot_dimension_numbers<[1], [0], [0], [1], [0, 0, 1, 1], [], []>} : vector<1x14xf32>, vector<14x512xf32>, vector<1x512xf32> -> vector<1x512xf32>
    %356 = arith.addf %354, %355 : vector<1x512xf32>
    %357 = vector.extract_strided_slice %356 {offsets = [0, 0], sizes = [1, 384], strides = [1, 1]} : vector<1x512xf32> to vector<1x384xf32>
    %358 = arith.negf %357 : vector<1x384xf32>
    %359 = math.exp %358 : vector<1x384xf32>
    %cst_76 = arith.constant 1.000000e+00 : f32
    %360 = vector.broadcast %cst_76 : f32 to vector<1x384xf32>
    %361 = arith.addf %360, %359 : vector<1x384xf32>
    %362 = arith.divf %360, %361 : vector<1x384xf32>
    %363 = vector.extract_strided_slice %362 {offsets = [0, 0], sizes = [1, 14], strides = [1, 1]} : vector<1x384xf32> to vector<1x14xf32>
    %364 = vector.extract_strided_slice %362 {offsets = [0, 128], sizes = [1, 14], strides = [1, 1]} : vector<1x384xf32> to vector<1x14xf32>
    %365 = vector.extract_strided_slice %362 {offsets = [0, 256], sizes = [1, 14], strides = [1, 1]} : vector<1x384xf32> to vector<1x14xf32>
    %366 = vector.extract_strided_slice %356 {offsets = [0, 384], sizes = [1, 14], strides = [1, 1]} : vector<1x512xf32> to vector<1x14xf32>
    %367 = math.tanh %366 : vector<1x14xf32>
    %368 = arith.mulf %364, %311 : vector<1x14xf32>
    %369 = arith.mulf %363, %367 : vector<1x14xf32>
    %370 = arith.addf %368, %369 : vector<1x14xf32>
    %371 = math.tanh %370 : vector<1x14xf32>
    %372 = arith.mulf %365, %371 : vector<1x14xf32>
    %373 = vector.extract_strided_slice %5 {offsets = [6, 0], sizes = [1, 512], strides = [1, 1]} : vector<8x512xf32> to vector<1x512xf32>
    %cst_77 = arith.constant dense<0.000000e+00> : vector<1x512xf32>
    %374 = tpu.matmul %332, %6, %cst_77 {dimension_numbers = #tpu.dot_dimension_numbers<[1], [0], [0], [1], [0, 0, 1, 1], [], []>} : vector<1x14xf32>, vector<14x512xf32>, vector<1x512xf32> -> vector<1x512xf32>
    %375 = arith.addf %373, %374 : vector<1x512xf32>
    %376 = vector.extract_strided_slice %375 {offsets = [0, 0], sizes = [1, 384], strides = [1, 1]} : vector<1x512xf32> to vector<1x384xf32>
    %377 = arith.negf %376 : vector<1x384xf32>
    %378 = math.exp %377 : vector<1x384xf32>
    %cst_78 = arith.constant 1.000000e+00 : f32
    %379 = vector.broadcast %cst_78 : f32 to vector<1x384xf32>
    %380 = arith.addf %379, %378 : vector<1x384xf32>
    %381 = arith.divf %379, %380 : vector<1x384xf32>
    %382 = vector.extract_strided_slice %381 {offsets = [0, 0], sizes = [1, 14], strides = [1, 1]} : vector<1x384xf32> to vector<1x14xf32>
    %383 = vector.extract_strided_slice %381 {offsets = [0, 128], sizes = [1, 14], strides = [1, 1]} : vector<1x384xf32> to vector<1x14xf32>
    %384 = vector.extract_strided_slice %381 {offsets = [0, 256], sizes = [1, 14], strides = [1, 1]} : vector<1x384xf32> to vector<1x14xf32>
    %385 = vector.extract_strided_slice %375 {offsets = [0, 384], sizes = [1, 14], strides = [1, 1]} : vector<1x512xf32> to vector<1x14xf32>
    %386 = math.tanh %385 : vector<1x14xf32>
    %387 = arith.mulf %383, %330 : vector<1x14xf32>
    %388 = arith.mulf %382, %386 : vector<1x14xf32>
    %389 = arith.addf %387, %388 : vector<1x14xf32>
    %390 = math.tanh %389 : vector<1x14xf32>
    %391 = arith.mulf %384, %390 : vector<1x14xf32>
    %cst_79 = arith.constant dense<0.000000e+00> : vector<1x512xf32>
    %392 = tpu.matmul %352, %7, %cst_79 {dimension_numbers = #tpu.dot_dimension_numbers<[1], [0], [0], [1], [0, 0, 1, 1], [], []>} : vector<1x14xf32>, vector<14x512xf32>, vector<1x512xf32> -> vector<1x512xf32>
    %393 = arith.addf %392, %11 : vector<1x512xf32>
    %cst_80 = arith.constant dense<0.000000e+00> : vector<1x512xf32>
    %394 = tpu.matmul %391, %9, %cst_80 {dimension_numbers = #tpu.dot_dimension_numbers<[1], [0], [0], [1], [0, 0, 1, 1], [], []>} : vector<1x14xf32>, vector<14x512xf32>, vector<1x512xf32> -> vector<1x512xf32>
    %395 = arith.addf %393, %394 : vector<1x512xf32>
    %396 = vector.extract_strided_slice %395 {offsets = [0, 0], sizes = [1, 384], strides = [1, 1]} : vector<1x512xf32> to vector<1x384xf32>
    %397 = arith.negf %396 : vector<1x384xf32>
    %398 = math.exp %397 : vector<1x384xf32>
    %cst_81 = arith.constant 1.000000e+00 : f32
    %399 = vector.broadcast %cst_81 : f32 to vector<1x384xf32>
    %400 = arith.addf %399, %398 : vector<1x384xf32>
    %401 = arith.divf %399, %400 : vector<1x384xf32>
    %402 = vector.extract_strided_slice %401 {offsets = [0, 0], sizes = [1, 14], strides = [1, 1]} : vector<1x384xf32> to vector<1x14xf32>
    %403 = vector.extract_strided_slice %401 {offsets = [0, 128], sizes = [1, 14], strides = [1, 1]} : vector<1x384xf32> to vector<1x14xf32>
    %404 = vector.extract_strided_slice %401 {offsets = [0, 256], sizes = [1, 14], strides = [1, 1]} : vector<1x384xf32> to vector<1x14xf32>
    %405 = vector.extract_strided_slice %395 {offsets = [0, 384], sizes = [1, 14], strides = [1, 1]} : vector<1x512xf32> to vector<1x14xf32>
    %406 = math.tanh %405 : vector<1x14xf32>
    %407 = arith.mulf %403, %350 : vector<1x14xf32>
    %408 = arith.mulf %402, %406 : vector<1x14xf32>
    %409 = arith.addf %407, %408 : vector<1x14xf32>
    %410 = math.tanh %409 : vector<1x14xf32>
    %411 = arith.mulf %404, %410 : vector<1x14xf32>
    %cst_82 = arith.constant dense<0.000000e+00> : vector<1x512xf32>
    %412 = tpu.matmul %372, %8, %cst_82 {dimension_numbers = #tpu.dot_dimension_numbers<[1], [0], [0], [1], [0, 0, 1, 1], [], []>} : vector<1x14xf32>, vector<14x512xf32>, vector<1x512xf32> -> vector<1x512xf32>
    %413 = arith.addf %412, %12 : vector<1x512xf32>
    %cst_83 = arith.constant dense<0.000000e+00> : vector<1x512xf32>
    %414 = tpu.matmul %411, %10, %cst_83 {dimension_numbers = #tpu.dot_dimension_numbers<[1], [0], [0], [1], [0, 0, 1, 1], [], []>} : vector<1x14xf32>, vector<14x512xf32>, vector<1x512xf32> -> vector<1x512xf32>
    %415 = arith.addf %413, %414 : vector<1x512xf32>
    %416 = vector.extract_strided_slice %415 {offsets = [0, 0], sizes = [1, 384], strides = [1, 1]} : vector<1x512xf32> to vector<1x384xf32>
    %417 = arith.negf %416 : vector<1x384xf32>
    %418 = math.exp %417 : vector<1x384xf32>
    %cst_84 = arith.constant 1.000000e+00 : f32
    %419 = vector.broadcast %cst_84 : f32 to vector<1x384xf32>
    %420 = arith.addf %419, %418 : vector<1x384xf32>
    %421 = arith.divf %419, %420 : vector<1x384xf32>
    %422 = vector.extract_strided_slice %421 {offsets = [0, 0], sizes = [1, 14], strides = [1, 1]} : vector<1x384xf32> to vector<1x14xf32>
    %423 = vector.extract_strided_slice %421 {offsets = [0, 128], sizes = [1, 14], strides = [1, 1]} : vector<1x384xf32> to vector<1x14xf32>
    %424 = vector.extract_strided_slice %421 {offsets = [0, 256], sizes = [1, 14], strides = [1, 1]} : vector<1x384xf32> to vector<1x14xf32>
    %425 = vector.extract_strided_slice %415 {offsets = [0, 384], sizes = [1, 14], strides = [1, 1]} : vector<1x512xf32> to vector<1x14xf32>
    %426 = math.tanh %425 : vector<1x14xf32>
    %427 = arith.mulf %423, %370 : vector<1x14xf32>
    %428 = arith.mulf %422, %426 : vector<1x14xf32>
    %429 = arith.addf %427, %428 : vector<1x14xf32>
    %430 = math.tanh %429 : vector<1x14xf32>
    %431 = arith.mulf %424, %430 : vector<1x14xf32>
    %432 = vector.extract_strided_slice %5 {offsets = [7, 0], sizes = [1, 512], strides = [1, 1]} : vector<8x512xf32> to vector<1x512xf32>
    %cst_85 = arith.constant dense<0.000000e+00> : vector<1x512xf32>
    %433 = tpu.matmul %391, %6, %cst_85 {dimension_numbers = #tpu.dot_dimension_numbers<[1], [0], [0], [1], [0, 0, 1, 1], [], []>} : vector<1x14xf32>, vector<14x512xf32>, vector<1x512xf32> -> vector<1x512xf32>
    %434 = arith.addf %432, %433 : vector<1x512xf32>
    %435 = vector.extract_strided_slice %434 {offsets = [0, 0], sizes = [1, 384], strides = [1, 1]} : vector<1x512xf32> to vector<1x384xf32>
    %436 = arith.negf %435 : vector<1x384xf32>
    %437 = math.exp %436 : vector<1x384xf32>
    %cst_86 = arith.constant 1.000000e+00 : f32
    %438 = vector.broadcast %cst_86 : f32 to vector<1x384xf32>
    %439 = arith.addf %438, %437 : vector<1x384xf32>
    %440 = arith.divf %438, %439 : vector<1x384xf32>
    %441 = vector.extract_strided_slice %440 {offsets = [0, 0], sizes = [1, 14], strides = [1, 1]} : vector<1x384xf32> to vector<1x14xf32>
    %442 = vector.extract_strided_slice %440 {offsets = [0, 128], sizes = [1, 14], strides = [1, 1]} : vector<1x384xf32> to vector<1x14xf32>
    %443 = vector.extract_strided_slice %440 {offsets = [0, 256], sizes = [1, 14], strides = [1, 1]} : vector<1x384xf32> to vector<1x14xf32>
    %444 = vector.extract_strided_slice %434 {offsets = [0, 384], sizes = [1, 14], strides = [1, 1]} : vector<1x512xf32> to vector<1x14xf32>
    %445 = math.tanh %444 : vector<1x14xf32>
    %446 = arith.mulf %442, %389 : vector<1x14xf32>
    %447 = arith.mulf %441, %445 : vector<1x14xf32>
    %448 = arith.addf %446, %447 : vector<1x14xf32>
    %449 = math.tanh %448 : vector<1x14xf32>
    %450 = arith.mulf %443, %449 : vector<1x14xf32>
    %cst_87 = arith.constant dense<0.000000e+00> : vector<1x512xf32>
    %451 = tpu.matmul %411, %7, %cst_87 {dimension_numbers = #tpu.dot_dimension_numbers<[1], [0], [0], [1], [0, 0, 1, 1], [], []>} : vector<1x14xf32>, vector<14x512xf32>, vector<1x512xf32> -> vector<1x512xf32>
    %452 = arith.addf %451, %11 : vector<1x512xf32>
    %cst_88 = arith.constant dense<0.000000e+00> : vector<1x512xf32>
    %453 = tpu.matmul %450, %9, %cst_88 {dimension_numbers = #tpu.dot_dimension_numbers<[1], [0], [0], [1], [0, 0, 1, 1], [], []>} : vector<1x14xf32>, vector<14x512xf32>, vector<1x512xf32> -> vector<1x512xf32>
    %454 = arith.addf %452, %453 : vector<1x512xf32>
    %455 = vector.extract_strided_slice %454 {offsets = [0, 0], sizes = [1, 384], strides = [1, 1]} : vector<1x512xf32> to vector<1x384xf32>
    %456 = arith.negf %455 : vector<1x384xf32>
    %457 = math.exp %456 : vector<1x384xf32>
    %cst_89 = arith.constant 1.000000e+00 : f32
    %458 = vector.broadcast %cst_89 : f32 to vector<1x384xf32>
    %459 = arith.addf %458, %457 : vector<1x384xf32>
    %460 = arith.divf %458, %459 : vector<1x384xf32>
    %461 = vector.extract_strided_slice %460 {offsets = [0, 0], sizes = [1, 14], strides = [1, 1]} : vector<1x384xf32> to vector<1x14xf32>
    %462 = vector.extract_strided_slice %460 {offsets = [0, 128], sizes = [1, 14], strides = [1, 1]} : vector<1x384xf32> to vector<1x14xf32>
    %463 = vector.extract_strided_slice %460 {offsets = [0, 256], sizes = [1, 14], strides = [1, 1]} : vector<1x384xf32> to vector<1x14xf32>
    %464 = vector.extract_strided_slice %454 {offsets = [0, 384], sizes = [1, 14], strides = [1, 1]} : vector<1x512xf32> to vector<1x14xf32>
    %465 = math.tanh %464 : vector<1x14xf32>
    %466 = arith.mulf %462, %409 : vector<1x14xf32>
    %467 = arith.mulf %461, %465 : vector<1x14xf32>
    %468 = arith.addf %466, %467 : vector<1x14xf32>
    %469 = math.tanh %468 : vector<1x14xf32>
    %470 = arith.mulf %463, %469 : vector<1x14xf32>
    %cst_90 = arith.constant dense<0.000000e+00> : vector<1x512xf32>
    %471 = tpu.matmul %431, %8, %cst_90 {dimension_numbers = #tpu.dot_dimension_numbers<[1], [0], [0], [1], [0, 0, 1, 1], [], []>} : vector<1x14xf32>, vector<14x512xf32>, vector<1x512xf32> -> vector<1x512xf32>
    %472 = arith.addf %471, %12 : vector<1x512xf32>
    %cst_91 = arith.constant dense<0.000000e+00> : vector<1x512xf32>
    %473 = tpu.matmul %470, %10, %cst_91 {dimension_numbers = #tpu.dot_dimension_numbers<[1], [0], [0], [1], [0, 0, 1, 1], [], []>} : vector<1x14xf32>, vector<14x512xf32>, vector<1x512xf32> -> vector<1x512xf32>
    %474 = arith.addf %472, %473 : vector<1x512xf32>
    %475 = vector.extract_strided_slice %474 {offsets = [0, 0], sizes = [1, 384], strides = [1, 1]} : vector<1x512xf32> to vector<1x384xf32>
    %476 = arith.negf %475 : vector<1x384xf32>
    %477 = math.exp %476 : vector<1x384xf32>
    %cst_92 = arith.constant 1.000000e+00 : f32
    %478 = vector.broadcast %cst_92 : f32 to vector<1x384xf32>
    %479 = arith.addf %478, %477 : vector<1x384xf32>
    %480 = arith.divf %478, %479 : vector<1x384xf32>
    %481 = vector.extract_strided_slice %480 {offsets = [0, 0], sizes = [1, 14], strides = [1, 1]} : vector<1x384xf32> to vector<1x14xf32>
    %482 = vector.extract_strided_slice %480 {offsets = [0, 128], sizes = [1, 14], strides = [1, 1]} : vector<1x384xf32> to vector<1x14xf32>
    %483 = vector.extract_strided_slice %480 {offsets = [0, 256], sizes = [1, 14], strides = [1, 1]} : vector<1x384xf32> to vector<1x14xf32>
    %484 = vector.extract_strided_slice %474 {offsets = [0, 384], sizes = [1, 14], strides = [1, 1]} : vector<1x512xf32> to vector<1x14xf32>
    %485 = math.tanh %484 : vector<1x14xf32>
    %486 = arith.mulf %482, %429 : vector<1x14xf32>
    %487 = arith.mulf %481, %485 : vector<1x14xf32>
    %488 = arith.addf %486, %487 : vector<1x14xf32>
    %489 = math.tanh %488 : vector<1x14xf32>
    %490 = arith.mulf %483, %489 : vector<1x14xf32>
    %491 = tpu.concatenate %450, %470, %490 in 0 : vector<1x14xf32>, vector<1x14xf32>, vector<1x14xf32> -> vector<3x14xf32>
    %c0_93 = arith.constant 0 : index
    %c0_94 = arith.constant 0 : index
    %492 = vector.load %arg15[%c0_93, %c0_94] : memref<3x14xf32, #tpu.memory_space<vmem>>, vector<3x14xf32>
    tpu.vector_store %arg15[%c0_93, %c0_94], %491 {strides = array<i32>} : memref<3x14xf32, #tpu.memory_space<vmem>>, vector<3x14xf32>,
    %493 = tpu.concatenate %448, %468, %488 in 0 : vector<1x14xf32>, vector<1x14xf32>, vector<1x14xf32> -> vector<3x14xf32>
    %c0_95 = arith.constant 0 : index
    %c0_96 = arith.constant 0 : index
    %494 = vector.load %arg16[%c0_95, %c0_96] : memref<3x14xf32, #tpu.memory_space<vmem>>, vector<3x14xf32>
    tpu.vector_store %arg16[%c0_95, %c0_96], %493 {strides = array<i32>} : memref<3x14xf32, #tpu.memory_space<vmem>>, vector<3x14xf32>,
    %495 = tpu.concatenate %77, %136, %195, %254, %313, %372, %431, %490 in 0 : vector<1x14xf32>, vector<1x14xf32>, vector<1x14xf32>, vector<1x14xf32>, vector<1x14xf32>, vector<1x14xf32>, vector<1x14xf32>, vector<1x14xf32> -> vector<8x14xf32>
    %cst_97 = arith.constant 0.000000e+00 : f32
    %496 = vector.broadcast %cst_97 : f32 to vector<8x14xf32>
    %497 = arith.maximumf %495, %496 : vector<8x14xf32>
    %c0_98 = arith.constant 0 : index
    %c0_99 = arith.constant 0 : index
    %498 = vector.load %arg10[%c0_98, %c0_99] : memref<14x128xf32, #tpu.memory_space<vmem>>, vector<14x128xf32>
    %cst_100 = arith.constant dense<0.000000e+00> : vector<8x128xf32>
    %499 = tpu.matmul %497, %498, %cst_100 {dimension_numbers = #tpu.dot_dimension_numbers<[1], [0], [0], [1], [0, 0, 1, 1], [], []>} : vector<8x14xf32>, vector<14x128xf32>, vector<8x128xf32> -> vector<8x128xf32>
    %c0_101 = arith.constant 0 : index
    %c0_102 = arith.constant 0 : index
    %500 = vector.load %arg11[%c0_101, %c0_102] : memref<1x128xf32, #tpu.memory_space<vmem>>, vector<1x128xf32>
    %501 = vector.broadcast %500 : vector<1x128xf32> to vector<8x128xf32>
    %502 = arith.addf %499, %501 : vector<8x128xf32>
    %cst_103 = arith.constant 0.000000e+00 : f32
    %503 = vector.broadcast %cst_103 : f32 to vector<8x128xf32>
    %504 = arith.maximumf %502, %503 : vector<8x128xf32>
    %c0_104 = arith.constant 0 : index
    %c0_105 = arith.constant 0 : index
    %505 = vector.load %arg14[%c0_104, %c0_105] : memref<8x128xf32, #tpu.memory_space<vmem>>, vector<8x128xf32>
    tpu.vector_store %arg14[%c0_104, %c0_105], %504 {strides = array<i32>} : memref<8x128xf32, #tpu.memory_space<vmem>>, vector<8x128xf32>,
    return
  }
}

</mosaic_0001>

<bundles_post_ra>
// kernel: incidence_guesser_forward.1
= control target key start
LH: loop header
LB: loop body
LE: loop exit
PB: predicated region body
PF: predicated region fallthrough
CT: control target
= control target key end

     0   :  { %s8779_s0 = inlined_call_operand.hbm [shape: f32[8,60], index: 0, kind: input, shape index: {}]   ;;  %s8780_s1 = inlined_call_operand.hbm [shape: f32[60,512], index: 1, kind: input, shape index: {}]   ;;  %s8781_s2 = inlined_call_operand.hbm [shape: f32[14,512], index: 2, kind: input, shape index: {}]   ;;  %s8782_s3 = inlined_call_operand.hbm [shape: f32[1,512], index: 3, kind: input, shape index: {}]   ;;  %s8783_s4 = inlined_call_operand.hbm [shape: f32[14,512], index: 4, kind: input, shape index: {}]   ;;  %s8784_s5 = inlined_call_operand.hbm [shape: f32[14,512], index: 5, kind: input, shape index: {}]   ;;  %s8785_s6 = inlined_call_operand.hbm [shape: f32[1,512], index: 6, kind: input, shape index: {}]   ;;  %s8786_s7 = inlined_call_operand.hbm [shape: f32[14,512], index: 7, kind: input, shape index: {}]   ;;  %s8787_s8 = inlined_call_operand.hbm [shape: f32[14,512], index: 8, kind: input, shape index: {}]   ;;  %s8788_s9 = inlined_call_operand.hbm [shape: f32[1,512], index: 9, kind: input, shape index: {}]   ;;  %s8789_s10 = inlined_call_operand.hbm [shape: f32[14,128], index: 10, kind: input, shape index: {}]   ;;  %s8790_s11 = inlined_call_operand.hbm [shape: f32[1,128], index: 11, kind: input, shape index: {}]   ;;  %s8791_s12 = inlined_call_operand.vmem [shape: f32[3,14], index: 12, kind: input, shape index: {}]   ;;  %s8792_s13 = inlined_call_operand.vmem [shape: f32[3,14], index: 13, kind: input, shape index: {}]   ;;  %s8793_s14 = inlined_call_operand.hbm [shape: f32[8,128], index: 14, kind: output, shape index: {0}]   ;;  %s8794_s15 = inlined_call_operand.hbm [shape: f32[3,14], index: 15, kind: output, shape index: {1}]   ;;  %s8795_s16 = inlined_call_operand.hbm [shape: f32[3,14], index: 16, kind: output, shape index: {2}]  }
   0x1   :  { %8834 = sst [smem:[#allocation49_spill]] %s8779_s0 }
   0x2   :  { %22 = vsyncpa [#allocation3], 0 }
   0x3   :  { %23 = vsyncpa [#allocation6], 0 }
   0x4   :  { %24 = vsyncpa [#allocation9], 0 }
   0x5   :  { %25 = vsyncpa [#allocation12], 0 }
   0x6   :  { %26 = vsyncpa [#allocation15], 0 }
   0x7   :  { %27 = vsyncpa [#allocation18], 0 }
   0x8   :  { %28 = vsyncpa [#allocation21], 0 }
   0x9   :  { %29 = vsyncpa [#allocation4], 0  ;;  %s46_s23 = sshll.u32 %s8780_s1, 4  ;;  %s47_s23 = int_to_ptr.hbm [resolvable:$true] %s46_s23 }
   0xa   :  { %30 = vsyncpa [#allocation24], 0  ;;  %s6936_s24 = smov [#allocation5]   ;;  %s73_s28 = sshll.u32 %s8782_s3, 4  ;;  %s74_s28 = int_to_ptr.hbm [resolvable:$true] %s73_s28 }
   0xb   :  { %s48_s25 = sshll.u32 %s6936_s24, 4  ;;  %s6937_s29 = smov 512   ;;  %s49_s25 = int_to_ptr.vmem [resolvable:$true] %s48_s25 }
   0xc   :  { %s6938_s30 = smov 32   ;;  %s6939_s0 = smov [#allocation8]  }
   0xd   :  { %54 = dma.hbm_to_vmem [thread:$0]  %s47_s23, 4096, %s49_s25, [#allocation6], %s6937_s29, %s6937_s29, %s6938_s30  }
   0xe   :  { %s75_s17 = sshll.u32 %s6939_s0, 4  ;;  %s96_s19 = sshll.u32 %s8784_s5, 4  ;;  %s76_s17 = int_to_ptr.vmem [resolvable:$true] %s75_s17  ;;  %s97_s19 = int_to_ptr.hbm [resolvable:$true] %s96_s19 }
   0xf   :  { %78 = dma.hbm_to_vmem [thread:$0]  %s74_s28, 64, %s76_s17, [#allocation9]  }
  0x10   :  { %s120_s3 = sshll.u32 %s8786_s7, 4  ;;  %s6940_s22 = smov [#allocation11]   ;;  %s121_s3 = int_to_ptr.hbm [resolvable:$true] %s120_s3 }
  0x11   :  { %s98_s24 = sshll.u32 %s6940_s22, 4  ;;  %s6941_s23 = smov [#allocation14]   ;;  %s99_s24 = int_to_ptr.vmem [resolvable:$true] %s98_s24 }
  0x12   :  { %104 = dma.hbm_to_vmem [thread:$0]  %s97_s19, 1024, %s99_s24, [#allocation12], %s6937_s29, %s6937_s29, %s6938_s30  }
  0x13   :  { %s122_s25 = sshll.u32 %s6941_s23, 4  ;;  %s147_s5 = sshll.u32 %s8788_s9, 4  ;;  %s123_s25 = int_to_ptr.vmem [resolvable:$true] %s122_s25  ;;  %s148_s5 = int_to_ptr.hbm [resolvable:$true] %s147_s5 }
  0x14   :  { %128 = dma.hbm_to_vmem [thread:$0]  %s121_s3, 1024, %s123_s25, [#allocation15], %s6937_s29, %s6937_s29, %s6938_s30  }
  0x15   :  { %s8835_s0 = sld [smem:[#allocation49_spill]]  ;;  %s6942_s18 = smov [#allocation17]  }
  0x16   :  { %s149_s1 = sshll.u32 %s6942_s18, 4  ;;  %s6943_s19 = smov [#allocation2]   ;;  %s150_s1 = int_to_ptr.vmem [resolvable:$true] %s149_s1 }
  0x17   :  { %152 = dma.hbm_to_vmem [thread:$0]  %s148_s5, 64, %s150_s1, [#allocation18]  }
  0x18   :  { %s38_s20 = sshll.u32 %s6943_s19, 4  ;;  %s59_s9 = sshll.u32 %s8781_s2, 4  ;;  %s39_s20 = int_to_ptr.vmem [resolvable:$true] %s38_s20  ;;  %s60_s9 = int_to_ptr.hbm [resolvable:$true] %s59_s9 }
  0x19   :  { %s83_s23 = sshll.u32 %s8783_s4, 4  ;;  %s6944_s25 = smov [#allocation7]   ;;  %s84_s23 = int_to_ptr.hbm [resolvable:$true] %s83_s23 }
  0x1a   :  { %s61_s26 = sshll.u32 %s6944_s25, 4  ;;  %s6945_s27 = smov [#allocation10]   ;;  %s62_s26 = int_to_ptr.vmem [resolvable:$true] %s61_s26 }
  0x1b   :  { %s36_s17 = sshll.u32 %s8835_s0, 4  ;;  %s85_s5 = sshll.u32 %s6945_s27, 4  ;;  %s37_s17 = int_to_ptr.hbm [resolvable:$true] %s36_s17  ;;  %s86_s5 = int_to_ptr.vmem [resolvable:$true] %s85_s5 }
  0x1c   :  { %41 = dma.hbm_to_vmem [thread:$0]  %s37_s17, 128, %s39_s20, [#allocation3]  }
  0x1d   :  { %67 = dma.hbm_to_vmem [thread:$0]  %s60_s9, 1024, %s62_s26, [#allocation6], %s6937_s29, %s6937_s29, %s6938_s30  }
  0x1e   :  { %s110_s2 = sshll.u32 %s8785_s6, 4  ;;  %s133_s17 = sshll.u32 %s8787_s8, 4  ;;  %s111_s2 = int_to_ptr.hbm [resolvable:$true] %s110_s2  ;;  %s134_s17 = int_to_ptr.hbm [resolvable:$true] %s133_s17 }
  0x1f   :  { %91 = dma.hbm_to_vmem [thread:$0]  %s84_s23, 1024, %s86_s5, [#allocation9], %s6937_s29, %s6937_s29, %s6938_s30  }
  0x20   :  { %s6946_s18 = smov [#allocation13]   ;;  %s6947_s19 = smov [#allocation16]  }
  0x21   :  { %s112_s1 = sshll.u32 %s6946_s18, 4  ;;  %s135_s20 = sshll.u32 %s6947_s19, 4  ;;  %s113_s1 = int_to_ptr.vmem [resolvable:$true] %s112_s1  ;;  %s136_s20 = int_to_ptr.vmem [resolvable:$true] %s135_s20 }
  0x22   :  { %115 = dma.hbm_to_vmem [thread:$0]  %s111_s2, 64, %s113_s1, [#allocation12]  }
  0x23   :  { %s157_s6 = sshll.u32 %s8789_s10, 4  ;;  %s6948_s9 = smov [#allocation19]   ;;  %s158_s6 = int_to_ptr.hbm [resolvable:$true] %s157_s6 }
  0x24   :  { %141 = dma.hbm_to_vmem [thread:$0]  %s134_s17, 1024, %s136_s20, [#allocation15], %s6937_s29, %s6937_s29, %s6938_s30  }
  0x25   :  { %s159_s24 = sshll.u32 %s6948_s9, 4  ;;  %s171_s23 = sshll.u32 %s8790_s11, 4  ;;  %s160_s24 = int_to_ptr.vmem [resolvable:$true] %s159_s24  ;;  %s172_s23 = int_to_ptr.hbm [resolvable:$true] %s171_s23 }
  0x26   :  { %s6949_s25 = smov 128   ;;  %s6950_s26 = smov 8  }
  0x27   :  { %165 = dma.hbm_to_vmem [thread:$0]  %s158_s6, 256, %s160_s24, [#allocation18], %s6949_s25, %s6949_s25, %s6950_s26  }
  0x28   :  { %s6951_s27 = smov [#allocation20]  }
  0x29   :  { %s173_s5 = sshll.u32 %s6951_s27, 4  ;;  %s174_s5 = int_to_ptr.vmem [resolvable:$true] %s173_s5 }
  0x2a   :  { %176 = dma.hbm_to_vmem [thread:$0]  %s172_s23, 16, %s174_s5, [#allocation21]  }
  0x2b   :  { %6918 = dma.done.wait [#allocation3], 128  }
  0x2c   :  { %6919 = vsyncadd [#allocation3], 4294967168 }
  0x2d   :  { %6920 = dma.done.wait [#allocation6], 5120  }
  0x2e   :  { %6921 = vsyncadd [#allocation6], 4294962176 }
  0x2f   :  { %6922 = dma.done.wait [#allocation9], 1088  }
  0x30   :  { %6923 = vsyncadd [#allocation9], 4294966208 }
  0x31   :  { %6924 = dma.done.wait [#allocation12], 1088  }
  0x32   :  { %6925 = vsyncadd [#allocation12], 4294966208 }
  0x33   :  { %6926 = dma.done.wait [#allocation15], 2048  }
  0x34   :  { %6927 = vsyncadd [#allocation15], 4294965248 }
  0x35   :  { %6928 = dma.done.wait [#allocation18], 320  }
  0x36   :  { %6929 = vsyncadd [#allocation18], 4294966976 }
  0x37   :  { %6930 = dma.done.wait [#allocation21], 16  }
  0x38   :  { %6931 = vsyncadd [#allocation21], 4294967280  ;;  %vm276_vm0 = vcmask 1043456   ;;  %v258_v0 = vld [vmem:[#allocation5 + $0xe0] sm:$0xf]  ;;  %v255_v4 = vld [vmem:[#allocation5 + $0xc8] sm:$0xff] }
  0x39   :  { %v259_v1 = vld [vmem:[#allocation5 + $0xe8] sm:$0xf]  ;;  %v260_v2 = vld [vmem:[#allocation5 + $0xf0] sm:$0xf]  ;;  %5632 = vmatpush.msk.msra.mxu0 %vm276_vm0, %v258_v0  ;;  %v254_v3 = vld [vmem:[#allocation5 + $0xc0] sm:$0xff]  ;;  %vm272_vm1 = vcmask 490496  }
  0x3a   :  { %5634 = vmatpush.msk.msra.mxu1 %vm276_vm0, %v259_v1  ;;  %v256_v5 = vld [vmem:[#allocation5 + $0xd0] sm:$0xff]  ;;  %5636 = vmatpush.msk.msra.mxu2 %vm276_vm0, %v260_v2  ;;  %v250_v6 = vld [vmem:[#allocation5 + $0xa0] sm:$0xff]  ;;  %v251_v7 = vld [vmem:[#allocation5 + $0xa8] sm:$0xff]  ;;  %vm421_vm2 = vcmask 1045504   ;;  %vm417_vm3 = vcmask 113664   ;;  %s5596_s19 = sshll.u32 %s8794_s15, 4  ;;  %s5597_s19 = int_to_ptr.hbm [resolvable:$true] %s5596_s19 }
  0x3b   :  { %298 = vmatpush.msra.mxu0 %v254_v3  ;;  %v252_v8 = vld [vmem:[#allocation5 + $0xb0] sm:$0xff]  ;;  %v246_v9 = vld [vmem:[#allocation5 + $0x80] sm:$0xff]  ;;  %v247_v10 = vld [vmem:[#allocation5 + $0x88] sm:$0xff]  ;;  %s6952_s20 = smov [#allocation23]   ;;  %s5607_s9 = sshll.u32 %s8795_s16, 4  ;;  %s5608_s9 = int_to_ptr.hbm [resolvable:$true] %s5607_s9 }
  0x3c   :  { %318 = vmatpush.msra.mxu1 %v255_v4  ;;  %338 = vmatpush.msra.mxu2 %v256_v5  ;;  %v248_v11 = vld [vmem:[#allocation5 + $0x90] sm:$0xff]  ;;  %v261_v12 = vld [vmem:[#allocation5 + $0xf8] sm:$0xf]  ;;  %v242_v13 = vld [vmem:[#allocation5 + $0x60] sm:$0xff]  ;;  %s5594_s21 = sshll.u32 %s6952_s20, 4  ;;  %s6953_s24 = smov [#allocation25]   ;;  %s5595_s21 = int_to_ptr.vmem [resolvable:$true] %s5594_s21 }
  0x3d   :  { %299 = vmatpush.msra.mxu0 %v250_v6  ;;  %v243_v14 = vld [vmem:[#allocation5 + $0x68] sm:$0xff]  ;;  %5638 = vmatpush.msk.msra.mxu3 %vm276_vm0, %v261_v12  ;;  %v257_v15 = vld [vmem:[#allocation5 + $0xd8] sm:$0xff]  ;;  %v244_v16 = vld [vmem:[#allocation5 + $0x70] sm:$0xff]  ;;  %s5605_s8 = sshll.u32 %s6953_s24, 4  ;;  %s6954_s3 = smov [#allocation22]   ;;  %s5606_s8 = int_to_ptr.vmem [resolvable:$true] %s5605_s8 }
  0x3e   :  { %319 = vmatpush.msra.mxu1 %v251_v7  ;;  %339 = vmatpush.msra.mxu2 %v252_v8  ;;  %v253_v17 = vld [vmem:[#allocation5 + $0xb8] sm:$0xff]  ;;  %v238_v18 = vld [vmem:[#allocation5 + $0x40] sm:$0xff]  ;;  %v239_v19 = vld [vmem:[#allocation5 + $0x48] sm:$0xff]  ;;  %s5583_s23 = sshll.u32 %s6954_s3, 4  ;;  %s5585_s26 = sshll.u32 %s8793_s14, 4  ;;  %s5584_s23 = int_to_ptr.vmem [resolvable:$true] %s5583_s23  ;;  %s5586_s26 = int_to_ptr.hbm [resolvable:$true] %s5585_s26 }
  0x3f   :  { %300 = vmatpush.msra.mxu0 %v246_v9  ;;  %358 = vmatpush.msra.mxu3 %v257_v15  ;;  %v240_v20 = vld [vmem:[#allocation5 + $0x50] sm:$0xff]  ;;  %v249_v21 = vld [vmem:[#allocation5 + $0x98] sm:$0xff]  ;;  %v234_v22 = vld [vmem:[#allocation5 + $0x20] sm:$0xff] }
  0x40   :  { %320 = vmatpush.msra.mxu1 %v247_v10  ;;  %340 = vmatpush.msra.mxu2 %v248_v11  ;;  %v235_v23 = vld [vmem:[#allocation5 + $0x28] sm:$0xff]  ;;  %v236_v24 = vld [vmem:[#allocation5 + $0x30] sm:$0xff]  ;;  %v245_v25 = vld [vmem:[#allocation5 + $0x78] sm:$0xff] }
  0x41   :  { %301 = vmatpush.msra.mxu0 %v242_v13  ;;  %359 = vmatpush.msra.mxu3 %v253_v17  ;;  %v230_v26 = vld [vmem:[#allocation5] sm:$0xff]  ;;  %v231_v27 = vld [vmem:[#allocation5 + $0x8] sm:$0xff]  ;;  %v232_v28 = vld [vmem:[#allocation5 + $0x10] sm:$0xff] }
  0x42   :  { %321 = vmatpush.msra.mxu1 %v243_v14  ;;  %341 = vmatpush.msra.mxu2 %v244_v16  ;;  %v229_v29 = vld [vmem:[#allocation2] sm:$0xff]  ;;  %v7098_v30 = vld [vmem:[#allocation7 + $0x20] sm:$0x3f]  ;;  %v7100_v31 = vld [vmem:[#allocation7 + $0x28] sm:$0x3f] }
  0x43   :  { %302 = vmatpush.msra.mxu0 %v238_v18  ;;  %360 = vmatpush.msra.mxu3 %v249_v21  ;;  %v241_v32 = vld [vmem:[#allocation5 + $0x58] sm:$0xff]  ;;  %v7103_v33 = vld [vmem:[#allocation7 + $0x30] sm:$0x3f]  ;;  %v7107_v34 = vld [vmem:[#allocation7] sm:$0xff] }
  0x44   :  { %322 = vmatpush.msra.mxu1 %v239_v19  ;;  %342 = vmatpush.msra.mxu2 %v240_v20  ;;  %8836 = vst [vmem:[#allocation35_spill] sm:$0xff] %v7103_v33  ;;  %v7109_v35 = vld [vmem:[#allocation7 + $0x8] sm:$0xff]  ;;  %v237_v36 = vld [vmem:[#allocation5 + $0x38] sm:$0xff]  ;;  %v7115_v37 = vld [vmem:[#allocation7 + $0x10] sm:$0xff] }
  0x45   :  { %303 = vmatpush.msra.mxu0 %v234_v22  ;;  %361 = vmatpush.msra.mxu3 %v245_v25  ;;  %8837 = vst [vmem:[#allocation36_spill] sm:$0xff] %v7107_v34  ;;  %v233_v38 = vld [vmem:[#allocation5 + $0x18] sm:$0xff]  ;;  %v7137_v42 = vld [vmem:[#allocation8] sm:$0xf]  ;;  %v7148_v55 = vld [vmem:[#allocation11 + $0x20] sm:$0x3f] }
  0x46   :  { %323 = vmatpush.msra.mxu1 %v235_v23  ;;  %343 = vmatpush.msra.mxu2 %v236_v24  ;;  %8838 = vst [vmem:[#allocation37_spill] sm:$0xff] %v7109_v35  ;;  %v411_v39 = vld [vmem:[%s8791_s12] sm:$0x1]  ;;  %v264_v45 = vperm.slane %v7137_v42, 0  ;;  %v265_v46 = vperm.slane %v7137_v42, 1  ;;  %v266_v50 = vperm.slane %v7137_v42, 2 }
  0x47   :  { %304 = vmatpush.msra.mxu0 %v230_v26  ;;  %8839 = vst [vmem:[#allocation38_spill] sm:$0xff] %v7115_v37  ;;  %362 = vmatpush.msra.mxu3 %v241_v32  ;;  %v7125_v40 = vld [vmem:[#allocation7 + $0x38] sm:$0x3f]  ;;  %v7150_v56 = vld [vmem:[#allocation11 + $0x28] sm:$0x3f]  ;;  %v7162_v62 = vld [vmem:[#allocation11] sm:$0xff] }
  0x48   :  { %324 = vmatpush.msra.mxu1 %v231_v27  ;;  %344 = vmatpush.msra.mxu2 %v232_v28  ;;  %8840 = vst [vmem:[#allocation39_spill] sm:$0xff] %v7125_v40  ;;  %v7131_v41 = vld [vmem:[#allocation7 + $0x18] sm:$0xff]  ;;  %v7164_v63 = vld [vmem:[#allocation11 + $0x8] sm:$0xff]  ;;  %v7186_v7 = vld [vmem:[#allocation10 + $0x20] sm:$0x3f]  ;;  %v267_v15 = vperm.slane %v7137_v42, 3 }
  0x49   :  { %5633 = vmatmul.msk.f32.vlgmr.msra.gmra.mxu0 %vm272_vm1, %v229_v29  ;;  %5635 = vmatmul.msk.f32.vlgmr.msra.gmra.mxu1 %vm272_vm1, %v229_v29  ;;  %8841 = vst [vmem:[#allocation40_spill] sm:$0xff] %v7131_v41  ;;  %v7152_v57 = vld [vmem:[#allocation11 + $0x30] sm:$0x3f]  ;;  %v7158_v59 = vld [vmem:[#allocation11 + $0x38] sm:$0x3f]  ;;  %v7194_v10 = vld [vmem:[#allocation10] sm:$0xff] }
  0x4a   :  { %5637 = vmatmul.msk.f32.vlgmr.msra.gmra.mxu2 %vm272_vm1, %v229_v29  ;;  %5640 = vmatpush.msk.msrb.mxu0 %vm421_vm2, %v7098_v30  ;;  %v7170_v0 = vld [vmem:[#allocation11 + $0x10] sm:$0xff]  ;;  %v7174_v1 = vld [vmem:[#allocation11 + $0x18] sm:$0xff]  ;;  %v7188_v8 = vld [vmem:[#allocation10 + $0x28] sm:$0x3f] }
  0x4b   :  { %5642 = vmatpush.msk.msrb.mxu1 %vm421_vm2, %v7100_v31  ;;  %5644 = vmatpush.msk.msrb.mxu2 %vm421_vm2, %v7103_v33  ;;  %v412_v2 = vld [vmem:[%s8791_s12 + $0x1] sm:$0x1]  ;;  %v7196_v11 = vld [vmem:[#allocation10 + $0x8] sm:$0xff]  ;;  %v7203_v16 = vld [vmem:[#allocation10 + $0x38] sm:$0x3f] }
  0x4c   :  { %449 = vmatpush.msrb.mxu0 %v7107_v34  ;;  %363 = vmatpush.msra.mxu3 %v237_v36  ;;  %v7198_v12 = vld [vmem:[#allocation10 + $0x30] sm:$0x3f]  ;;  %v7209_v19 = vld [vmem:[#allocation10 + $0x18] sm:$0xff] }
  0x4d   :  { %469 = vmatpush.msrb.mxu1 %v7109_v35  ;;  %489 = vmatpush.msrb.mxu2 %v7115_v37  ;;  %v7205_v17 = vld [vmem:[#allocation10 + $0x10] sm:$0xff] }
  0x4e   :  { %364 = vmatpush.msra.mxu3 %v233_v38  ;;  %5651 = vmatpush.msk.msra.mxu0 %vm421_vm2, %v7148_v55 }
  0x4f   :  { %5639 = vmatmul.msk.f32.vlgmr.msra.gmra.mxu3 %vm272_vm1, %v229_v29  ;;  %5653 = vmatpush.msk.msra.mxu1 %vm421_vm2, %v7150_v56 }
  0x50   :  { %5646 = vmatpush.msk.msrb.mxu3 %vm421_vm2, %v7125_v40  ;;  %5655 = vmatpush.msk.msra.mxu2 %vm421_vm2, %v7152_v57 }
  0x51   :  { %5641 = vmatmul.msk.f32.vlgmr.msrb.gmra.mxu0 %vm417_vm3, %v411_v39  ;;  %5643 = vmatmul.msk.f32.vlgmr.msrb.gmra.mxu1 %vm417_vm3, %v411_v39 }
  0x52   :  { %5645 = vmatmul.msk.f32.vlgmr.msrb.gmra.mxu2 %vm417_vm3, %v411_v39  ;;  %509 = vmatpush.msrb.mxu3 %v7131_v41 }
  0x53   :  { %620 = vmatpush.msra.mxu0 %v7162_v62  ;;  %640 = vmatpush.msra.mxu1 %v7164_v63 }
  0x54   :  { %5657 = vmatpush.msk.msra.mxu3 %vm421_vm2, %v7158_v59  ;;  %660 = vmatpush.msra.mxu2 %v7170_v0 }
  0x55   :  { %5659 = vmatpush.msk.msrb.mxu0 %vm421_vm2, %v7186_v7  ;;  %5661 = vmatpush.msk.msrb.mxu1 %vm421_vm2, %v7188_v8 }
  0x56   :  { %680 = vmatpush.msra.mxu3 %v7174_v1  ;;  %5663 = vmatpush.msk.msrb.mxu2 %vm421_vm2, %v7198_v12 }
  0x57   :  { %5647 = vmatmul.msk.f32.vlgmr.msrb.gmra.mxu3 %vm417_vm3, %v411_v39  ;;  %715 = vmatpush.msrb.mxu0 %v7194_v10 }
  0x58   :  { %735 = vmatpush.msrb.mxu1 %v7196_v11  ;;  %5665 = vmatpush.msk.msrb.mxu3 %vm421_vm2, %v7203_v16 }
  0x59   :  { %5652 = vmatmul.msk.f32.vlgmr.msra.gmra.mxu0 %vm417_vm3, %v412_v2  ;;  %5654 = vmatmul.msk.f32.vlgmr.msra.gmra.mxu1 %vm417_vm3, %v412_v2 }
  0x5a   :  { %5656 = vmatmul.msk.f32.vlgmr.msra.gmra.mxu2 %vm417_vm3, %v412_v2  ;;  %775 = vmatpush.msrb.mxu3 %v7209_v19 }
  0x5b   :  { %755 = vmatpush.msrb.mxu2 %v7205_v17 }
  0x5f   :  { %5658 = vmatmul.msk.f32.vlgmr.msra.gmra.mxu3 %vm417_vm3, %v412_v2 }
  0xc6   :  { %v306_v43 = vpop.f32.mrf.mxu0  ;;  %v326_v44 = vpop.f32.mrf.mxu1 }
  0xc7   :  { %v7141_v47 = vadd.f32 %v306_v43, %v264_v45  ;;  %v7143_v49 = vadd.f32 %v326_v44, %v265_v46 }
  0xcd   :  { %v346_v48 = vpop.f32.mrf.mxu2 }
  0xce   :  { %v451_v51 = vpop.f32.mrf.mxu0  ;;  %v471_v53 = vpop.f32.mrf.mxu1  ;;  %v7160_v60 = vadd.f32 %v346_v48, %v266_v50 }
  0xcf   :  { %v514_v52 = vadd.f32 %v451_v51, %v7141_v47  ;;  %v515_v54 = vadd.f32 %v471_v53, %v7143_v49  ;;  %v414_v53 = vld [vmem:[%s8792_s13] sm:$0x1] }
  0xd0   :  { %8842 = vst [vmem:[#allocation41_spill] sm:$0xff] %v7160_v60 }
  0xd1   :  { %v5648_v58 = vmul.f32 -1.442695, %v514_v52  ;;  %v5649_v61 = vmul.f32 -1.442695, %v515_v54 }
  0xd2   :  { %v366_v4 = vpop.f32.mrf.mxu3 }
  0xd3   :  { %6054 = vpow2.f32 %v5648_v58  ;;  %v7214_v20 = vadd.f32 %v366_v4, %v267_v15 }
  0xd4   :  { %6056 = vpow2.f32 %v5649_v61 }
  0xd5   :  { %v491_v3 = vpop.f32.mrf.mxu2  ;;  %8843 = vst [vmem:[#allocation42_spill] sm:$0xff] %v7214_v20 }
  0xd6   :  { %v516_v5 = vadd.f32 %v491_v3, %v7160_v60 }
  0xd8   :  { %v5650_v6 = vmul.f32 -1.442695, %v516_v5 }
  0xd9   :  { %v6055_v9 = vpop.eup %6054 }
  0xda   :  { %v6057_v13 = vpop.eup %6056  ;;  %v527_v14 = vadd.f32 1.0, %v6055_v9  ;;  %6058 = vpow2.f32 %v5650_v6  ;;  %v511_v21 = vpop.f32.mrf.mxu3 }
  0xdb   :  { %v528_v18 = vadd.f32 1.0, %v6057_v13  ;;  %v517_v25 = vadd.f32 %v511_v21, %v7214_v20 }
  0xdc   :  { %6060 = vrcp.f32 %v527_v14  ;;  %v541_v36 = vand.u32 2147483648, %v527_v14  ;;  %v539_v42 = vand.u32 2147483647, %v527_v14  ;;  %vm535_vm6 = vweird.f32 %v527_v14 }
  0xdd   :  { %6062 = vrcp.f32 %v528_v18  ;;  %v556_v38 = vand.u32 2147483648, %v528_v18  ;;  %v554_v44 = vand.u32 2147483647, %v528_v18  ;;  %vm550_vm7 = vweird.f32 %v528_v18 }
  0xde   :  { %v542_v50 = vor.u32 1.1754944e-38, %v541_v36  ;;  %vm540_vm10 = vcmp.eq.f32.partialorder %v539_v42, 8.507059e+37  ;;  %v662_v36 = vpop.f32.mrf.mxu2 }
  0xdf   :  { %v557_v52 = vor.u32 1.1754944e-38, %v556_v38  ;;  %vm555_vm11 = vcmp.eq.f32.partialorder %v554_v44, 8.507059e+37 }
  0xe0   :  { %v6059_v22 = vpop.eup %6058 }
  0xe1   :  { %v529_v23 = vadd.f32 1.0, %v6059_v22 }
  0xe2   :  { %v6061_v24 = vpop.eup %6060 }
  0xe3   :  { %v6063_v26 = vpop.eup %6062  ;;  %v531_v27 = vmul.f32 %v6061_v24, %v527_v14  ;;  %6064 = vrcp.f32 %v529_v23  ;;  %vm536_vm4 = vweird.f32 %v6061_v24  ;;  %v571_v15 = vand.u32 2147483648, %v529_v23 }
  0xe4   :  { %v546_v28 = vmul.f32 %v6063_v26, %v528_v18  ;;  %6066 = vtanh.f32 %v517_v25  ;;  %vm551_vm5 = vweird.f32 %v6063_v26  ;;  %vm537_vm8 = vmor %vm535_vm6, %vm536_vm4  ;;  %vm565_vm13 = vweird.f32 %v529_v23 }
  0xe5   :  { %v532_v29 = vsub.f32 1.0, %v531_v27  ;;  %vm552_vm9 = vmor %vm550_vm7, %vm551_vm5  ;;  %v569_v18 = vand.u32 2147483647, %v529_v23  ;;  %v572_v22 = vor.u32 1.1754944e-38, %v571_v15  ;;  %v642_v27 = vpop.f32.mrf.mxu1 }
  0xe6   :  { %v547_v32 = vsub.f32 1.0, %v546_v28  ;;  %v409_v28 = vld [vmem:[#allocation13] sm:$0xf] }
  0xe7   :  { %v533_v39 = vmul.f32 %v6061_v24, %v532_v29  ;;  %vm570_vm15 = vcmp.eq.f32.partialorder %v569_v18, 8.507059e+37  ;;  %v7234_v29 = vperm.slane %v409_v28, 0  ;;  %v7240_v42 = vperm.slane %v409_v28, 2  ;;  %v7278_v18 = vld [vmem:[#allocation14 + $0x20] sm:$0x3f] }
  0xe8   :  { %v548_v43 = vmul.f32 %v6063_v26, %v547_v32  ;;  %v7236_v32 = vperm.slane %v409_v28, 1 }
  0xe9   :  { %v6065_v45 = vpop.eup %6064  ;;  %v534_v46 = vadd.f32 %v6061_v24, %v533_v39  ;;  %8844 = vst [vmem:[#allocation43_spill] sm:$0xff] %v7234_v29 }
  0xea   :  { %v561_v48 = vmul.f32 %v6065_v45, %v529_v23  ;;  %v549_v51 = vadd.f32 %v6063_v26, %v548_v43  ;;  %v6067_v58 = vpop.eup %6066  ;;  %vm566_vm12 = vweird.f32 %v6065_v45  ;;  %v622_v23 = vpop.f32.mrf.mxu0  ;;  %8845 = vst [vmem:[#allocation44_spill] sm:$0xff] %v7236_v32  ;;  %v643_v39 = vadd.f32 %v642_v27, %v7236_v32 }
  0xeb   :  { %v538_v54 = vsel %vm537_vm8, %v6061_v24, %v534_v46  ;;  %vm567_vm14 = vmor %vm565_vm13, %vm566_vm12  ;;  %v623_v38 = vadd.f32 %v622_v23, %v7234_v29  ;;  %8846 = vst [vmem:[#allocation45_spill] sm:$0xff] %v7240_v42  ;;  %v7290_v23 = vld [vmem:[#allocation14 + $0x30] sm:$0x3f] }
  0xec   :  { %v562_v61 = vsub.f32 1.0, %v561_v48  ;;  %v543_v2 = vsel %vm540_vm10, %v542_v50, %v538_v54  ;;  %v553_v3 = vsel %vm552_vm9, %v6063_v26, %v549_v51  ;;  %v7242_v48 = vld [vmem:[#allocation16 + $0x20] sm:$0x3f]  ;;  %v7244_v50 = vld [vmem:[#allocation16 + $0x28] sm:$0x3f] }
  0xed   :  { %v558_v4 = vsel %vm555_vm11, %v557_v52, %v553_v3  ;;  %v577_v5 = vmul.f32 %v6067_v58, %v543_v2  ;;  %v7246_v51 = vld [vmem:[#allocation16 + $0x30] sm:$0x3f]  ;;  %5670 = vmatpush.msk.msra.mxu0 %vm421_vm2, %v7242_v48  ;;  %5672 = vmatpush.msk.msra.mxu1 %vm421_vm2, %v7244_v50  ;;  %v7252_v54 = vld [vmem:[#allocation16 + $0x38] sm:$0x3f]  ;;  %v663_v58 = vadd.f32 %v662_v36, %v7240_v42  ;;  %v7257_v2 = vld [vmem:[#allocation16 + $0x8] sm:$0xff]  ;;  %v7292_v36 = vperm.slane %v409_v28, 3 }
  0xee   :  { %v563_v6 = vmul.f32 %v6065_v45, %v562_v61  ;;  %v576_v9 = vmul.f32 %v558_v4, %v414_v53  ;;  %v7255_v61 = vld [vmem:[#allocation16] sm:$0xff]  ;;  %5674 = vmatpush.msk.msra.mxu2 %vm421_vm2, %v7246_v51  ;;  %5676 = vmatpush.msk.msra.mxu3 %vm421_vm2, %v7252_v54  ;;  %v7263_v3 = vld [vmem:[#allocation16 + $0x10] sm:$0xff]  ;;  %v7267_v4 = vld [vmem:[#allocation16 + $0x18] sm:$0xff] }
  0xef   :  { %886 = vmatpush.msra.mxu0 %v7255_v61  ;;  %906 = vmatpush.msra.mxu1 %v7257_v2  ;;  %8847 = vst [vmem:[#allocation46_spill] sm:$0xff] %v7292_v36 }
  0xf0   :  { %v7221_v13 = vadd.f32 %v577_v5, %v576_v9  ;;  %v564_v14 = vadd.f32 %v6065_v45, %v563_v6  ;;  %v413_v5 = vld [vmem:[%s8791_s12 + $0x2] sm:$0x1]  ;;  %926 = vmatpush.msra.mxu2 %v7263_v3  ;;  %946 = vmatpush.msra.mxu3 %v7267_v4  ;;  %v682_v6 = vpop.f32.mrf.mxu3 }
  0xf1   :  { %v683_v28 = vadd.f32 %v682_v6, %v7292_v36 }
  0xf2   :  { %6068 = vtanh.f32 %v7221_v13  ;;  %v568_v21 = vsel %vm567_vm14, %v6065_v45, %v564_v14 }
  0xf3   :  { %v573_v25 = vsel %vm570_vm15, %v572_v22, %v568_v21  ;;  %v7280_v21 = vld [vmem:[#allocation14 + $0x28] sm:$0x3f] }
  0xf8   :  { %v6069_v24 = vpop.eup %6068 }
  0xf9   :  { %v7224_v26 = vmul.f32 %v6069_v24, %v573_v25  ;;  %v7286_v24 = vld [vmem:[#allocation14] sm:$0xff]  ;;  %v7288_v25 = vld [vmem:[#allocation14 + $0x8] sm:$0xff] }
  0xfb   :  { %5660 = vmatmul.msk.f32.vlgmr.msrb.gmra.mxu0 %vm417_vm3, %v7224_v26  ;;  %5662 = vmatmul.msk.f32.vlgmr.msrb.gmra.mxu1 %vm417_vm3, %v7224_v26 }
  0xfc   :  { %5664 = vmatmul.msk.f32.vlgmr.msrb.gmra.mxu2 %vm417_vm3, %v7224_v26  ;;  %5666 = vmatmul.msk.f32.vlgmr.msrb.gmra.mxu3 %vm417_vm3, %v7224_v26 }
  0xfd   :  { %5678 = vmatpush.msk.msrb.mxu0 %vm421_vm2, %v7278_v18  ;;  %5680 = vmatpush.msk.msrb.mxu1 %vm421_vm2, %v7280_v21 }
  0xfe   :  { %5682 = vmatpush.msk.msrb.mxu2 %vm421_vm2, %v7290_v23 }
  0xff   :  { %981 = vmatpush.msrb.mxu0 %v7286_v24  ;;  %1001 = vmatpush.msrb.mxu1 %v7288_v25 }
 0x103   :  { %5671 = vmatmul.msk.f32.vlgmr.msra.gmra.mxu0 %vm417_vm3, %v413_v5  ;;  %5673 = vmatmul.msk.f32.vlgmr.msra.gmra.mxu1 %vm417_vm3, %v413_v5 }
 0x104   :  { %5675 = vmatmul.msk.f32.vlgmr.msra.gmra.mxu2 %vm417_vm3, %v413_v5  ;;  %5677 = vmatmul.msk.f32.vlgmr.msra.gmra.mxu3 %vm417_vm3, %v413_v5 }
 0x105   :  { %5689 = vmatpush.msk.msra.mxu0 %vm421_vm2, %v7098_v30  ;;  %5691 = vmatpush.msk.msra.mxu1 %vm421_vm2, %v7100_v31 }
 0x107   :  { %1128 = vmatpush.msra.mxu0 %v7107_v34  ;;  %1148 = vmatpush.msra.mxu1 %v7109_v35 }
 0x178   :  { %v717_v43 = vpop.f32.mrf.mxu0  ;;  %v737_v44 = vpop.f32.mrf.mxu1 }
 0x179   :  { %v780_v45 = vadd.f32 %v717_v43, %v623_v38  ;;  %v781_v46 = vadd.f32 %v737_v44, %v643_v39  ;;  %v7296_v39 = vld [vmem:[#allocation14 + $0x38] sm:$0x3f]  ;;  %v7298_v43 = vld [vmem:[#allocation14 + $0x10] sm:$0xff] }
 0x17a   :  { %5684 = vmatpush.msk.msrb.mxu3 %vm421_vm2, %v7296_v39  ;;  %1021 = vmatpush.msrb.mxu2 %v7298_v43 }
 0x17b   :  { %v5667_v52 = vmul.f32 -1.442695, %v780_v45  ;;  %v5668_v53 = vmul.f32 -1.442695, %v781_v46  ;;  %v7302_v45 = vld [vmem:[#allocation14 + $0x18] sm:$0xff] }
 0x17c   :  { %1041 = vmatpush.msrb.mxu3 %v7302_v45  ;;  %5693 = vmatpush.msk.msra.mxu2 %vm421_vm2, %v7103_v33 }
 0x17d   :  { %6070 = vpow2.f32 %v5667_v52 }
 0x17e   :  { %6072 = vpow2.f32 %v5668_v53  ;;  %5695 = vmatpush.msk.msra.mxu3 %vm421_vm2, %v7125_v40  ;;  %1168 = vmatpush.msra.mxu2 %v7115_v37 }
 0x17f   :  { %v757_v9 = vpop.f32.mrf.mxu2  ;;  %v777_v46 = vpop.f32.mrf.mxu3 }
 0x180   :  { %v782_v14 = vadd.f32 %v757_v9, %v663_v58  ;;  %v783_v58 = vadd.f32 %v777_v46, %v683_v28  ;;  %1188 = vmatpush.msra.mxu3 %v7131_v41 }
 0x182   :  { %v5669_v15 = vmul.f32 -1.442695, %v782_v14 }
 0x183   :  { %v6071_v22 = vpop.eup %6070 }
 0x184   :  { %v6073_v27 = vpop.eup %6072  ;;  %v793_v38 = vadd.f32 1.0, %v6071_v22  ;;  %6074 = vpow2.f32 %v5669_v15 }
 0x185   :  { %v794_v44 = vadd.f32 1.0, %v6073_v27 }
 0x186   :  { %6076 = vrcp.f32 %v793_v38  ;;  %v807_v22 = vand.u32 2147483648, %v793_v38  ;;  %v805_v42 = vand.u32 2147483647, %v793_v38  ;;  %vm801_vm5 = vweird.f32 %v793_v38 }
 0x187   :  { %6078 = vrcp.f32 %v794_v44  ;;  %v822_v27 = vand.u32 2147483648, %v794_v44  ;;  %v820_v29 = vand.u32 2147483647, %v794_v44  ;;  %vm816_vm6 = vweird.f32 %v794_v44 }
 0x188   :  { %v808_v46 = vor.u32 1.1754944e-38, %v807_v22  ;;  %vm806_vm9 = vcmp.eq.f32.partialorder %v805_v42, 8.507059e+37 }
 0x189   :  { %vm821_vm10 = vcmp.eq.f32.partialorder %v820_v29, 8.507059e+37 }
 0x18a   :  { %v6075_v52 = vpop.eup %6074 }
 0x18b   :  { %v795_v30 = vadd.f32 1.0, %v6075_v52 }
 0x18c   :  { %v6077_v53 = vpop.eup %6076 }
 0x18d   :  { %v6079_v5 = vpop.eup %6078  ;;  %v797_v6 = vmul.f32 %v6077_v53, %v793_v38  ;;  %6080 = vrcp.f32 %v795_v30  ;;  %vm802_vm1 = vweird.f32 %v6077_v53  ;;  %v837_v22 = vand.u32 2147483648, %v795_v30 }
 0x18e   :  { %v812_v9 = vmul.f32 %v6079_v5, %v794_v44  ;;  %6082 = vtanh.f32 %v783_v58  ;;  %vm817_vm4 = vweird.f32 %v6079_v5  ;;  %vm803_vm7 = vmor %vm801_vm5, %vm802_vm1  ;;  %v415_v58 = vld [vmem:[%s8792_s13 + $0x1] sm:$0x1]  ;;  %vm831_vm12 = vweird.f32 %v795_v30 }
 0x18f   :  { %v798_v14 = vsub.f32 1.0, %v797_v6  ;;  %vm818_vm8 = vmor %vm816_vm6, %vm817_vm4  ;;  %v823_v6 = vor.u32 1.1754944e-38, %v822_v27  ;;  %v835_v27 = vand.u32 2147483647, %v795_v30  ;;  %v838_v42 = vor.u32 1.1754944e-38, %v837_v22 }
 0x190   :  { %v813_v15 = vsub.f32 1.0, %v812_v9 }
 0x191   :  { %v799_v36 = vmul.f32 %v6077_v53, %v798_v14  ;;  %vm836_vm14 = vcmp.eq.f32.partialorder %v835_v27, 8.507059e+37 }
 0x192   :  { %v814_v32 = vmul.f32 %v6079_v5, %v813_v15 }
 0x193   :  { %v6081_v52 = vpop.eup %6080  ;;  %v800_v37 = vadd.f32 %v6077_v53, %v799_v36 }
 0x194   :  { %v827_v28 = vmul.f32 %v6081_v52, %v795_v30  ;;  %v815_v41 = vadd.f32 %v6079_v5, %v814_v32  ;;  %v6083_v14 = vpop.eup %6082  ;;  %vm832_vm11 = vweird.f32 %v6081_v52 }
 0x195   :  { %v804_v9 = vsel %vm803_vm7, %v6077_v53, %v800_v37  ;;  %vm833_vm13 = vmor %vm831_vm12, %vm832_vm11 }
 0x196   :  { %v828_v15 = vsub.f32 1.0, %v827_v28  ;;  %v809_v35 = vsel %vm806_vm9, %v808_v46, %v804_v9  ;;  %v819_v34 = vsel %vm818_vm8, %v6079_v5, %v815_v41 }
 0x197   :  { %v824_v36 = vsel %vm821_vm10, %v823_v6, %v819_v34  ;;  %v843_v38 = vmul.f32 %v6083_v14, %v809_v35  ;;  %v888_v34 = vpop.f32.mrf.mxu0  ;;  %v908_v35 = vpop.f32.mrf.mxu1 }
 0x198   :  { %v829_v44 = vmul.f32 %v6081_v52, %v828_v15  ;;  %v842_v40 = vmul.f32 %v824_v36, %v415_v58 }
 0x19a   :  { %v7324_v33 = vadd.f32 %v843_v38, %v842_v40  ;;  %v830_v32 = vadd.f32 %v6081_v52, %v829_v44  ;;  %v410_v40 = vld [vmem:[#allocation17] sm:$0xf] }
 0x19b   :  { %v7396_v27 = vperm.slane %v410_v40, 3 }
 0x19c   :  { %6084 = vtanh.f32 %v7324_v33  ;;  %v834_v37 = vsel %vm833_vm13, %v6081_v52, %v830_v32 }
 0x19d   :  { %v839_v41 = vsel %vm836_vm14, %v838_v42, %v834_v37  ;;  %8848 = vst [vmem:[#allocation47_spill] sm:$0xff] %v7396_v27 }
 0x1a2   :  { %v6085_v53 = vpop.eup %6084 }
 0x1a3   :  { %v846_v29 = vmul.f32 %v6085_v53, %v839_v41 }
 0x1a5   :  { %5679 = vmatmul.msk.f32.vlgmr.msrb.gmra.mxu0 %vm417_vm3, %v846_v29  ;;  %5681 = vmatmul.msk.f32.vlgmr.msrb.gmra.mxu1 %vm417_vm3, %v846_v29 }
 0x1a6   :  { %5683 = vmatmul.msk.f32.vlgmr.msrb.gmra.mxu2 %vm417_vm3, %v846_v29  ;;  %5685 = vmatmul.msk.f32.vlgmr.msrb.gmra.mxu3 %vm417_vm3, %v846_v29 }
 0x1a7   :  { %5700 = vmatpush.msk.msrb.mxu0 %vm421_vm2, %v7148_v55  ;;  %5702 = vmatpush.msk.msrb.mxu1 %vm421_vm2, %v7150_v56  ;;  %v7379_v55 = vperm.slane %v410_v40, 0  ;;  %v7381_v56 = vperm.slane %v410_v40, 1 }
 0x1a8   :  { %5704 = vmatpush.msk.msrb.mxu2 %vm421_vm2, %v7152_v57  ;;  %5706 = vmatpush.msk.msrb.mxu3 %vm421_vm2, %v7158_v59  ;;  %v928_v57 = vpop.f32.mrf.mxu2 }
 0x1a9   :  { %1290 = vmatpush.msrb.mxu0 %v7162_v62  ;;  %1310 = vmatpush.msrb.mxu1 %v7164_v63  ;;  %v889_v59 = vadd.f32 %v888_v34, %v7379_v55  ;;  %v909_v62 = vadd.f32 %v908_v35, %v7381_v56 }
 0x1aa   :  { %1330 = vmatpush.msrb.mxu2 %v7170_v0  ;;  %1350 = vmatpush.msrb.mxu3 %v7174_v1 }
 0x1ad   :  { %5690 = vmatmul.msk.f32.vlgmr.msra.gmra.mxu0 %vm417_vm3, %v7224_v26  ;;  %5692 = vmatmul.msk.f32.vlgmr.msra.gmra.mxu1 %vm417_vm3, %v7224_v26 }
 0x1ae   :  { %5694 = vmatmul.msk.f32.vlgmr.msra.gmra.mxu2 %vm417_vm3, %v7224_v26  ;;  %5696 = vmatmul.msk.f32.vlgmr.msra.gmra.mxu3 %vm417_vm3, %v7224_v26 }
 0x1af   :  { %5708 = vmatpush.msk.msra.mxu0 %vm421_vm2, %v7186_v7  ;;  %5710 = vmatpush.msk.msra.mxu1 %vm421_vm2, %v7188_v8 }
 0x1b0   :  { %5712 = vmatpush.msk.msra.mxu2 %vm421_vm2, %v7198_v12  ;;  %5714 = vmatpush.msk.msra.mxu3 %vm421_vm2, %v7203_v16  ;;  %v7385_v12 = vperm.slane %v410_v40, 2 }
 0x1b1   :  { %1374 = vmatpush.msra.mxu0 %v7194_v10  ;;  %1394 = vmatpush.msra.mxu1 %v7196_v11  ;;  %v948_v11 = vpop.f32.mrf.mxu3 }
 0x1b2   :  { %1414 = vmatpush.msra.mxu2 %v7205_v17  ;;  %1434 = vmatpush.msra.mxu3 %v7209_v19  ;;  %v929_v26 = vadd.f32 %v928_v57, %v7385_v12  ;;  %v949_v34 = vadd.f32 %v948_v11, %v7396_v27 }
 0x1b5   :  { %5701 = vmatmul.msk.f32.vlgmr.msrb.gmra.mxu0 %vm417_vm3, %v846_v29  ;;  %5703 = vmatmul.msk.f32.vlgmr.msrb.gmra.mxu1 %vm417_vm3, %v846_v29 }
 0x1b6   :  { %5705 = vmatmul.msk.f32.vlgmr.msrb.gmra.mxu2 %vm417_vm3, %v846_v29  ;;  %5707 = vmatmul.msk.f32.vlgmr.msrb.gmra.mxu3 %vm417_vm3, %v846_v29 }
 0x1b7   :  { %5719 = vmatpush.msk.msrb.mxu0 %vm421_vm2, %v7242_v48  ;;  %5721 = vmatpush.msk.msrb.mxu1 %vm421_vm2, %v7244_v50 }
 0x1b8   :  { %5723 = vmatpush.msk.msrb.mxu2 %vm421_vm2, %v7246_v51  ;;  %5725 = vmatpush.msk.msrb.mxu3 %vm421_vm2, %v7252_v54 }
 0x1b9   :  { %1524 = vmatpush.msrb.mxu0 %v7255_v61  ;;  %1544 = vmatpush.msrb.mxu1 %v7257_v2 }
 0x1ba   :  { %1564 = vmatpush.msrb.mxu2 %v7263_v3  ;;  %1584 = vmatpush.msrb.mxu3 %v7267_v4 }
 0x222   :  { %v983_v63 = vpop.f32.mrf.mxu0  ;;  %v1003_v0 = vpop.f32.mrf.mxu1 }
 0x223   :  { %v1046_v1 = vadd.f32 %v983_v63, %v889_v59  ;;  %v1047_v7 = vadd.f32 %v1003_v0, %v909_v62 }
 0x225   :  { %v5686_v8 = vmul.f32 -1.442695, %v1046_v1  ;;  %v5687_v10 = vmul.f32 -1.442695, %v1047_v7 }
 0x227   :  { %6086 = vpow2.f32 %v5686_v8 }
 0x228   :  { %6088 = vpow2.f32 %v5687_v10 }
 0x229   :  { %v1023_v16 = vpop.f32.mrf.mxu2  ;;  %v1043_v38 = vpop.f32.mrf.mxu3 }
 0x22a   :  { %v1130_v17 = vpop.f32.mrf.mxu0  ;;  %v1150_v19 = vpop.f32.mrf.mxu1  ;;  %v1048_v14 = vadd.f32 %v1023_v16, %v929_v26  ;;  %v1049_v0 = vadd.f32 %v1043_v38, %v949_v34 }
 0x22b   :  { %v1197_v30 = vrot.slane %v1130_v17, 7  ;;  %v1198_v5 = vrot.slane %v1150_v19, 7  ;;  %v1268_v17 = vrot.slane %v7221_v13, 7 }
 0x22c   :  { %v5688_v22 = vmul.f32 -1.442695, %v1048_v14 }
 0x22d   :  { %v6087_v52 = vpop.eup %6086  ;;  %v1205_v28 = vadd.f32 %v1197_v30, %v7141_v47  ;;  %v1206_v46 = vadd.f32 %v1198_v5, %v7143_v49 }
 0x22e   :  { %v6089_v6 = vpop.eup %6088  ;;  %v7390_v58 = vadd.f32 1.0, %v6087_v52 }
 0x22f   :  { %v7392_v9 = vadd.f32 1.0, %v6089_v6  ;;  %v5697_v15 = vmul.f32 -1.442695, %v1205_v28  ;;  %v5698_v36 = vmul.f32 -1.442695, %v1206_v46 }
 0x230   :  { %6090 = vrcp.f32 %v7390_v58  ;;  %vm1067_vm15 = vweird.f32 %v7390_v58  ;;  %v1071_v30 = vand.u32 2147483647, %v7390_v58  ;;  %v1073_v46 = vand.u32 2147483648, %v7390_v58 }
 0x231   :  { %6092 = vrcp.f32 %v7392_v9  ;;  %v1170_v44 = vpop.f32.mrf.mxu2  ;;  %v1190_v40 = vpop.f32.mrf.mxu3  ;;  %vm1082_vm1 = vweird.f32 %v7392_v9 }
 0x232   :  { %6094 = vpow2.f32 %v5697_v15  ;;  %v1199_v32 = vrot.slane %v1170_v44, 7  ;;  %v1200_v7 = vrot.slane %v1190_v40, 7  ;;  %v1088_v15 = vand.u32 2147483648, %v7392_v9 }
 0x233   :  { %6096 = vpow2.f32 %v5698_v36  ;;  %v1086_v36 = vand.u32 2147483647, %v7392_v9 }
 0x234   :  { %v1207_v37 = vadd.f32 %v1199_v32, %v7160_v60  ;;  %6098 = vpow2.f32 %v5688_v22  ;;  %v1208_v5 = vadd.f32 %v1200_v7, %v7214_v20 }
 0x236   :  { %v7399_v42 = vpop.eup %6090  ;;  %v5699_v53 = vmul.f32 -1.442695, %v1207_v37 }
 0x237   :  { %v7401_v41 = vpop.eup %6092  ;;  %v1063_v59 = vmul.f32 %v7399_v42, %v7390_v58  ;;  %vm1068_vm5 = vweird.f32 %v7399_v42 }
 0x238   :  { %v6095_v29 = vpop.eup %6094  ;;  %6100 = vpow2.f32 %v5699_v53  ;;  %v1078_v63 = vmul.f32 %v7401_v41, %v7392_v9  ;;  %vm1083_vm4 = vweird.f32 %v7401_v41  ;;  %vm7444_vm9 = vmor %vm1067_vm15, %vm1068_vm5 }
 0x239   :  { %v6097_v35 = vpop.eup %6096  ;;  %v1218_v57 = vadd.f32 1.0, %v6095_v29  ;;  %v1064_v10 = vsub.f32 1.0, %v1063_v59  ;;  %vm7434_vm7 = vmor %vm1082_vm1, %vm1083_vm4  ;;  %vm1072_vm1 = vcmp.eq.f32.partialorder %v1071_v30, 8.507059e+37  ;;  %vm1087_vm4 = vcmp.eq.f32.partialorder %v1086_v36, 8.507059e+37 }
 0x23a   :  { %v7406_v62 = vadd.f32 1.0, %v6097_v35  ;;  %v6099_v1 = vpop.eup %6098  ;;  %v1079_v11 = vsub.f32 1.0, %v1078_v63 }
 0x23b   :  { %6102 = vrcp.f32 %v1218_v57  ;;  %v7414_v19 = vadd.f32 1.0, %v6099_v1  ;;  %v1065_v28 = vmul.f32 %v7399_v42, %v1064_v10  ;;  %v1230_v22 = vand.u32 2147483647, %v1218_v57 }
 0x23c   :  { %6104 = vrcp.f32 %v7406_v62  ;;  %v1080_v14 = vmul.f32 %v7401_v41, %v1079_v11  ;;  %v1232_v37 = vand.u32 2147483648, %v1218_v57  ;;  %v1247_v34 = vand.u32 2147483648, %v7406_v62 }
 0x23d   :  { %6106 = vtanh.f32 %v1049_v0  ;;  %v1066_v29 = vadd.f32 %v7399_v42, %v1065_v28  ;;  %v1245_v1 = vand.u32 2147483647, %v7406_v62  ;;  %vm1226_vm10 = vweird.f32 %v1218_v57 }
 0x23e   :  { %v6101_v8 = vpop.eup %6100  ;;  %v1081_v63 = vadd.f32 %v7401_v41, %v1080_v14  ;;  %vm1241_vm11 = vweird.f32 %v7406_v62  ;;  %vm1231_vm13 = vcmp.eq.f32.partialorder %v1230_v22, 8.507059e+37  ;;  %v1233_v11 = vor.u32 1.1754944e-38, %v1232_v37 }
 0x23f   :  { %v7411_v16 = vadd.f32 1.0, %v6101_v8  ;;  %v1074_v8 = vor.u32 1.1754944e-38, %v1073_v46  ;;  %v1070_v58 = vsel %vm7444_vm9, %v7399_v42, %v1066_v29  ;;  %vm1246_vm15 = vcmp.eq.f32.partialorder %v1245_v1, 8.507059e+37  ;;  %v416_v29 = vld [vmem:[%s8792_s13 + $0x2] sm:$0x1] }
 0x241   :  { %v6103_v26 = vpop.eup %6102  ;;  %6108 = vrcp.f32 %v7411_v16  ;;  %v1262_v30 = vand.u32 2147483648, %v7411_v16 }
 0x242   :  { %v6105_v52 = vpop.eup %6104  ;;  %v1222_v6 = vmul.f32 %v6103_v26, %v1218_v57  ;;  %6110 = vrcp.f32 %v7414_v19  ;;  %vm1227_vm6 = vweird.f32 %v6103_v26  ;;  %v1085_v57 = vsel %vm7434_vm7, %v7401_v41, %v1081_v63 }
 0x243   :  { %v1237_v38 = vmul.f32 %v6105_v52, %v7406_v62  ;;  %6112 = vtanh.f32 %v1208_v5  ;;  %v6107_v53 = vpop.eup %6106  ;;  %vm1242_vm8 = vweird.f32 %v6105_v52  ;;  %vm1228_vm12 = vmor %vm1226_vm10, %vm1227_vm6  ;;  %v1075_v41 = vsel %vm1072_vm1, %v1074_v8, %v1070_v58 }
 0x244   :  { %v1223_v44 = vsub.f32 1.0, %v1222_v6  ;;  %vm1243_vm14 = vmor %vm1241_vm11, %vm1242_vm8  ;;  %v1248_v6 = vor.u32 1.1754944e-38, %v1247_v34  ;;  %v1109_v63 = vmul.f32 %v6107_v53, %v1075_v41  ;;  %vm1256_vm6 = vweird.f32 %v7411_v16 }
 0x245   :  { %v1238_v32 = vsub.f32 1.0, %v1237_v38  ;;  %v1263_v1 = vor.u32 1.1754944e-38, %v1262_v30  ;;  %vm1097_vm10 = vweird.f32 %v7414_v19 }
 0x246   :  { %v1224_v35 = vmul.f32 %v6103_v26, %v1223_v44 }
 0x247   :  { %v6109_v59 = vpop.eup %6108  ;;  %v1239_v0 = vmul.f32 %v6105_v52, %v1238_v32  ;;  %v1089_v32 = vor.u32 1.1754944e-38, %v1088_v15 }
 0x248   :  { %v1252_v9 = vmul.f32 %v6109_v59, %v7411_v16  ;;  %v1225_v10 = vadd.f32 %v6103_v26, %v1224_v35  ;;  %v7450_v28 = vpop.eup %6110  ;;  %vm1257_vm5 = vweird.f32 %v6109_v59 }
 0x249   :  { %v1240_v5 = vadd.f32 %v6105_v52, %v1239_v0  ;;  %v6113_v38 = vpop.eup %6112  ;;  %v1090_v34 = vsel %vm1087_vm4, %v1089_v32, %v1085_v57  ;;  %vm1258_vm7 = vmor %vm1256_vm6, %vm1257_vm5  ;;  %vm1098_vm9 = vweird.f32 %v7450_v28  ;;  %v8861_v57 = vld [vmem:[#allocation44_spill] sm:$0xff] }
 0x24a   :  { %v1253_v14 = vsub.f32 1.0, %v1252_v9  ;;  %v1229_v46 = vsel %vm1228_vm12, %v6103_v26, %v1225_v10  ;;  %v1093_v26 = vmul.f32 %v7450_v28, %v7414_v19  ;;  %v1108_v40 = vmul.f32 %v1090_v34, %v416_v29  ;;  %vm1099_vm11 = vmor %vm1097_vm10, %vm1098_vm9 }
 0x24b   :  { %v1234_v62 = vsel %vm1231_vm13, %v1233_v11, %v1229_v46  ;;  %v1244_v44 = vsel %vm1243_vm14, %v6105_v52, %v1240_v5  ;;  %v8860_v46 = vld [vmem:[#allocation43_spill] sm:$0xff] }
 0x24c   :  { %v1254_v22 = vmul.f32 %v6109_v59, %v1253_v14  ;;  %v1249_v37 = vsel %vm1246_vm15, %v1248_v6, %v1244_v44  ;;  %v1271_v35 = vmul.f32 %v6113_v38, %v1234_v62  ;;  %v1094_v13 = vsub.f32 1.0, %v1093_v26  ;;  %v1312_v14 = vpop.f32.mrf.mxu1  ;;  %v1332_v62 = vpop.f32.mrf.mxu2  ;;  %v8862_v26 = vld [vmem:[#allocation45_spill] sm:$0xff] }
 0x24d   :  { %v1270_v42 = vmul.f32 %v1268_v17, %v1249_v37  ;;  %v1260_v17 = vand.u32 2147483647, %v7411_v16  ;;  %v7471_v0 = vadd.f32 %v1109_v63, %v1108_v40  ;;  %v1103_v16 = vand.u32 2147483648, %v7414_v19 }
 0x24e   :  { %v1255_v15 = vadd.f32 %v6109_v59, %v1254_v22  ;;  %v1095_v7 = vmul.f32 %v7450_v28, %v1094_v13  ;;  %v1333_v29 = vadd.f32 %v1332_v62, %v8862_v26 }
 0x24f   :  { %v7465_v52 = vadd.f32 %v1271_v35, %v1270_v42  ;;  %vm1261_vm8 = vcmp.eq.f32.partialorder %v1260_v17, 8.507059e+37  ;;  %v1104_v6 = vor.u32 1.1754944e-38, %v1103_v16 }
 0x250   :  { %v1259_v36 = vsel %vm1258_vm7, %v6109_v59, %v1255_v15  ;;  %v1096_v11 = vadd.f32 %v7450_v28, %v1095_v7  ;;  %v1101_v59 = vand.u32 2147483647, %v7414_v19  ;;  %v1352_v15 = vpop.f32.mrf.mxu3  ;;  %v8863_v7 = vld [vmem:[#allocation46_spill] sm:$0xff] }
 0x251   :  { %6114 = vtanh.f32 %v7465_v52  ;;  %v1264_v9 = vsel %vm1261_vm8, %v1263_v1, %v1259_v36 }
 0x252   :  { %6116 = vtanh.f32 %v7471_v0  ;;  %v1100_v5 = vsel %vm1099_vm11, %v7450_v28, %v1096_v11  ;;  %vm1102_vm12 = vcmp.eq.f32.partialorder %v1101_v59, 8.507059e+37  ;;  %v1292_v28 = vpop.f32.mrf.mxu0 }
 0x253   :  { %v1105_v19 = vsel %vm1102_vm12, %v1104_v6, %v1100_v5  ;;  %v1293_v38 = vadd.f32 %v1292_v28, %v8860_v46 }
 0x257   :  { %v6115_v8 = vpop.eup %6114 }
 0x258   :  { %v1274_v53 = vmul.f32 %v6115_v8, %v1264_v9  ;;  %v6117_v58 = vpop.eup %6116  ;;  %v1353_v8 = vadd.f32 %v1352_v15, %v8863_v7 }
 0x25a   :  { %v7475_v10 = vrot.slane %v1274_v53, 1 }
 0x25c   :  { %5709 = vmatmul.msk.f32.vlgmr.msra.gmra.mxu0 %vm417_vm3, %v7475_v10  ;;  %5711 = vmatmul.msk.f32.vlgmr.msra.gmra.mxu1 %vm417_vm3, %v7475_v10 }
 0x25d   :  { %5713 = vmatmul.msk.f32.vlgmr.msra.gmra.mxu2 %vm417_vm3, %v7475_v10  ;;  %5715 = vmatmul.msk.f32.vlgmr.msra.gmra.mxu3 %vm417_vm3, %v7475_v10 }
 0x25e   :  { %5727 = vmatpush.msk.msra.mxu0 %vm421_vm2, %v7278_v18  ;;  %5729 = vmatpush.msk.msra.mxu1 %vm421_vm2, %v7280_v21  ;;  %v7503_v18 = vmul.f32 %v6117_v58, %v1105_v19  ;;  %v7513_v21 = vld [vmem:[#allocation7 + $0x20] sm:$0x3f] }
 0x25f   :  { %5731 = vmatpush.msk.msra.mxu2 %vm421_vm2, %v7290_v23  ;;  %5733 = vmatpush.msk.msra.mxu3 %vm421_vm2, %v7296_v39  ;;  %v8856_v23 = vld [vmem:[#allocation36_spill] sm:$0xff]  ;;  %v8857_v39 = vld [vmem:[#allocation37_spill] sm:$0xff] }
 0x260   :  { %1607 = vmatpush.msra.mxu0 %v7286_v24  ;;  %1627 = vmatpush.msra.mxu1 %v7288_v25  ;;  %8853 = vst [vmem:[#allocation48_spill] sm:$0xff] %v7503_v18  ;;  %v8854_v24 = vld [vmem:[#allocation35_spill] sm:$0xff] }
 0x261   :  { %1647 = vmatpush.msra.mxu2 %v7298_v43  ;;  %1667 = vmatpush.msra.mxu3 %v7302_v45  ;;  %v8855_v25 = vld [vmem:[#allocation39_spill] sm:$0xff]  ;;  %v8858_v43 = vld [vmem:[#allocation38_spill] sm:$0xff]  ;;  %v8859_v45 = vld [vmem:[#allocation40_spill] sm:$0xff] }
 0x264   :  { %5720 = vmatmul.msk.f32.vlgmr.msrb.gmra.mxu0 %vm417_vm3, %v7503_v18  ;;  %5722 = vmatmul.msk.f32.vlgmr.msrb.gmra.mxu1 %vm417_vm3, %v7503_v18 }
 0x265   :  { %5724 = vmatmul.msk.f32.vlgmr.msrb.gmra.mxu2 %vm417_vm3, %v7503_v18  ;;  %5726 = vmatmul.msk.f32.vlgmr.msrb.gmra.mxu3 %vm417_vm3, %v7503_v18 }
 0x266   :  { %5738 = vmatpush.msk.msrb.mxu0 %vm421_vm2, %v7513_v21  ;;  %5740 = vmatpush.msk.msrb.mxu1 %vm421_vm2, %v7100_v31  ;;  %v1313_v31 = vadd.f32 %v1312_v14, %v8861_v57 }
 0x267   :  { %5742 = vmatpush.msk.msrb.mxu2 %vm421_vm2, %v8854_v24  ;;  %5744 = vmatpush.msk.msrb.mxu3 %vm421_vm2, %v8855_v25 }
 0x268   :  { %1754 = vmatpush.msrb.mxu0 %v8856_v23  ;;  %1774 = vmatpush.msrb.mxu1 %v8857_v39 }
 0x269   :  { %1794 = vmatpush.msrb.mxu2 %v8858_v43  ;;  %1814 = vmatpush.msrb.mxu3 %v8859_v45 }
 0x2d9   :  { %v1376_v44 = vpop.f32.mrf.mxu0  ;;  %v1396_v32 = vpop.f32.mrf.mxu1 }
 0x2da   :  { %v1439_v22 = vadd.f32 %v1376_v44, %v1293_v38  ;;  %v1440_v37 = vadd.f32 %v1396_v32, %v1313_v31 }
 0x2dc   :  { %v5716_v35 = vmul.f32 -1.442695, %v1439_v22  ;;  %v5717_v42 = vmul.f32 -1.442695, %v1440_v37 }
 0x2de   :  { %6118 = vpow2.f32 %v5716_v35 }
 0x2df   :  { %6120 = vpow2.f32 %v5717_v42 }
 0x2e0   :  { %v1416_v41 = vpop.f32.mrf.mxu2  ;;  %v1436_v36 = vpop.f32.mrf.mxu3 }
 0x2e1   :  { %v1441_v34 = vadd.f32 %v1416_v41, %v1333_v29  ;;  %v1442_v11 = vadd.f32 %v1436_v36, %v1353_v8 }
 0x2e3   :  { %v5718_v40 = vmul.f32 -1.442695, %v1441_v34 }
 0x2e4   :  { %v6119_v63 = vpop.eup %6118 }
 0x2e5   :  { %v6121_v30 = vpop.eup %6120  ;;  %v1452_v13 = vadd.f32 1.0, %v6119_v63  ;;  %6122 = vpow2.f32 %v5718_v40 }
 0x2e6   :  { %v1453_v17 = vadd.f32 1.0, %v6121_v30 }
 0x2e7   :  { %6124 = vrcp.f32 %v1452_v13  ;;  %v1466_v19 = vand.u32 2147483648, %v1452_v13  ;;  %v1464_v23 = vand.u32 2147483647, %v1452_v13  ;;  %vm1460_vm15 = vweird.f32 %v1452_v13 }
 0x2e8   :  { %6126 = vrcp.f32 %v1453_v17  ;;  %v1481_v24 = vand.u32 2147483648, %v1453_v17  ;;  %v1479_v43 = vand.u32 2147483647, %v1453_v17  ;;  %vm1475_vm1 = vweird.f32 %v1453_v17 }
 0x2e9   :  { %v1467_v38 = vor.u32 1.1754944e-38, %v1466_v19  ;;  %vm1465_vm6 = vcmp.eq.f32.partialorder %v1464_v23, 8.507059e+37  ;;  %v7579_v19 = vld [vmem:[#allocation10 + $0x28] sm:$0x3f] }
 0x2ea   :  { %v1482_v62 = vor.u32 1.1754944e-38, %v1481_v24  ;;  %vm1480_vm7 = vcmp.eq.f32.partialorder %v1479_v43, 8.507059e+37  ;;  %v7583_v24 = vld [vmem:[#allocation10 + $0x30] sm:$0x3f]  ;;  %v7594_v23 = vld [vmem:[#allocation10 + $0x8] sm:$0xff]  ;;  %v7600_v43 = vld [vmem:[#allocation10 + $0x18] sm:$0xff] }
 0x2eb   :  { %v6123_v1 = vpop.eup %6122 }
 0x2ec   :  { %v1454_v9 = vadd.f32 1.0, %v6123_v1 }
 0x2ed   :  { %v6125_v53 = vpop.eup %6124 }
 0x2ee   :  { %v6127_v16 = vpop.eup %6126  ;;  %v1456_v59 = vmul.f32 %v6125_v53, %v1452_v13  ;;  %6128 = vrcp.f32 %v1454_v9  ;;  %vm1461_vm13 = vweird.f32 %v6125_v53  ;;  %v1496_v63 = vand.u32 2147483648, %v1454_v9 }
 0x2ef   :  { %v1471_v5 = vmul.f32 %v6127_v16, %v1453_v17  ;;  %6130 = vtanh.f32 %v1442_v11  ;;  %vm1476_vm14 = vweird.f32 %v6127_v16  ;;  %vm1462_vm4 = vmor %vm1460_vm15, %vm1461_vm13  ;;  %vm1490_vm9 = vweird.f32 %v1454_v9  ;;  %v7551_v11 = vld [vmem:[#allocation11 + $0x38] sm:$0x3f] }
 0x2f0   :  { %v1457_v58 = vsub.f32 1.0, %v1456_v59  ;;  %vm1477_vm5 = vmor %vm1475_vm1, %vm1476_vm14  ;;  %v1494_v30 = vand.u32 2147483647, %v1454_v9  ;;  %v1497_v17 = vor.u32 1.1754944e-38, %v1496_v63  ;;  %v7558_v59 = vld [vmem:[#allocation11 + $0x8] sm:$0xff] }
 0x2f1   :  { %v1472_v6 = vsub.f32 1.0, %v1471_v5  ;;  %v7561_v5 = vld [vmem:[#allocation11 + $0x10] sm:$0xff] }
 0x2f2   :  { %v1458_v25 = vmul.f32 %v6125_v53, %v1457_v58  ;;  %vm1495_vm11 = vcmp.eq.f32.partialorder %v1494_v30, 8.507059e+37  ;;  %v7564_v58 = vld [vmem:[#allocation11 + $0x18] sm:$0xff] }
 0x2f3   :  { %v1473_v39 = vmul.f32 %v6127_v16, %v1472_v6  ;;  %v7575_v6 = vld [vmem:[#allocation10 + $0x20] sm:$0x3f] }
 0x2f4   :  { %v6129_v45 = vpop.eup %6128  ;;  %v1459_v28 = vadd.f32 %v6125_v53, %v1458_v25  ;;  %v7587_v25 = vld [vmem:[#allocation10 + $0x38] sm:$0x3f] }
 0x2f5   :  { %v1486_v14 = vmul.f32 %v6129_v45, %v1454_v9  ;;  %v1474_v31 = vadd.f32 %v6127_v16, %v1473_v39  ;;  %v6131_v32 = vpop.eup %6130  ;;  %vm1491_vm8 = vweird.f32 %v6129_v45  ;;  %v7543_v9 = vld [vmem:[#allocation11 + $0x28] sm:$0x3f]  ;;  %v7597_v39 = vld [vmem:[#allocation10 + $0x10] sm:$0xff] }
 0x2f6   :  { %v1463_v44 = vsel %vm1462_vm4, %v6125_v53, %v1459_v28  ;;  %vm1492_vm10 = vmor %vm1490_vm9, %vm1491_vm8  ;;  %v7547_v53 = vld [vmem:[#allocation11 + $0x30] sm:$0x3f]  ;;  %v1546_v28 = vpop.f32.mrf.mxu1 }
 0x2f7   :  { %v1487_v22 = vsub.f32 1.0, %v1486_v14  ;;  %v1468_v37 = vsel %vm1465_vm6, %v1467_v38, %v1463_v44  ;;  %v1478_v35 = vsel %vm1477_vm5, %v6127_v16, %v1474_v31  ;;  %v7555_v16 = vld [vmem:[#allocation11] sm:$0xff]  ;;  %v1566_v14 = vpop.f32.mrf.mxu2 }
 0x2f8   :  { %v1483_v42 = vsel %vm1480_vm7, %v1482_v62, %v1478_v35  ;;  %v1502_v29 = vmul.f32 %v6131_v32, %v1468_v37  ;;  %v1567_v35 = vadd.f32 %v1566_v14, %v7385_v12 }
 0x2f9   :  { %v1488_v41 = vmul.f32 %v6129_v45, %v1487_v22  ;;  %v1501_v34 = vmul.f32 %v1483_v42, %v7324_v33  ;;  %v7539_v33 = vld [vmem:[#allocation11 + $0x20] sm:$0x3f] }
 0x2fb   :  { %v7532_v15 = vadd.f32 %v1502_v29, %v1501_v34  ;;  %v1489_v40 = vadd.f32 %v6129_v45, %v1488_v41 }
 0x2fd   :  { %6132 = vtanh.f32 %v7532_v15  ;;  %v1493_v13 = vsel %vm1492_vm10, %v6129_v45, %v1489_v40  ;;  %v1526_v45 = vpop.f32.mrf.mxu0 }
 0x2fe   :  { %v1498_v1 = vsel %vm1495_vm11, %v1497_v17, %v1493_v13 }
 0x303   :  { %v6133_v36 = vpop.eup %6132 }
 0x304   :  { %v1505_v8 = vmul.f32 %v6133_v36, %v1498_v1 }
 0x306   :  { %5728 = vmatmul.msk.f32.vlgmr.msra.gmra.mxu0 %vm417_vm3, %v1505_v8  ;;  %5730 = vmatmul.msk.f32.vlgmr.msra.gmra.mxu1 %vm417_vm3, %v1505_v8 }
 0x307   :  { %5732 = vmatmul.msk.f32.vlgmr.msra.gmra.mxu2 %vm417_vm3, %v1505_v8  ;;  %5734 = vmatmul.msk.f32.vlgmr.msra.gmra.mxu3 %vm417_vm3, %v1505_v8 }
 0x308   :  { %5749 = vmatpush.msk.msra.mxu0 %vm421_vm2, %v7539_v33  ;;  %5751 = vmatpush.msk.msra.mxu1 %vm421_vm2, %v7543_v9 }
 0x309   :  { %5753 = vmatpush.msk.msra.mxu2 %vm421_vm2, %v7547_v53  ;;  %5755 = vmatpush.msk.msra.mxu3 %vm421_vm2, %v7551_v11 }
 0x30a   :  { %1916 = vmatpush.msra.mxu0 %v7555_v16  ;;  %1936 = vmatpush.msra.mxu1 %v7558_v59 }
 0x30b   :  { %1956 = vmatpush.msra.mxu2 %v7561_v5  ;;  %1976 = vmatpush.msra.mxu3 %v7564_v58 }
 0x30e   :  { %5739 = vmatmul.msk.f32.vlgmr.msrb.gmra.mxu0 %vm417_vm3, %v7475_v10  ;;  %5741 = vmatmul.msk.f32.vlgmr.msrb.gmra.mxu1 %vm417_vm3, %v7475_v10 }
 0x30f   :  { %5743 = vmatmul.msk.f32.vlgmr.msrb.gmra.mxu2 %vm417_vm3, %v7475_v10  ;;  %5745 = vmatmul.msk.f32.vlgmr.msrb.gmra.mxu3 %vm417_vm3, %v7475_v10  ;;  %v7591_v10 = vld [vmem:[#allocation10] sm:$0xff] }
 0x310   :  { %5757 = vmatpush.msk.msrb.mxu0 %vm421_vm2, %v7575_v6  ;;  %5759 = vmatpush.msk.msrb.mxu1 %vm421_vm2, %v7579_v19 }
 0x311   :  { %5761 = vmatpush.msk.msrb.mxu2 %vm421_vm2, %v7583_v24  ;;  %5763 = vmatpush.msk.msrb.mxu3 %vm421_vm2, %v7587_v25 }
 0x312   :  { %2000 = vmatpush.msrb.mxu0 %v7591_v10  ;;  %2020 = vmatpush.msrb.mxu1 %v7594_v23 }
 0x313   :  { %2040 = vmatpush.msrb.mxu2 %v7597_v39  ;;  %2060 = vmatpush.msrb.mxu3 %v7600_v43 }
 0x316   :  { %5750 = vmatmul.msk.f32.vlgmr.msra.gmra.mxu0 %vm417_vm3, %v1505_v8  ;;  %5752 = vmatmul.msk.f32.vlgmr.msra.gmra.mxu1 %vm417_vm3, %v1505_v8 }
 0x317   :  { %5754 = vmatmul.msk.f32.vlgmr.msra.gmra.mxu2 %vm417_vm3, %v1505_v8  ;;  %5756 = vmatmul.msk.f32.vlgmr.msra.gmra.mxu3 %vm417_vm3, %v1505_v8 }
 0x318   :  { %5768 = vmatpush.msk.msra.mxu0 %vm421_vm2, %v7242_v48  ;;  %5770 = vmatpush.msk.msra.mxu1 %vm421_vm2, %v7244_v50  ;;  %v1527_v48 = vadd.f32 %v1526_v45, %v7379_v55  ;;  %v1547_v50 = vadd.f32 %v1546_v28, %v7381_v56 }
 0x319   :  { %5772 = vmatpush.msk.msra.mxu2 %vm421_vm2, %v7246_v51  ;;  %5774 = vmatpush.msk.msra.mxu3 %vm421_vm2, %v7252_v54 }
 0x31a   :  { %2150 = vmatpush.msra.mxu0 %v7255_v61  ;;  %2170 = vmatpush.msra.mxu1 %v7257_v2  ;;  %v1586_v61 = vpop.f32.mrf.mxu3 }
 0x31b   :  { %2190 = vmatpush.msra.mxu2 %v7263_v3  ;;  %2210 = vmatpush.msra.mxu3 %v7267_v4 }
 0x383   :  { %v1609_v38 = vpop.f32.mrf.mxu0  ;;  %v1629_v51 = vpop.f32.mrf.mxu1 }
 0x384   :  { %v1672_v31 = vadd.f32 %v1609_v38, %v1527_v48  ;;  %v1673_v62 = vadd.f32 %v1629_v51, %v1547_v50 }
 0x386   :  { %v5735_v54 = vmul.f32 -1.442695, %v1672_v31  ;;  %v5736_v44 = vmul.f32 -1.442695, %v1673_v62  ;;  %v1587_v31 = vadd.f32 %v1586_v61, %v7396_v27 }
 0x388   :  { %6134 = vpow2.f32 %v5735_v54 }
 0x389   :  { %6136 = vpow2.f32 %v5736_v44 }
 0x38a   :  { %v1649_v2 = vpop.f32.mrf.mxu2  ;;  %v1669_v17 = vpop.f32.mrf.mxu3 }
 0x38b   :  { %v1756_v3 = vpop.f32.mrf.mxu0  ;;  %v1776_v32 = vpop.f32.mrf.mxu1  ;;  %v1674_v63 = vadd.f32 %v1649_v2, %v1567_v35 }
 0x38c   :  { %v1823_v4 = vrot.slane %v1756_v3, 6  ;;  %v1824_v22 = vrot.slane %v1776_v32, 6  ;;  %v1675_v3 = vadd.f32 %v1669_v17, %v1587_v31 }
 0x38d   :  { %v5737_v8 = vmul.f32 -1.442695, %v1674_v63 }
 0x38e   :  { %v6135_v37 = vpop.eup %6134  ;;  %v1831_v42 = vadd.f32 %v1823_v4, %v7141_v47  ;;  %v1832_v29 = vadd.f32 %v1824_v22, %v7143_v49 }
 0x38f   :  { %v6137_v41 = vpop.eup %6136  ;;  %v7624_v34 = vadd.f32 1.0, %v6135_v37 }
 0x390   :  { %v7626_v40 = vadd.f32 1.0, %v6137_v41  ;;  %v5746_v30 = vmul.f32 -1.442695, %v1831_v42  ;;  %v5747_v13 = vmul.f32 -1.442695, %v1832_v29 }
 0x391   :  { %6138 = vrcp.f32 %v7624_v34  ;;  %vm1693_vm12 = vweird.f32 %v7624_v34  ;;  %v1697_v63 = vand.u32 2147483647, %v7624_v34 }
 0x392   :  { %6140 = vrcp.f32 %v7626_v40  ;;  %v1796_v36 = vpop.f32.mrf.mxu2  ;;  %v1816_v44 = vpop.f32.mrf.mxu3  ;;  %vm1708_vm13 = vweird.f32 %v7626_v40 }
 0x393   :  { %6142 = vpow2.f32 %v5746_v30  ;;  %v1825_v1 = vrot.slane %v1796_v36, 6  ;;  %v1826_v4 = vrot.slane %v1816_v44, 6  ;;  %v1699_v36 = vand.u32 2147483648, %v7624_v34 }
 0x394   :  { %6144 = vpow2.f32 %v5747_v13 }
 0x395   :  { %v1833_v45 = vadd.f32 %v1825_v1, %v7160_v60  ;;  %6146 = vpow2.f32 %v5737_v8  ;;  %v1834_v30 = vadd.f32 %v1826_v4, %v7214_v20 }
 0x397   :  { %v7631_v28 = vpop.eup %6138  ;;  %v5748_v48 = vmul.f32 -1.442695, %v1833_v45  ;;  %v1714_v45 = vand.u32 2147483648, %v7626_v40 }
 0x398   :  { %v7633_v50 = vpop.eup %6140  ;;  %v1689_v62 = vmul.f32 %v7631_v28, %v7624_v34  ;;  %vm1694_vm15 = vweird.f32 %v7631_v28 }
 0x399   :  { %v6143_v14 = vpop.eup %6142  ;;  %6148 = vpow2.f32 %v5748_v48  ;;  %v1704_v2 = vmul.f32 %v7633_v50, %v7626_v40  ;;  %v1712_v48 = vand.u32 2147483647, %v7626_v40  ;;  %vm1709_vm14 = vweird.f32 %v7633_v50  ;;  %vm7676_vm6 = vmor %vm1693_vm12, %vm1694_vm15 }
 0x39a   :  { %v6145_v38 = vpop.eup %6144  ;;  %v1844_v51 = vadd.f32 1.0, %v6143_v14  ;;  %v1690_v37 = vsub.f32 1.0, %v1689_v62  ;;  %vm7666_vm4 = vmor %vm1708_vm13, %vm1709_vm14  ;;  %vm1698_vm13 = vcmp.eq.f32.partialorder %v1697_v63, 8.507059e+37 }
 0x39b   :  { %v7638_v54 = vadd.f32 1.0, %v6145_v38  ;;  %v6147_v32 = vpop.eup %6146  ;;  %v1705_v35 = vsub.f32 1.0, %v1704_v2  ;;  %vm1713_vm14 = vcmp.eq.f32.partialorder %v1712_v48, 8.507059e+37 }
 0x39c   :  { %6150 = vrcp.f32 %v1844_v51  ;;  %v7646_v29 = vadd.f32 1.0, %v6147_v32  ;;  %v1691_v17 = vmul.f32 %v7631_v28, %v1690_v37  ;;  %v1856_v62 = vand.u32 2147483647, %v1844_v51 }
 0x39d   :  { %6152 = vrcp.f32 %v7638_v54  ;;  %v1706_v8 = vmul.f32 %v7633_v50, %v1705_v35  ;;  %v1858_v44 = vand.u32 2147483648, %v1844_v51  ;;  %v1873_v32 = vand.u32 2147483648, %v7638_v54 }
 0x39e   :  { %6154 = vtanh.f32 %v1675_v3  ;;  %v1692_v3 = vadd.f32 %v7631_v28, %v1691_v17  ;;  %vm1852_vm7 = vweird.f32 %v1844_v51  ;;  %vm1867_vm8 = vweird.f32 %v7638_v54 }
 0x39f   :  { %v6149_v22 = vpop.eup %6148  ;;  %v1707_v35 = vadd.f32 %v7633_v50, %v1706_v8  ;;  %vm1857_vm10 = vcmp.eq.f32.partialorder %v1856_v62, 8.507059e+37  ;;  %v1859_v8 = vor.u32 1.1754944e-38, %v1858_v44  ;;  %v1874_v18 = vor.u32 1.1754944e-38, %v1873_v32 }
 0x3a0   :  { %v7643_v42 = vadd.f32 1.0, %v6149_v22  ;;  %v1696_v34 = vsel %vm7676_vm6, %v7631_v28, %v1692_v3  ;;  %v1715_v62 = vor.u32 1.1754944e-38, %v1714_v45  ;;  %v8868_v28 = vrot.slane %v7465_v52, 7 }
 0x3a2   :  { %v6151_v41 = vpop.eup %6150  ;;  %6156 = vrcp.f32 %v7643_v42  ;;  %v1886_v52 = vand.u32 2147483647, %v7643_v42 }
 0x3a3   :  { %v6153_v13 = vpop.eup %6152  ;;  %v1848_v1 = vmul.f32 %v6151_v41, %v1844_v51  ;;  %6158 = vrcp.f32 %v7646_v29  ;;  %vm1853_vm1 = vweird.f32 %v6151_v41  ;;  %v1711_v51 = vsel %vm7666_vm4, %v7633_v50, %v1707_v35 }
 0x3a4   :  { %v1863_v14 = vmul.f32 %v6153_v13, %v7638_v54  ;;  %6160 = vtanh.f32 %v1834_v30  ;;  %v6155_v2 = vpop.eup %6154  ;;  %vm1868_vm5 = vweird.f32 %v6153_v13  ;;  %v1871_v30 = vand.u32 2147483647, %v7638_v54  ;;  %vm1854_vm9 = vmor %vm1852_vm7, %vm1853_vm1 }
 0x3a5   :  { %v1849_v38 = vsub.f32 1.0, %v1848_v1  ;;  %vm1869_vm11 = vmor %vm1867_vm8, %vm1868_vm5  ;;  %v1716_v17 = vsel %vm1713_vm14, %v1715_v62, %v1711_v51  ;;  %vm1882_vm1 = vweird.f32 %v7643_v42  ;;  %vm1887_vm5 = vcmp.eq.f32.partialorder %v1886_v52, 8.507059e+37  ;;  %v7739_v51 = vld [vmem:[#allocation14 + $0x38] sm:$0x3f]  ;;  %v7749_v62 = vld [vmem:[#allocation14 + $0x10] sm:$0xff]  ;;  %v1958_v52 = vpop.f32.mrf.mxu2 }
 0x3a6   :  { %v1864_v31 = vsub.f32 1.0, %v1863_v14  ;;  %v1700_v14 = vor.u32 1.1754944e-38, %v1699_v36  ;;  %vm1872_vm12 = vcmp.eq.f32.partialorder %v1871_v30, 8.507059e+37  ;;  %vm1723_vm7 = vweird.f32 %v7646_v29 }
 0x3a7   :  { %v1850_v4 = vmul.f32 %v6151_v41, %v1849_v38 }
 0x3a8   :  { %v6157_v22 = vpop.eup %6156  ;;  %v1865_v1 = vmul.f32 %v6153_v13, %v1864_v31  ;;  %v1701_v32 = vsel %vm1698_vm13, %v1700_v14, %v1696_v34  ;;  %v1978_v14 = vpop.f32.mrf.mxu3 }
 0x3a9   :  { %v1878_v40 = vmul.f32 %v6157_v22, %v7643_v42  ;;  %v1851_v38 = vadd.f32 %v6151_v41, %v1850_v4  ;;  %v7682_v61 = vpop.eup %6158  ;;  %vm1883_vm15 = vweird.f32 %v6157_v22  ;;  %v1735_v45 = vmul.f32 %v6155_v2, %v1701_v32  ;;  %v7779_v32 = vld [vmem:[#allocation7] sm:$0xff] }
 0x3aa   :  { %v1866_v31 = vadd.f32 %v6153_v13, %v1865_v1  ;;  %v6161_v60 = vpop.eup %6160  ;;  %vm1884_vm4 = vmor %vm1882_vm1, %vm1883_vm15  ;;  %vm1724_vm6 = vweird.f32 %v7682_v61 }
 0x3ab   :  { %v1879_v20 = vsub.f32 1.0, %v1878_v40  ;;  %v1855_v36 = vsel %vm1854_vm9, %v6151_v41, %v1851_v38  ;;  %v1719_v41 = vmul.f32 %v7682_v61, %v7646_v29  ;;  %vm7720_vm8 = vmor %vm1723_vm7, %vm1724_vm6 }
 0x3ac   :  { %v1860_v54 = vsel %vm1857_vm10, %v1859_v8, %v1855_v36  ;;  %v1870_v4 = vsel %vm1869_vm11, %v6153_v13, %v1866_v31  ;;  %v1734_v13 = vmul.f32 %v1716_v17, %v7471_v0  ;;  %v7727_v8 = vld [vmem:[#allocation14 + $0x20] sm:$0x3f]  ;;  %v7735_v36 = vld [vmem:[#allocation14 + $0x30] sm:$0x3f]  ;;  %v7785_v17 = vld [vmem:[#allocation7 + $0x10] sm:$0xff] }
 0x3ad   :  { %v1880_v44 = vmul.f32 %v6157_v22, %v1879_v20  ;;  %v1875_v1 = vsel %vm1872_vm12, %v1874_v18, %v1870_v4  ;;  %v1897_v27 = vmul.f32 %v6161_v60, %v1860_v54  ;;  %v1888_v20 = vand.u32 2147483648, %v7643_v42  ;;  %v7746_v54 = vld [vmem:[#allocation14 + $0x8] sm:$0xff]  ;;  %8871 = vst [vmem:[#allocation35_spill] sm:$0xff] %v7785_v17 }
 0x3ae   :  { %v1896_v3 = vmul.f32 %v8868_v28, %v1875_v1  ;;  %v1720_v60 = vsub.f32 1.0, %v1719_v41  ;;  %v7701_v63 = vadd.f32 %v1735_v45, %v1734_v13  ;;  %v1729_v42 = vand.u32 2147483648, %v7646_v29  ;;  %v7767_v28 = vld [vmem:[#allocation7 + $0x28] sm:$0x3f]  ;;  %v7775_v41 = vld [vmem:[#allocation7 + $0x38] sm:$0x3f]  ;;  %v1918_v13 = vpop.f32.mrf.mxu0  ;;  %v1938_v45 = vpop.f32.mrf.mxu1 }
 0x3af   :  { %v1881_v50 = vadd.f32 %v6157_v22, %v1880_v44  ;;  %v7752_v44 = vld [vmem:[#allocation14 + $0x18] sm:$0xff] }
 0x3b0   :  { %v7694_v40 = vadd.f32 %v1897_v27, %v1896_v3  ;;  %v1889_v27 = vor.u32 1.1754944e-38, %v1888_v20  ;;  %v1721_v48 = vmul.f32 %v7682_v61, %v1720_v60  ;;  %v1730_v34 = vor.u32 1.1754944e-38, %v1729_v42  ;;  %v7771_v3 = vld [vmem:[#allocation7 + $0x30] sm:$0x3f] }
 0x3b1   :  { %v1885_v18 = vsel %vm1884_vm4, %v6157_v22, %v1881_v50  ;;  %v1727_v22 = vand.u32 2147483647, %v7646_v29  ;;  %v7731_v29 = vld [vmem:[#allocation14 + $0x28] sm:$0x3f]  ;;  %v7788_v50 = vld [vmem:[#allocation7 + $0x18] sm:$0xff]  ;;  %v1919_v20 = vadd.f32 %v1918_v13, %v8860_v46  ;;  %v1939_v60 = vadd.f32 %v1938_v45, %v8861_v57 }
 0x3b2   :  { %6162 = vtanh.f32 %v7694_v40  ;;  %v1890_v0 = vsel %vm1887_vm5, %v1889_v27, %v1885_v18  ;;  %v1722_v30 = vadd.f32 %v7682_v61, %v1721_v48  ;;  %8872 = vst [vmem:[#allocation39_spill] sm:$0xff] %v7788_v50 }
 0x3b3   :  { %6164 = vtanh.f32 %v7701_v63  ;;  %vm1728_vm9 = vcmp.eq.f32.partialorder %v1727_v22, 8.507059e+37 }
 0x3b4   :  { %v1726_v38 = vsel %vm7720_vm8, %v7682_v61, %v1722_v30  ;;  %v7743_v61 = vld [vmem:[#allocation14] sm:$0xff]  ;;  %v1959_v30 = vadd.f32 %v1958_v52, %v8862_v26 }
 0x3b5   :  { %v1731_v4 = vsel %vm1728_vm9, %v1730_v34, %v1726_v38 }
 0x3b8   :  { %v6163_v37 = vpop.eup %6162 }
 0x3b9   :  { %v1900_v2 = vmul.f32 %v6163_v37, %v1890_v0  ;;  %v6165_v31 = vpop.eup %6164 }
 0x3ba   :  { %v7755_v1 = vmul.f32 %v6165_v31, %v1731_v4 }
 0x3bb   :  { %v7705_v35 = vrot.slane %v1900_v2, 2 }
 0x3bd   :  { %5758 = vmatmul.msk.f32.vlgmr.msrb.gmra.mxu0 %vm417_vm3, %v7705_v35  ;;  %5760 = vmatmul.msk.f32.vlgmr.msrb.gmra.mxu1 %vm417_vm3, %v7705_v35 }
 0x3be   :  { %5762 = vmatmul.msk.f32.vlgmr.msrb.gmra.mxu2 %vm417_vm3, %v7705_v35  ;;  %5764 = vmatmul.msk.f32.vlgmr.msrb.gmra.mxu3 %vm417_vm3, %v7705_v35 }
 0x3bf   :  { %5776 = vmatpush.msk.msrb.mxu0 %vm421_vm2, %v7727_v8  ;;  %5778 = vmatpush.msk.msrb.mxu1 %vm421_vm2, %v7731_v29 }
 0x3c0   :  { %5780 = vmatpush.msk.msrb.mxu2 %vm421_vm2, %v7735_v36  ;;  %5782 = vmatpush.msk.msrb.mxu3 %vm421_vm2, %v7739_v51 }
 0x3c1   :  { %2233 = vmatpush.msrb.mxu0 %v7743_v61  ;;  %2253 = vmatpush.msrb.mxu1 %v7746_v54 }
 0x3c2   :  { %2273 = vmatpush.msrb.mxu2 %v7749_v62  ;;  %2293 = vmatpush.msrb.mxu3 %v7752_v44 }
 0x3c5   :  { %5769 = vmatmul.msk.f32.vlgmr.msra.gmra.mxu0 %vm417_vm3, %v7755_v1  ;;  %5771 = vmatmul.msk.f32.vlgmr.msra.gmra.mxu1 %vm417_vm3, %v7755_v1 }
 0x3c6   :  { %5773 = vmatmul.msk.f32.vlgmr.msra.gmra.mxu2 %vm417_vm3, %v7755_v1  ;;  %5775 = vmatmul.msk.f32.vlgmr.msra.gmra.mxu3 %vm417_vm3, %v7755_v1 }
 0x3c7   :  { %5787 = vmatpush.msk.msra.mxu0 %vm421_vm2, %v7513_v21  ;;  %5789 = vmatpush.msk.msra.mxu1 %vm421_vm2, %v7767_v28  ;;  %v7782_v21 = vld [vmem:[#allocation7 + $0x8] sm:$0xff] }
 0x3c8   :  { %5791 = vmatpush.msk.msra.mxu2 %vm421_vm2, %v7771_v3  ;;  %5793 = vmatpush.msk.msra.mxu3 %vm421_vm2, %v7775_v41 }
 0x3c9   :  { %2380 = vmatpush.msra.mxu0 %v7779_v32  ;;  %2400 = vmatpush.msra.mxu1 %v7782_v21 }
 0x3ca   :  { %2420 = vmatpush.msra.mxu2 %v7785_v17  ;;  %2440 = vmatpush.msra.mxu3 %v7788_v50 }
 0x43a   :  { %v2002_v18 = vpop.f32.mrf.mxu0  ;;  %v2022_v27 = vpop.f32.mrf.mxu1 }
 0x43b   :  { %v2065_v48 = vadd.f32 %v2002_v18, %v1919_v20  ;;  %v2066_v37 = vadd.f32 %v2022_v27, %v1939_v60  ;;  %v1979_v60 = vadd.f32 %v1978_v14, %v8863_v7 }
 0x43d   :  { %v5765_v0 = vmul.f32 -1.442695, %v2065_v48  ;;  %v5766_v2 = vmul.f32 -1.442695, %v2066_v37 }
 0x43f   :  { %6166 = vpow2.f32 %v5765_v0 }
 0x440   :  { %6168 = vpow2.f32 %v5766_v2 }
 0x441   :  { %v2042_v42 = vpop.f32.mrf.mxu2  ;;  %v2062_v45 = vpop.f32.mrf.mxu3 }
 0x442   :  { %v2067_v22 = vadd.f32 %v2042_v42, %v1959_v30  ;;  %v2068_v48 = vadd.f32 %v2062_v45, %v1979_v60 }
 0x444   :  { %v5767_v38 = vmul.f32 -1.442695, %v2067_v22 }
 0x445   :  { %v6167_v31 = vpop.eup %6166 }
 0x446   :  { %v6169_v34 = vpop.eup %6168  ;;  %v2078_v4 = vadd.f32 1.0, %v6167_v31  ;;  %6170 = vpow2.f32 %v5767_v38 }
 0x447   :  { %v2079_v13 = vadd.f32 1.0, %v6169_v34 }
 0x448   :  { %6172 = vrcp.f32 %v2078_v4  ;;  %v2092_v42 = vand.u32 2147483648, %v2078_v4  ;;  %v2090_v31 = vand.u32 2147483647, %v2078_v4  ;;  %vm2086_vm12 = vweird.f32 %v2078_v4 }
 0x449   :  { %6174 = vrcp.f32 %v2079_v13  ;;  %v2107_v22 = vand.u32 2147483648, %v2079_v13  ;;  %v2105_v26 = vand.u32 2147483647, %v2079_v13  ;;  %vm2101_vm13 = vweird.f32 %v2079_v13 }
 0x44a   :  { %vm2091_vm1 = vcmp.eq.f32.partialorder %v2090_v31, 8.507059e+37 }
 0x44b   :  { %vm2106_vm4 = vcmp.eq.f32.partialorder %v2105_v26, 8.507059e+37 }
 0x44c   :  { %v6171_v20 = vpop.eup %6170 }
 0x44d   :  { %v2080_v18 = vadd.f32 1.0, %v6171_v20  ;;  %v2093_v20 = vor.u32 1.1754944e-38, %v2092_v42 }
 0x44e   :  { %v6173_v27 = vpop.eup %6172 }
 0x44f   :  { %v6175_v52 = vpop.eup %6174  ;;  %v2082_v37 = vmul.f32 %v6173_v27, %v2078_v4  ;;  %6176 = vrcp.f32 %v2080_v18  ;;  %vm2087_vm10 = vweird.f32 %v6173_v27  ;;  %v2122_v42 = vand.u32 2147483648, %v2080_v18 }
 0x450   :  { %v2097_v0 = vmul.f32 %v6175_v52, %v2079_v13  ;;  %6178 = vtanh.f32 %v2068_v48  ;;  %vm2102_vm11 = vweird.f32 %v6175_v52  ;;  %vm2088_vm14 = vmor %vm2086_vm12, %vm2087_vm10  ;;  %vm2116_vm6 = vweird.f32 %v2080_v18 }
 0x451   :  { %v2083_v2 = vsub.f32 1.0, %v2082_v37  ;;  %vm2103_vm15 = vmor %vm2101_vm13, %vm2102_vm11  ;;  %v2108_v37 = vor.u32 1.1754944e-38, %v2107_v22  ;;  %v2123_v31 = vor.u32 1.1754944e-38, %v2122_v42 }
 0x452   :  { %v2098_v30 = vsub.f32 1.0, %v2097_v0 }
 0x453   :  { %v2084_v38 = vmul.f32 %v6173_v27, %v2083_v2 }
 0x454   :  { %v2099_v34 = vmul.f32 %v6175_v52, %v2098_v30 }
 0x455   :  { %v6177_v57 = vpop.eup %6176  ;;  %v2085_v14 = vadd.f32 %v6173_v27, %v2084_v38 }
 0x456   :  { %v2112_v45 = vmul.f32 %v6177_v57, %v2080_v18  ;;  %v2100_v60 = vadd.f32 %v6175_v52, %v2099_v34  ;;  %v6179_v48 = vpop.eup %6178  ;;  %vm2117_vm5 = vweird.f32 %v6177_v57 }
 0x457   :  { %v2089_v0 = vsel %vm2088_vm14, %v6173_v27, %v2085_v14  ;;  %v2120_v27 = vand.u32 2147483647, %v2080_v18  ;;  %vm2118_vm7 = vmor %vm2116_vm6, %vm2117_vm5 }
 0x458   :  { %v2113_v7 = vsub.f32 1.0, %v2112_v45  ;;  %v2094_v2 = vsel %vm2091_vm1, %v2093_v20, %v2089_v0  ;;  %v2104_v46 = vsel %vm2103_vm15, %v6175_v52, %v2100_v60 }
 0x459   :  { %v2109_v30 = vsel %vm2106_vm4, %v2108_v37, %v2104_v46  ;;  %v2128_v50 = vmul.f32 %v6179_v48, %v2094_v2  ;;  %vm2121_vm8 = vcmp.eq.f32.partialorder %v2120_v27, 8.507059e+37 }
 0x45a   :  { %v2114_v17 = vmul.f32 %v6177_v57, %v2113_v7  ;;  %v2127_v38 = vmul.f32 %v2109_v30, %v7532_v15  ;;  %v7843_v7 = vld [vmem:[#allocation16 + $0x28] sm:$0x3f]  ;;  %v7847_v15 = vld [vmem:[#allocation16 + $0x30] sm:$0x3f] }
 0x45c   :  { %v7796_v4 = vadd.f32 %v2128_v50, %v2127_v38  ;;  %v2115_v13 = vadd.f32 %v6177_v57, %v2114_v17 }
 0x45e   :  { %6180 = vtanh.f32 %v7796_v4  ;;  %v2119_v22 = vsel %vm2118_vm7, %v6177_v57, %v2115_v13  ;;  %v7839_v57 = vld [vmem:[#allocation16 + $0x20] sm:$0x3f] }
 0x45f   :  { %v2124_v26 = vsel %vm2121_vm8, %v2123_v31, %v2119_v22 }
 0x464   :  { %v6181_v52 = vpop.eup %6180 }
 0x465   :  { %v2131_v46 = vmul.f32 %v6181_v52, %v2124_v26  ;;  %v8873_v52 = vld [vmem:[#allocation47_spill] sm:$0xff] }
 0x467   :  { %5777 = vmatmul.msk.f32.vlgmr.msrb.gmra.mxu0 %vm417_vm3, %v2131_v46  ;;  %5779 = vmatmul.msk.f32.vlgmr.msrb.gmra.mxu1 %vm417_vm3, %v2131_v46 }
 0x468   :  { %5781 = vmatmul.msk.f32.vlgmr.msrb.gmra.mxu2 %vm417_vm3, %v2131_v46  ;;  %5783 = vmatmul.msk.f32.vlgmr.msrb.gmra.mxu3 %vm417_vm3, %v2131_v46 }
 0x469   :  { %5798 = vmatpush.msk.msrb.mxu0 %vm421_vm2, %v7539_v33  ;;  %5800 = vmatpush.msk.msrb.mxu1 %vm421_vm2, %v7543_v9  ;;  %v7851_v33 = vld [vmem:[#allocation16 + $0x38] sm:$0x3f]  ;;  %v7855_v9 = vld [vmem:[#allocation16] sm:$0xff] }
 0x46a   :  { %5802 = vmatpush.msk.msrb.mxu2 %vm421_vm2, %v7547_v53  ;;  %5804 = vmatpush.msk.msrb.mxu3 %vm421_vm2, %v7551_v11  ;;  %v7858_v53 = vld [vmem:[#allocation16 + $0x8] sm:$0xff]  ;;  %v7861_v11 = vld [vmem:[#allocation16 + $0x10] sm:$0xff] }
 0x46b   :  { %2542 = vmatpush.msrb.mxu0 %v7555_v16  ;;  %2562 = vmatpush.msrb.mxu1 %v7558_v59  ;;  %v7864_v16 = vld [vmem:[#allocation16 + $0x18] sm:$0xff]  ;;  %v2152_v59 = vpop.f32.mrf.mxu0 }
 0x46c   :  { %2582 = vmatpush.msrb.mxu2 %v7561_v5  ;;  %2602 = vmatpush.msrb.mxu3 %v7564_v58  ;;  %v2172_v5 = vpop.f32.mrf.mxu1  ;;  %v2153_v58 = vadd.f32 %v2152_v59, %v7379_v55  ;;  %v8874_v59 = vld [vmem:[#allocation41_spill] sm:$0xff] }
 0x46f   :  { %5788 = vmatmul.msk.f32.vlgmr.msra.gmra.mxu0 %vm417_vm3, %v7705_v35  ;;  %5790 = vmatmul.msk.f32.vlgmr.msra.gmra.mxu1 %vm417_vm3, %v7705_v35 }
 0x470   :  { %5792 = vmatmul.msk.f32.vlgmr.msra.gmra.mxu2 %vm417_vm3, %v7705_v35  ;;  %5794 = vmatmul.msk.f32.vlgmr.msra.gmra.mxu3 %vm417_vm3, %v7705_v35  ;;  %v2212_v35 = vpop.f32.mrf.mxu3 }
 0x471   :  { %5806 = vmatpush.msk.msra.mxu0 %vm421_vm2, %v7575_v6  ;;  %5808 = vmatpush.msk.msra.mxu1 %vm421_vm2, %v7579_v19  ;;  %v2173_v6 = vadd.f32 %v2172_v5, %v7381_v56  ;;  %v2192_v19 = vpop.f32.mrf.mxu2  ;;  %v2213_v26 = vadd.f32 %v2212_v35, %v8873_v52 }
 0x472   :  { %5810 = vmatpush.msk.msra.mxu2 %vm421_vm2, %v7583_v24  ;;  %5812 = vmatpush.msk.msra.mxu3 %vm421_vm2, %v7587_v25  ;;  %v2193_v17 = vadd.f32 %v2192_v19, %v7385_v12 }
 0x473   :  { %2626 = vmatpush.msra.mxu0 %v7591_v10  ;;  %2646 = vmatpush.msra.mxu1 %v7594_v23 }
 0x474   :  { %2666 = vmatpush.msra.mxu2 %v7597_v39  ;;  %2686 = vmatpush.msra.mxu3 %v7600_v43 }
 0x477   :  { %5799 = vmatmul.msk.f32.vlgmr.msrb.gmra.mxu0 %vm417_vm3, %v2131_v46  ;;  %5801 = vmatmul.msk.f32.vlgmr.msrb.gmra.mxu1 %vm417_vm3, %v2131_v46 }
 0x478   :  { %5803 = vmatmul.msk.f32.vlgmr.msrb.gmra.mxu2 %vm417_vm3, %v2131_v46  ;;  %5805 = vmatmul.msk.f32.vlgmr.msrb.gmra.mxu3 %vm417_vm3, %v2131_v46 }
 0x479   :  { %5817 = vmatpush.msk.msrb.mxu0 %vm421_vm2, %v7839_v57  ;;  %5819 = vmatpush.msk.msrb.mxu1 %vm421_vm2, %v7843_v7 }
 0x47a   :  { %5821 = vmatpush.msk.msrb.mxu2 %vm421_vm2, %v7847_v15  ;;  %5823 = vmatpush.msk.msrb.mxu3 %vm421_vm2, %v7851_v33 }
 0x47b   :  { %2776 = vmatpush.msrb.mxu0 %v7855_v9  ;;  %2796 = vmatpush.msrb.mxu1 %v7858_v53 }
 0x47c   :  { %2816 = vmatpush.msrb.mxu2 %v7861_v11  ;;  %2836 = vmatpush.msrb.mxu3 %v7864_v16 }
 0x4e4   :  { %v2235_v24 = vpop.f32.mrf.mxu0  ;;  %v2255_v25 = vpop.f32.mrf.mxu1 }
 0x4e5   :  { %v2298_v10 = vadd.f32 %v2235_v24, %v2153_v58  ;;  %v2299_v23 = vadd.f32 %v2255_v25, %v2173_v6 }
 0x4e7   :  { %v5784_v39 = vmul.f32 -1.442695, %v2298_v10  ;;  %v5785_v43 = vmul.f32 -1.442695, %v2299_v23 }
 0x4e9   :  { %6182 = vpow2.f32 %v5784_v39 }
 0x4ea   :  { %6184 = vpow2.f32 %v5785_v43 }
 0x4eb   :  { %v2275_v50 = vpop.f32.mrf.mxu2  ;;  %v2295_v13 = vpop.f32.mrf.mxu3 }
 0x4ec   :  { %v2300_v18 = vadd.f32 %v2275_v50, %v2193_v17  ;;  %v2382_v34 = vpop.f32.mrf.mxu0  ;;  %v2402_v14 = vpop.f32.mrf.mxu1  ;;  %v2301_v6 = vadd.f32 %v2295_v13, %v2213_v26 }
 0x4ed   :  { %v2449_v45 = vrot.slane %v2382_v34, 5  ;;  %v2450_v20 = vrot.slane %v2402_v14, 5 }
 0x4ee   :  { %v5786_v60 = vmul.f32 -1.442695, %v2300_v18 }
 0x4ef   :  { %v6183_v37 = vpop.eup %6182  ;;  %v2457_v0 = vadd.f32 %v2449_v45, %v7141_v47  ;;  %v2458_v48 = vadd.f32 %v2450_v20, %v7143_v49 }
 0x4f0   :  { %v6185_v2 = vpop.eup %6184  ;;  %v2311_v30 = vadd.f32 1.0, %v6183_v37  ;;  %6186 = vpow2.f32 %v5786_v60 }
 0x4f1   :  { %v2312_v38 = vadd.f32 1.0, %v6185_v2  ;;  %v5795_v42 = vmul.f32 -1.442695, %v2457_v0  ;;  %v5796_v27 = vmul.f32 -1.442695, %v2458_v48 }
 0x4f2   :  { %6188 = vrcp.f32 %v2311_v30  ;;  %v2323_v50 = vand.u32 2147483647, %v2311_v30  ;;  %v2325_v45 = vand.u32 2147483648, %v2311_v30  ;;  %vm2319_vm12 = vweird.f32 %v2311_v30 }
 0x4f3   :  { %6190 = vrcp.f32 %v2312_v38  ;;  %v2422_v22 = vpop.f32.mrf.mxu2  ;;  %v2442_v18 = vpop.f32.mrf.mxu3  ;;  %v2340_v14 = vand.u32 2147483648, %v2312_v38  ;;  %v2338_v37 = vand.u32 2147483647, %v2312_v38  ;;  %vm2334_vm11 = vweird.f32 %v2312_v38 }
 0x4f4   :  { %6192 = vpow2.f32 %v5795_v42  ;;  %v2451_v31 = vrot.slane %v2422_v22, 5  ;;  %v2452_v48 = vrot.slane %v2442_v18, 5  ;;  %vm2324_vm14 = vcmp.eq.f32.partialorder %v2323_v50, 8.507059e+37 }
 0x4f5   :  { %6194 = vpow2.f32 %v5796_v27  ;;  %v2326_v22 = vor.u32 1.1754944e-38, %v2325_v45  ;;  %vm2339_vm1 = vcmp.eq.f32.partialorder %v2338_v37, 8.507059e+37  ;;  %v5519_v18 = vrot.slane %v7755_v1, 7 }
 0x4f6   :  { %v6187_v46 = vpop.eup %6186  ;;  %v2459_v5 = vadd.f32 %v2451_v31, %v8874_v59  ;;  %v2520_v45 = vrot.slane %v7694_v40, 7 }
 0x4f7   :  { %v7874_v58 = vadd.f32 1.0, %v6187_v46  ;;  %v2341_v46 = vor.u32 1.1754944e-38, %v2340_v14 }
 0x4f8   :  { %v6189_v19 = vpop.eup %6188  ;;  %v5797_v24 = vmul.f32 -1.442695, %v2459_v5 }
 0x4f9   :  { %v6191_v25 = vpop.eup %6190  ;;  %v2315_v10 = vmul.f32 %v6189_v19, %v2311_v30  ;;  %6196 = vrcp.f32 %v7874_v58  ;;  %vm2320_vm9 = vweird.f32 %v6189_v19  ;;  %vm2349_vm4 = vweird.f32 %v7874_v58 }
 0x4fa   :  { %v6193_v23 = vpop.eup %6192  ;;  %v2330_v39 = vmul.f32 %v6191_v25, %v2312_v38  ;;  %6198 = vpow2.f32 %v5797_v24  ;;  %vm2335_vm10 = vweird.f32 %v6191_v25  ;;  %vm2321_vm13 = vmor %vm2319_vm12, %vm2320_vm9 }
 0x4fb   :  { %v6195_v43 = vpop.eup %6194  ;;  %v2316_v17 = vsub.f32 1.0, %v2315_v10  ;;  %6200 = vtanh.f32 %v2301_v6  ;;  %v7877_v35 = vadd.f32 1.0, %v6193_v23  ;;  %vm2336_vm15 = vmor %vm2334_vm11, %vm2335_vm10  ;;  %v8875_v23 = vld [vmem:[#allocation42_spill] sm:$0xff] }
 0x4fc   :  { %v2331_v34 = vsub.f32 1.0, %v2330_v39  ;;  %v7879_v20 = vadd.f32 1.0, %v6195_v43  ;;  %v2460_v30 = vadd.f32 %v2452_v48, %v8875_v23 }
 0x4fd   :  { %v2317_v60 = vmul.f32 %v6189_v19, %v2316_v17  ;;  %6202 = vrcp.f32 %v7877_v35  ;;  %v2482_v48 = vand.u32 2147483647, %v7877_v35  ;;  %vm2478_vm9 = vweird.f32 %v7877_v35 }
 0x4fe   :  { %v2332_v0 = vmul.f32 %v6191_v25, %v2331_v34  ;;  %6204 = vrcp.f32 %v7879_v20  ;;  %v2499_v40 = vand.u32 2147483648, %v7879_v20  ;;  %vm2493_vm8 = vweird.f32 %v7879_v20 }
 0x4ff   :  { %v7883_v2 = vpop.eup %6196  ;;  %v2318_v13 = vadd.f32 %v6189_v19, %v2317_v60  ;;  %vm2483_vm12 = vcmp.eq.f32.partialorder %v2482_v48, 8.507059e+37 }
 0x500   :  { %v6199_v42 = vpop.eup %6198  ;;  %v2345_v27 = vmul.f32 %v7883_v2, %v7874_v58  ;;  %v2333_v31 = vadd.f32 %v6191_v25, %v2332_v0  ;;  %vm2350_vm5 = vweird.f32 %v7883_v2 }
 0x501   :  { %v6201_v26 = vpop.eup %6200  ;;  %v2322_v5 = vsel %vm2321_vm13, %v6189_v19, %v2318_v13  ;;  %v7887_v6 = vadd.f32 1.0, %v6199_v42  ;;  %v2484_v13 = vand.u32 2147483648, %v7877_v35  ;;  %vm7914_vm10 = vmor %vm2349_vm4, %vm2350_vm5  ;;  %vm5503_vm4 = vcmask 1041408  }
 0x502   :  { %v2346_v24 = vsub.f32 1.0, %v2345_v27  ;;  %v2327_v10 = vsel %vm2324_vm14, %v2326_v22, %v2322_v5  ;;  %v2337_v38 = vsel %vm2336_vm15, %v6191_v25, %v2333_v31  ;;  %v2355_v25 = vand.u32 2147483648, %v7874_v58 }
 0x503   :  { %v6203_v39 = vpop.eup %6202  ;;  %v2342_v43 = vsel %vm2339_vm1, %v2341_v46, %v2337_v38  ;;  %v2361_v17 = vmul.f32 %v6201_v26, %v2327_v10  ;;  %6206 = vrcp.f32 %v7887_v6  ;;  %v2497_v31 = vand.u32 2147483647, %v7879_v20 }
 0x504   :  { %v6205_v50 = vpop.eup %6204  ;;  %v2347_v34 = vmul.f32 %v7883_v2, %v2346_v24  ;;  %v2360_v19 = vmul.f32 %v2342_v43, %v7701_v63  ;;  %v2474_v14 = vmul.f32 %v6203_v39, %v7877_v35  ;;  %6208 = vtanh.f32 %v2460_v30 }
 0x505   :  { %v2489_v60 = vmul.f32 %v6205_v50, %v7879_v20  ;;  %vm2479_vm6 = vweird.f32 %v6203_v39  ;;  %vm2494_vm7 = vweird.f32 %v6205_v50  ;;  %v2353_v26 = vand.u32 2147483647, %v7874_v58 }
 0x506   :  { %v7899_v37 = vadd.f32 %v2361_v17, %v2360_v19  ;;  %v2475_v0 = vsub.f32 1.0, %v2474_v14  ;;  %v2348_v63 = vadd.f32 %v7883_v2, %v2347_v34  ;;  %vm2480_vm11 = vmor %vm2478_vm9, %vm2479_vm6  ;;  %v2485_v10 = vor.u32 1.1754944e-38, %v2484_v13 }
 0x507   :  { %v2490_v1 = vsub.f32 1.0, %v2489_v60  ;;  %vm2495_vm13 = vmor %vm2493_vm8, %vm2494_vm7  ;;  %v2500_v43 = vor.u32 1.1754944e-38, %v2499_v40  ;;  %v2356_v35 = vor.u32 1.1754944e-38, %v2355_v25  ;;  %vm2498_vm14 = vcmp.eq.f32.partialorder %v2497_v31, 8.507059e+37  ;;  %v8878_v40 = vld [vmem:[#allocation48_spill] sm:$0xff] }
 0x508   :  { %6210 = vtanh.f32 %v7899_v37  ;;  %v2476_v42 = vmul.f32 %v6203_v39, %v2475_v0  ;;  %v2352_v30 = vsel %vm7914_vm10, %v7883_v2, %v2348_v63  ;;  %vm2354_vm15 = vcmp.eq.f32.partialorder %v2353_v26, 8.507059e+37 }
 0x509   :  { %v6207_v27 = vpop.eup %6206  ;;  %v2491_v22 = vmul.f32 %v6205_v50, %v2490_v1  ;;  %v2357_v1 = vsel %vm2354_vm15, %v2356_v35, %v2352_v30  ;;  %vm5501_vm1 = vcmask 1040384   ;;  %vm2508_vm6 = vweird.f32 %v7887_v6 }
 0x50a   :  { %v2504_v46 = vmul.f32 %v6207_v27, %v7887_v6  ;;  %v2477_v5 = vadd.f32 %v6203_v39, %v2476_v42  ;;  %v6209_v20 = vpop.eup %6208  ;;  %vm2509_vm5 = vweird.f32 %v6207_v27 }
 0x50b   :  { %v2492_v38 = vadd.f32 %v6205_v50, %v2491_v22  ;;  %vm2510_vm7 = vmor %vm2508_vm6, %vm2509_vm5 }
 0x50c   :  { %v2505_v17 = vsub.f32 1.0, %v2504_v46  ;;  %v2481_v34 = vsel %vm2480_vm11, %v6203_v39, %v2477_v5  ;;  %v5533_v39 = vsel %vm5501_vm1, %v8878_v40, %v5519_v18 }
 0x50d   :  { %v2486_v19 = vsel %vm2483_vm12, %v2485_v10, %v2481_v34  ;;  %v2496_v58 = vsel %vm2495_vm13, %v6205_v50, %v2492_v38  ;;  %v2514_v50 = vand.u32 2147483648, %v7887_v6 }
 0x50e   :  { %v6211_v14 = vpop.eup %6210  ;;  %v2506_v60 = vmul.f32 %v6207_v27, %v2505_v17  ;;  %v2501_v0 = vsel %vm2498_vm14, %v2500_v43, %v2496_v58  ;;  %v2523_v48 = vmul.f32 %v6209_v20, %v2486_v19  ;;  %v2604_v17 = vpop.f32.mrf.mxu3 }
 0x50f   :  { %v2522_v13 = vmul.f32 %v2520_v45, %v2501_v0  ;;  %v2364_v42 = vmul.f32 %v6211_v14, %v2357_v1  ;;  %v2512_v45 = vand.u32 2147483647, %v7887_v6  ;;  %v2515_v26 = vor.u32 1.1754944e-38, %v2514_v50  ;;  %v2584_v6 = vpop.f32.mrf.mxu2 }
 0x510   :  { %v2507_v25 = vadd.f32 %v6207_v27, %v2506_v60 }
 0x511   :  { %v7921_v2 = vadd.f32 %v2523_v48, %v2522_v13  ;;  %v5521_v63 = vrot.slane %v2364_v42, 6  ;;  %vm2513_vm8 = vcmp.eq.f32.partialorder %v2512_v45, 8.507059e+37  ;;  %v8884_v48 = vld [vmem:[#allocation46_spill] sm:$0xff] }
 0x512   :  { %v2511_v31 = vsel %vm2510_vm7, %v6207_v27, %v2507_v25  ;;  %v2605_v1 = vadd.f32 %v2604_v17, %v8884_v48 }
 0x513   :  { %6212 = vtanh.f32 %v7921_v2  ;;  %v7928_v22 = vsel %vm5503_vm4, %v5533_v39, %v5521_v63  ;;  %v2516_v5 = vsel %vm2513_vm8, %v2515_v26, %v2511_v31 }
 0x519   :  { %v6213_v46 = vpop.eup %6212 }
 0x51a   :  { %v2526_v18 = vmul.f32 %v6213_v46, %v2516_v5 }
 0x51c   :  { %v7932_v24 = vrot.slane %v2526_v18, 3 }
 0x51e   :  { %5807 = vmatmul.msk.f32.vlgmr.msra.gmra.mxu0 %vm417_vm3, %v7932_v24  ;;  %5809 = vmatmul.msk.f32.vlgmr.msra.gmra.mxu1 %vm417_vm3, %v7932_v24 }
 0x51f   :  { %5811 = vmatmul.msk.f32.vlgmr.msra.gmra.mxu2 %vm417_vm3, %v7932_v24  ;;  %5813 = vmatmul.msk.f32.vlgmr.msra.gmra.mxu3 %vm417_vm3, %v7932_v24 }
 0x520   :  { %5825 = vmatpush.msk.msra.mxu0 %vm421_vm2, %v7727_v8  ;;  %5827 = vmatpush.msk.msra.mxu1 %vm421_vm2, %v7731_v29  ;;  %v7958_v8 = vld [vmem:[#allocation7 + $0x20] sm:$0x3f]  ;;  %v8879_v29 = vld [vmem:[#allocation35_spill] sm:$0xff] }
 0x521   :  { %5829 = vmatpush.msk.msra.mxu2 %vm421_vm2, %v7735_v36  ;;  %5831 = vmatpush.msk.msra.mxu3 %vm421_vm2, %v7739_v51  ;;  %v8880_v36 = vld [vmem:[#allocation39_spill] sm:$0xff]  ;;  %v2544_v51 = vpop.f32.mrf.mxu0 }
 0x522   :  { %2859 = vmatpush.msra.mxu0 %v7743_v61  ;;  %2879 = vmatpush.msra.mxu1 %v7746_v54  ;;  %v2564_v61 = vpop.f32.mrf.mxu1  ;;  %v8881_v54 = vld [vmem:[#allocation43_spill] sm:$0xff] }
 0x523   :  { %2899 = vmatpush.msra.mxu2 %v7749_v62  ;;  %2919 = vmatpush.msra.mxu3 %v7752_v44  ;;  %v2545_v62 = vadd.f32 %v2544_v51, %v8881_v54  ;;  %v8882_v44 = vld [vmem:[#allocation44_spill] sm:$0xff] }
 0x526   :  { %5818 = vmatmul.msk.f32.vlgmr.msrb.gmra.mxu0 %vm417_vm3, %v2364_v42  ;;  %5820 = vmatmul.msk.f32.vlgmr.msrb.gmra.mxu1 %vm417_vm3, %v2364_v42 }
 0x527   :  { %5822 = vmatmul.msk.f32.vlgmr.msrb.gmra.mxu2 %vm417_vm3, %v2364_v42  ;;  %5824 = vmatmul.msk.f32.vlgmr.msrb.gmra.mxu3 %vm417_vm3, %v2364_v42 }
 0x528   :  { %5836 = vmatpush.msk.msrb.mxu0 %vm421_vm2, %v7958_v8  ;;  %5838 = vmatpush.msk.msrb.mxu1 %vm421_vm2, %v7767_v28  ;;  %v2565_v28 = vadd.f32 %v2564_v61, %v8882_v44 }
 0x529   :  { %5840 = vmatpush.msk.msrb.mxu2 %vm421_vm2, %v7771_v3  ;;  %5842 = vmatpush.msk.msrb.mxu3 %vm421_vm2, %v7775_v41 }
 0x52a   :  { %3006 = vmatpush.msrb.mxu0 %v7779_v32  ;;  %3026 = vmatpush.msrb.mxu1 %v7782_v21  ;;  %v8883_v32 = vld [vmem:[#allocation45_spill] sm:$0xff] }
 0x52b   :  { %3046 = vmatpush.msrb.mxu2 %v8879_v29  ;;  %3066 = vmatpush.msrb.mxu3 %v8880_v36  ;;  %v2585_v21 = vadd.f32 %v2584_v6, %v8883_v32 }
 0x59b   :  { %v2628_v27 = vpop.f32.mrf.mxu0  ;;  %v2648_v3 = vpop.f32.mrf.mxu1 }
 0x59c   :  { %v2691_v10 = vadd.f32 %v2628_v27, %v2545_v62  ;;  %v2692_v38 = vadd.f32 %v2648_v3, %v2565_v28 }
 0x59e   :  { %v5814_v41 = vmul.f32 -1.442695, %v2691_v10  ;;  %v5815_v30 = vmul.f32 -1.442695, %v2692_v38 }
 0x5a0   :  { %6214 = vpow2.f32 %v5814_v41 }
 0x5a1   :  { %6216 = vpow2.f32 %v5815_v30 }
 0x5a2   :  { %v2668_v20 = vpop.f32.mrf.mxu2  ;;  %v2688_v60 = vpop.f32.mrf.mxu3 }
 0x5a3   :  { %v2693_v43 = vadd.f32 %v2668_v20, %v2585_v21  ;;  %v2694_v63 = vadd.f32 %v2688_v60, %v2605_v1 }
 0x5a5   :  { %v5816_v34 = vmul.f32 -1.442695, %v2693_v43 }
 0x5a6   :  { %v6215_v35 = vpop.eup %6214 }
 0x5a7   :  { %v6217_v19 = vpop.eup %6216  ;;  %v2704_v58 = vadd.f32 1.0, %v6215_v35  ;;  %6218 = vpow2.f32 %v5816_v34 }
 0x5a8   :  { %v2705_v14 = vadd.f32 1.0, %v6217_v19 }
 0x5a9   :  { %6220 = vrcp.f32 %v2704_v58  ;;  %v2718_v31 = vand.u32 2147483648, %v2704_v58  ;;  %v2716_v5 = vand.u32 2147483647, %v2704_v58  ;;  %vm2712_vm11 = vweird.f32 %v2704_v58 }
 0x5aa   :  { %6222 = vrcp.f32 %v2705_v14  ;;  %v2733_v26 = vand.u32 2147483648, %v2705_v14  ;;  %v2731_v29 = vand.u32 2147483647, %v2705_v14  ;;  %vm2727_vm12 = vweird.f32 %v2705_v14 }
 0x5ab   :  { %v2719_v62 = vor.u32 1.1754944e-38, %v2718_v31  ;;  %vm2717_vm15 = vcmp.eq.f32.partialorder %v2716_v5, 8.507059e+37  ;;  %v8024_v31 = vld [vmem:[#allocation10 + $0x28] sm:$0x3f] }
 0x5ac   :  { %v2734_v6 = vor.u32 1.1754944e-38, %v2733_v26  ;;  %vm2732_vm5 = vcmp.eq.f32.partialorder %v2731_v29, 8.507059e+37  ;;  %v8028_v26 = vld [vmem:[#allocation10 + $0x30] sm:$0x3f]  ;;  %v8039_v5 = vld [vmem:[#allocation10 + $0x8] sm:$0xff]  ;;  %v8045_v29 = vld [vmem:[#allocation10 + $0x18] sm:$0xff] }
 0x5ad   :  { %v6219_v0 = vpop.eup %6218 }
 0x5ae   :  { %v2706_v13 = vadd.f32 1.0, %v6219_v0 }
 0x5af   :  { %v6221_v42 = vpop.eup %6220 }
 0x5b0   :  { %v6223_v40 = vpop.eup %6222  ;;  %v2708_v39 = vmul.f32 %v6221_v42, %v2704_v58  ;;  %6224 = vrcp.f32 %v2706_v13  ;;  %vm2713_vm9 = vweird.f32 %v6221_v42  ;;  %v2748_v35 = vand.u32 2147483648, %v2706_v13 }
 0x5b1   :  { %v2723_v25 = vmul.f32 %v6223_v40, %v2705_v14  ;;  %6226 = vtanh.f32 %v2694_v63  ;;  %vm2728_vm10 = vweird.f32 %v6223_v40  ;;  %vm2714_vm13 = vmor %vm2712_vm11, %vm2713_vm9  ;;  %vm2742_vm7 = vweird.f32 %v2706_v13  ;;  %v7996_v63 = vld [vmem:[#allocation11 + $0x38] sm:$0x3f] }
 0x5b2   :  { %v2709_v50 = vsub.f32 1.0, %v2708_v39  ;;  %vm2729_vm14 = vmor %vm2727_vm12, %vm2728_vm10  ;;  %v2746_v19 = vand.u32 2147483647, %v2706_v13  ;;  %v2749_v14 = vor.u32 1.1754944e-38, %v2748_v35  ;;  %v8003_v39 = vld [vmem:[#allocation11 + $0x8] sm:$0xff] }
 0x5b3   :  { %v2724_v45 = vsub.f32 1.0, %v2723_v25  ;;  %v8006_v25 = vld [vmem:[#allocation11 + $0x10] sm:$0xff] }
 0x5b4   :  { %v2710_v46 = vmul.f32 %v6221_v42, %v2709_v50  ;;  %vm2747_vm9 = vcmp.eq.f32.partialorder %v2746_v19, 8.507059e+37  ;;  %v8009_v50 = vld [vmem:[#allocation11 + $0x18] sm:$0xff] }
 0x5b5   :  { %v2725_v18 = vmul.f32 %v6223_v40, %v2724_v45  ;;  %v8020_v45 = vld [vmem:[#allocation10 + $0x20] sm:$0x3f] }
 0x5b6   :  { %v6225_v36 = vpop.eup %6224  ;;  %v2711_v51 = vadd.f32 %v6221_v42, %v2710_v46  ;;  %v8032_v46 = vld [vmem:[#allocation10 + $0x38] sm:$0x3f] }
 0x5b7   :  { %v2738_v61 = vmul.f32 %v6225_v36, %v2706_v13  ;;  %v2726_v28 = vadd.f32 %v6223_v40, %v2725_v18  ;;  %v6227_v3 = vpop.eup %6226  ;;  %vm2743_vm6 = vweird.f32 %v6225_v36  ;;  %v7988_v13 = vld [vmem:[#allocation11 + $0x28] sm:$0x3f]  ;;  %v8042_v18 = vld [vmem:[#allocation10 + $0x10] sm:$0xff] }
 0x5b8   :  { %v2715_v27 = vsel %vm2714_vm13, %v6221_v42, %v2711_v51  ;;  %vm2744_vm8 = vmor %vm2742_vm7, %vm2743_vm6  ;;  %v7992_v42 = vld [vmem:[#allocation11 + $0x30] sm:$0x3f]  ;;  %v2798_v51 = vpop.f32.mrf.mxu1 }
 0x5b9   :  { %v2739_v10 = vsub.f32 1.0, %v2738_v61  ;;  %v2720_v38 = vsel %vm2717_vm15, %v2719_v62, %v2715_v27  ;;  %v2730_v41 = vsel %vm2729_vm14, %v6223_v40, %v2726_v28  ;;  %v8000_v40 = vld [vmem:[#allocation11] sm:$0xff]  ;;  %v2818_v61 = vpop.f32.mrf.mxu2 }
 0x5ba   :  { %v2735_v30 = vsel %vm2732_vm5, %v2734_v6, %v2730_v41  ;;  %v2754_v21 = vmul.f32 %v6227_v3, %v2720_v38 }
 0x5bb   :  { %v2740_v20 = vmul.f32 %v6225_v36, %v2739_v10  ;;  %v2753_v43 = vmul.f32 %v2735_v30, %v7796_v4  ;;  %v7984_v4 = vld [vmem:[#allocation11 + $0x20] sm:$0x3f] }
 0x5bd   :  { %v7977_v17 = vadd.f32 %v2754_v21, %v2753_v43  ;;  %v2741_v34 = vadd.f32 %v6225_v36, %v2740_v20 }
 0x5bf   :  { %6228 = vtanh.f32 %v7977_v17  ;;  %v2745_v58 = vsel %vm2744_vm8, %v6225_v36, %v2741_v34  ;;  %v2778_v36 = vpop.f32.mrf.mxu0 }
 0x5c0   :  { %v2750_v0 = vsel %vm2747_vm9, %v2749_v14, %v2745_v58 }
 0x5c5   :  { %v6229_v60 = vpop.eup %6228 }
 0x5c6   :  { %v2757_v1 = vmul.f32 %v6229_v60, %v2750_v0 }
 0x5c8   :  { %5826 = vmatmul.msk.f32.vlgmr.msra.gmra.mxu0 %vm417_vm3, %v2757_v1  ;;  %5828 = vmatmul.msk.f32.vlgmr.msra.gmra.mxu1 %vm417_vm3, %v2757_v1 }
 0x5c9   :  { %5830 = vmatmul.msk.f32.vlgmr.msra.gmra.mxu2 %vm417_vm3, %v2757_v1  ;;  %5832 = vmatmul.msk.f32.vlgmr.msra.gmra.mxu3 %vm417_vm3, %v2757_v1 }
 0x5ca   :  { %5847 = vmatpush.msk.msra.mxu0 %vm421_vm2, %v7984_v4  ;;  %5849 = vmatpush.msk.msra.mxu1 %vm421_vm2, %v7988_v13 }
 0x5cb   :  { %5851 = vmatpush.msk.msra.mxu2 %vm421_vm2, %v7992_v42  ;;  %5853 = vmatpush.msk.msra.mxu3 %vm421_vm2, %v7996_v63 }
 0x5cc   :  { %3168 = vmatpush.msra.mxu0 %v8000_v40  ;;  %3188 = vmatpush.msra.mxu1 %v8003_v39 }
 0x5cd   :  { %3208 = vmatpush.msra.mxu2 %v8006_v25  ;;  %3228 = vmatpush.msra.mxu3 %v8009_v50 }
 0x5d0   :  { %5837 = vmatmul.msk.f32.vlgmr.msrb.gmra.mxu0 %vm417_vm3, %v7932_v24  ;;  %5839 = vmatmul.msk.f32.vlgmr.msrb.gmra.mxu1 %vm417_vm3, %v7932_v24 }
 0x5d1   :  { %5841 = vmatmul.msk.f32.vlgmr.msrb.gmra.mxu2 %vm417_vm3, %v7932_v24  ;;  %5843 = vmatmul.msk.f32.vlgmr.msrb.gmra.mxu3 %vm417_vm3, %v7932_v24  ;;  %v8036_v24 = vld [vmem:[#allocation10] sm:$0xff] }
 0x5d2   :  { %5855 = vmatpush.msk.msrb.mxu0 %vm421_vm2, %v8020_v45  ;;  %5857 = vmatpush.msk.msrb.mxu1 %vm421_vm2, %v8024_v31 }
 0x5d3   :  { %5859 = vmatpush.msk.msrb.mxu2 %vm421_vm2, %v8028_v26  ;;  %5861 = vmatpush.msk.msrb.mxu3 %vm421_vm2, %v8032_v46 }
 0x5d4   :  { %3252 = vmatpush.msrb.mxu0 %v8036_v24  ;;  %3272 = vmatpush.msrb.mxu1 %v8039_v5 }
 0x5d5   :  { %3292 = vmatpush.msrb.mxu2 %v8042_v18  ;;  %3312 = vmatpush.msrb.mxu3 %v8045_v29 }
 0x5d8   :  { %5848 = vmatmul.msk.f32.vlgmr.msra.gmra.mxu0 %vm417_vm3, %v2757_v1  ;;  %5850 = vmatmul.msk.f32.vlgmr.msra.gmra.mxu1 %vm417_vm3, %v2757_v1 }
 0x5d9   :  { %5852 = vmatmul.msk.f32.vlgmr.msra.gmra.mxu2 %vm417_vm3, %v2757_v1  ;;  %5854 = vmatmul.msk.f32.vlgmr.msra.gmra.mxu3 %vm417_vm3, %v2757_v1 }
 0x5da   :  { %5866 = vmatpush.msk.msra.mxu0 %vm421_vm2, %v7839_v57  ;;  %5868 = vmatpush.msk.msra.mxu1 %vm421_vm2, %v7843_v7  ;;  %v2779_v57 = vadd.f32 %v2778_v36, %v7379_v55  ;;  %v2799_v7 = vadd.f32 %v2798_v51, %v7381_v56 }
 0x5db   :  { %5870 = vmatpush.msk.msra.mxu2 %vm421_vm2, %v7847_v15  ;;  %5872 = vmatpush.msk.msra.mxu3 %vm421_vm2, %v7851_v33 }
 0x5dc   :  { %3402 = vmatpush.msra.mxu0 %v7855_v9  ;;  %3422 = vmatpush.msra.mxu1 %v7858_v53  ;;  %v2838_v9 = vpop.f32.mrf.mxu3  ;;  %v2819_v53 = vadd.f32 %v2818_v61, %v7385_v12 }
 0x5dd   :  { %3442 = vmatpush.msra.mxu2 %v7861_v11  ;;  %3462 = vmatpush.msra.mxu3 %v7864_v16  ;;  %v2839_v1 = vadd.f32 %v2838_v9, %v8873_v52 }
 0x645   :  { %v2861_v62 = vpop.f32.mrf.mxu0  ;;  %v2881_v15 = vpop.f32.mrf.mxu1 }
 0x646   :  { %v2924_v28 = vadd.f32 %v2861_v62, %v2779_v57  ;;  %v2925_v6 = vadd.f32 %v2881_v15, %v2799_v7 }
 0x648   :  { %v5833_v33 = vmul.f32 -1.442695, %v2924_v28  ;;  %v5834_v27 = vmul.f32 -1.442695, %v2925_v6 }
 0x64a   :  { %6230 = vpow2.f32 %v5833_v33 }
 0x64b   :  { %6232 = vpow2.f32 %v5834_v27 }
 0x64c   :  { %v2901_v11 = vpop.f32.mrf.mxu2  ;;  %v2921_v19 = vpop.f32.mrf.mxu3 }
 0x64d   :  { %v2926_v16 = vadd.f32 %v2901_v11, %v2819_v53  ;;  %v3008_v3 = vpop.f32.mrf.mxu0  ;;  %v3028_v10 = vpop.f32.mrf.mxu1  ;;  %v2927_v57 = vadd.f32 %v2921_v19, %v2839_v1 }
 0x64e   :  { %v3075_v38 = vrot.slane %v3008_v3, 4  ;;  %v3076_v41 = vrot.slane %v3028_v10, 4 }
 0x64f   :  { %v5835_v30 = vmul.f32 -1.442695, %v2926_v16 }
 0x650   :  { %v6231_v21 = vpop.eup %6230  ;;  %v3083_v20 = vadd.f32 %v3075_v38, %v7141_v47  ;;  %v3084_v43 = vadd.f32 %v3076_v41, %v7143_v49 }
 0x651   :  { %v6233_v34 = vpop.eup %6232  ;;  %v2937_v35 = vadd.f32 1.0, %v6231_v21  ;;  %6234 = vpow2.f32 %v5835_v30 }
 0x652   :  { %v2938_v58 = vadd.f32 1.0, %v6233_v34  ;;  %v5844_v14 = vmul.f32 -1.442695, %v3083_v20  ;;  %v5845_v60 = vmul.f32 -1.442695, %v3084_v43 }
 0x653   :  { %6236 = vrcp.f32 %v2937_v35  ;;  %v2949_v53 = vand.u32 2147483647, %v2937_v35  ;;  %v2951_v3 = vand.u32 2147483648, %v2937_v35  ;;  %vm2945_vm13 = vweird.f32 %v2937_v35 }
 0x654   :  { %6238 = vrcp.f32 %v2938_v58  ;;  %v3048_v0 = vpop.f32.mrf.mxu2  ;;  %v3068_v9 = vpop.f32.mrf.mxu3  ;;  %v2966_v41 = vand.u32 2147483648, %v2938_v58  ;;  %v2964_v30 = vand.u32 2147483647, %v2938_v58  ;;  %vm2960_vm12 = vweird.f32 %v2938_v58 }
 0x655   :  { %6240 = vpow2.f32 %v5844_v14  ;;  %v3077_v36 = vrot.slane %v3048_v0, 4  ;;  %v3078_v43 = vrot.slane %v3068_v9, 4  ;;  %vm2950_vm15 = vcmp.eq.f32.partialorder %v2949_v53, 8.507059e+37 }
 0x656   :  { %6242 = vpow2.f32 %v5845_v60  ;;  %v2952_v1 = vor.u32 1.1754944e-38, %v2951_v3  ;;  %vm2965_vm6 = vcmp.eq.f32.partialorder %v2964_v30, 8.507059e+37 }
 0x657   :  { %v6235_v51 = vpop.eup %6234  ;;  %v3085_v7 = vadd.f32 %v3077_v36, %v8874_v59 }
 0x658   :  { %v8071_v61 = vadd.f32 1.0, %v6235_v51 }
 0x659   :  { %v6237_v62 = vpop.eup %6236  ;;  %v5846_v15 = vmul.f32 -1.442695, %v3085_v7 }
 0x65a   :  { %v6239_v28 = vpop.eup %6238  ;;  %v2941_v6 = vmul.f32 %v6237_v62, %v2937_v35  ;;  %6244 = vrcp.f32 %v8071_v61  ;;  %vm2946_vm10 = vweird.f32 %v6237_v62  ;;  %vm2975_vm9 = vweird.f32 %v8071_v61 }
 0x65b   :  { %v6241_v33 = vpop.eup %6240  ;;  %v2956_v27 = vmul.f32 %v6239_v28, %v2938_v58  ;;  %6246 = vtanh.f32 %v2927_v57  ;;  %vm2961_vm11 = vweird.f32 %v6239_v28  ;;  %vm2947_vm14 = vmor %vm2945_vm13, %vm2946_vm10  ;;  %v2967_v57 = vor.u32 1.1754944e-38, %v2966_v41 }
 0x65c   :  { %v6243_v11 = vpop.eup %6242  ;;  %v2942_v16 = vsub.f32 1.0, %v2941_v6  ;;  %v8074_v10 = vadd.f32 1.0, %v6241_v33  ;;  %6248 = vpow2.f32 %v5846_v15  ;;  %vm2962_vm5 = vmor %vm2960_vm12, %vm2961_vm11  ;;  %v3086_v15 = vadd.f32 %v3078_v43, %v8875_v23 }
 0x65d   :  { %v2957_v38 = vsub.f32 1.0, %v2956_v27  ;;  %v8076_v21 = vadd.f32 1.0, %v6243_v11  ;;  %v2979_v41 = vand.u32 2147483647, %v8071_v61 }
 0x65e   :  { %v2943_v20 = vmul.f32 %v6237_v62, %v2942_v16  ;;  %6250 = vrcp.f32 %v8074_v10 }
 0x65f   :  { %v2958_v34 = vmul.f32 %v6239_v28, %v2957_v38  ;;  %6252 = vrcp.f32 %v8076_v21  ;;  %vm8109_vm12 = vcmp.eq.f32.partialorder %v2979_v41, 8.507059e+37  ;;  %vm3119_vm13 = vweird.f32 %v8076_v21 }
 0x660   :  { %v8080_v19 = vpop.eup %6244  ;;  %v2944_v14 = vadd.f32 %v6237_v62, %v2943_v20 }
 0x661   :  { %v6247_v60 = vpop.eup %6246  ;;  %v2971_v0 = vmul.f32 %v8080_v19, %v8071_v61  ;;  %v2959_v36 = vadd.f32 %v6239_v28, %v2958_v34  ;;  %v3108_v34 = vand.u32 2147483647, %v8074_v10  ;;  %vm2976_vm7 = vweird.f32 %v8080_v19 }
 0x662   :  { %v6249_v51 = vpop.eup %6248  ;;  %v2948_v7 = vsel %vm2947_vm14, %v6237_v62, %v2944_v14  ;;  %v3146_v62 = vrot.slane %v7921_v2, 7  ;;  %v3125_v2 = vand.u32 2147483648, %v8076_v21  ;;  %vm8105_vm11 = vmor %vm2975_vm9, %vm2976_vm7  ;;  %vm3104_vm14 = vweird.f32 %v8074_v10 }
 0x663   :  { %v2972_v6 = vsub.f32 1.0, %v2971_v0  ;;  %v2953_v33 = vsel %vm2950_vm15, %v2952_v1, %v2948_v7  ;;  %v2963_v58 = vsel %vm2962_vm5, %v6239_v28, %v2959_v36  ;;  %v8085_v27 = vadd.f32 1.0, %v6249_v51 }
 0x664   :  { %v6251_v35 = vpop.eup %6250  ;;  %v2968_v9 = vsel %vm2965_vm6, %v2967_v57, %v2963_v58  ;;  %v2987_v11 = vmul.f32 %v6247_v60, %v2953_v33  ;;  %v2981_v28 = vand.u32 2147483648, %v8071_v61  ;;  %v3110_v60 = vand.u32 2147483648, %v8074_v10 }
 0x665   :  { %v6253_v16 = vpop.eup %6252  ;;  %v2973_v53 = vmul.f32 %v8080_v19, %v2972_v6  ;;  %v2986_v3 = vmul.f32 %v2968_v9, %v7899_v37  ;;  %v3100_v38 = vmul.f32 %v6251_v35, %v8074_v10  ;;  %6254 = vrcp.f32 %v8085_v27 }
 0x666   :  { %v3115_v30 = vmul.f32 %v6253_v16, %v8076_v21  ;;  %6256 = vtanh.f32 %v3086_v15  ;;  %vm3105_vm8 = vweird.f32 %v6251_v35  ;;  %vm3120_vm10 = vweird.f32 %v6253_v16 }
 0x667   :  { %v8095_v20 = vadd.f32 %v2987_v11, %v2986_v3  ;;  %v3101_v43 = vsub.f32 1.0, %v3100_v38  ;;  %v2974_v37 = vadd.f32 %v8080_v19, %v2973_v53  ;;  %v3123_v36 = vand.u32 2147483647, %v8076_v21  ;;  %vm3106_vm15 = vmor %vm3104_vm14, %vm3105_vm8 }
 0x668   :  { %v3116_v14 = vsub.f32 1.0, %v3115_v30  ;;  %v3111_v33 = vor.u32 1.1754944e-38, %v3110_v60  ;;  %v2982_v11 = vor.u32 1.1754944e-38, %v2981_v28  ;;  %vm3121_vm5 = vmor %vm3119_vm13, %vm3120_vm10  ;;  %v3126_v53 = vor.u32 1.1754944e-38, %v3125_v2 }
 0x669   :  { %6258 = vtanh.f32 %v8095_v20  ;;  %v3102_v0 = vmul.f32 %v6251_v35, %v3101_v43  ;;  %v2978_v61 = vsel %vm8105_vm11, %v8080_v19, %v2974_v37  ;;  %vm3109_vm6 = vcmp.eq.f32.partialorder %v3108_v34, 8.507059e+37 }
 0x66a   :  { %v3117_v1 = vmul.f32 %v6253_v16, %v3116_v14  ;;  %vm3124_vm7 = vcmp.eq.f32.partialorder %v3123_v36, 8.507059e+37  ;;  %v2983_v19 = vsel %vm8109_vm12, %v2982_v11, %v2978_v61  ;;  %vm5535_vm8 = vcmask 1042432   ;;  %v8153_v61 = vld [vmem:[#allocation14 + $0x38] sm:$0x3f]  ;;  %v8175_v11 = vld [vmem:[#allocation7 + $0x28] sm:$0x3f] }
 0x66b   :  { %v6255_v51 = vpop.eup %6254  ;;  %v3103_v15 = vadd.f32 %v6251_v35, %v3102_v0  ;;  %vm3134_vm10 = vweird.f32 %v8085_v27  ;;  %v3138_v34 = vand.u32 2147483647, %v8085_v27 }
 0x66c   :  { %v3130_v6 = vmul.f32 %v6255_v51, %v8085_v27  ;;  %v3118_v58 = vadd.f32 %v6253_v16, %v3117_v1  ;;  %v6257_v9 = vpop.eup %6256  ;;  %vm3135_vm9 = vweird.f32 %v6255_v51 }
 0x66d   :  { %v3107_v3 = vsel %vm3106_vm15, %v6251_v35, %v3103_v15  ;;  %v3140_v35 = vand.u32 2147483648, %v8085_v27  ;;  %vm3136_vm11 = vmor %vm3134_vm10, %vm3135_vm9  ;;  %vm3139_vm12 = vcmp.eq.f32.partialorder %v3138_v34, 8.507059e+37  ;;  %v8145_v27 = vld [vmem:[#allocation14 + $0x28] sm:$0x3f] }
 0x66e   :  { %v3131_v21 = vsub.f32 1.0, %v3130_v6  ;;  %v3112_v38 = vsel %vm3109_vm6, %v3111_v33, %v3107_v3  ;;  %v3122_v41 = vsel %vm3121_vm5, %v6253_v16, %v3118_v58  ;;  %v8157_v6 = vld [vmem:[#allocation14] sm:$0xff]  ;;  %v8160_v33 = vld [vmem:[#allocation14 + $0x8] sm:$0xff]  ;;  %v8163_v58 = vld [vmem:[#allocation14 + $0x10] sm:$0xff] }
 0x66f   :  { %v6259_v10 = vpop.eup %6258  ;;  %v3127_v30 = vsel %vm3124_vm7, %v3126_v53, %v3122_v41  ;;  %v3149_v43 = vmul.f32 %v6257_v9, %v3112_v38  ;;  %v3141_v1 = vor.u32 1.1754944e-38, %v3140_v35  ;;  %v8166_v9 = vld [vmem:[#allocation14 + $0x18] sm:$0xff]  ;;  %v8179_v53 = vld [vmem:[#allocation7 + $0x30] sm:$0x3f]  ;;  %v8183_v3 = vld [vmem:[#allocation7 + $0x38] sm:$0x3f] }
 0x670   :  { %v3132_v37 = vmul.f32 %v6255_v51, %v3131_v21  ;;  %v3148_v14 = vmul.f32 %v3146_v62, %v3127_v30  ;;  %v2990_v60 = vmul.f32 %v6259_v10, %v2983_v19  ;;  %8889 = vst [vmem:[#allocation36_spill] sm:$0xff] %v8183_v3  ;;  %v8187_v21 = vld [vmem:[#allocation7] sm:$0xff]  ;;  %v8193_v38 = vld [vmem:[#allocation7 + $0x10] sm:$0xff]  ;;  %v8196_v41 = vld [vmem:[#allocation7 + $0x18] sm:$0xff]  ;;  %v3170_v10 = vpop.f32.mrf.mxu0  ;;  %v3190_v30 = vpop.f32.mrf.mxu1 }
 0x671   :  { %8890 = vst [vmem:[#allocation37_spill] sm:$0xff] %v8187_v21  ;;  %v3191_v19 = vadd.f32 %v3190_v30, %v8882_v44 }
 0x672   :  { %v8122_v28 = vadd.f32 %v3149_v43, %v3148_v14  ;;  %v5523_v0 = vrot.slane %v2990_v60, 5  ;;  %v3133_v2 = vadd.f32 %v6255_v51, %v3132_v37  ;;  %8892 = vst [vmem:[#allocation40_spill] sm:$0xff] %v8193_v38  ;;  %v3171_v43 = vadd.f32 %v3170_v10, %v8881_v54  ;;  %v3210_v37 = vpop.f32.mrf.mxu2 }
 0x673   :  { %8893 = vst [vmem:[#allocation47_spill] sm:$0xff] %v8196_v41 }
 0x674   :  { %6260 = vtanh.f32 %v8122_v28  ;;  %v8127_v16 = vsel %vm5535_vm8, %v7928_v22, %v5523_v0  ;;  %v3137_v62 = vsel %vm3136_vm11, %v6255_v51, %v3133_v2  ;;  %v8141_v22 = vld [vmem:[#allocation14 + $0x20] sm:$0x3f]  ;;  %v8149_v51 = vld [vmem:[#allocation14 + $0x30] sm:$0x3f] }
 0x675   :  { %v3142_v57 = vsel %vm3139_vm12, %v3141_v1, %v3137_v62  ;;  %v3211_v62 = vadd.f32 %v3210_v37, %v8883_v32 }
 0x67a   :  { %v6261_v36 = vpop.eup %6260 }
 0x67b   :  { %v3152_v7 = vmul.f32 %v6261_v36, %v3142_v57  ;;  %v3230_v57 = vpop.f32.mrf.mxu3 }
 0x67d   :  { %v8131_v15 = vrot.slane %v3152_v7, 4 }
 0x67f   :  { %5856 = vmatmul.msk.f32.vlgmr.msrb.gmra.mxu0 %vm417_vm3, %v8131_v15  ;;  %5858 = vmatmul.msk.f32.vlgmr.msrb.gmra.mxu1 %vm417_vm3, %v8131_v15 }
 0x680   :  { %5860 = vmatmul.msk.f32.vlgmr.msrb.gmra.mxu2 %vm417_vm3, %v8131_v15  ;;  %5862 = vmatmul.msk.f32.vlgmr.msrb.gmra.mxu3 %vm417_vm3, %v8131_v15 }
 0x681   :  { %5874 = vmatpush.msk.msrb.mxu0 %vm421_vm2, %v8141_v22  ;;  %5876 = vmatpush.msk.msrb.mxu1 %vm421_vm2, %v8145_v27 }
 0x682   :  { %5878 = vmatpush.msk.msrb.mxu2 %vm421_vm2, %v8149_v51  ;;  %5880 = vmatpush.msk.msrb.mxu3 %vm421_vm2, %v8153_v61 }
 0x683   :  { %3485 = vmatpush.msrb.mxu0 %v8157_v6  ;;  %3505 = vmatpush.msrb.mxu1 %v8160_v33 }
 0x684   :  { %3525 = vmatpush.msrb.mxu2 %v8163_v58  ;;  %3545 = vmatpush.msrb.mxu3 %v8166_v9 }
 0x687   :  { %5867 = vmatmul.msk.f32.vlgmr.msra.gmra.mxu0 %vm417_vm3, %v2990_v60  ;;  %5869 = vmatmul.msk.f32.vlgmr.msra.gmra.mxu1 %vm417_vm3, %v2990_v60 }
 0x688   :  { %5871 = vmatmul.msk.f32.vlgmr.msra.gmra.mxu2 %vm417_vm3, %v2990_v60  ;;  %5873 = vmatmul.msk.f32.vlgmr.msra.gmra.mxu3 %vm417_vm3, %v2990_v60 }
 0x689   :  { %5885 = vmatpush.msk.msra.mxu0 %vm421_vm2, %v7958_v8  ;;  %5887 = vmatpush.msk.msra.mxu1 %vm421_vm2, %v8175_v11  ;;  %v8190_v8 = vld [vmem:[#allocation7 + $0x8] sm:$0xff] }
 0x68a   :  { %5889 = vmatpush.msk.msra.mxu2 %vm421_vm2, %v8179_v53  ;;  %5891 = vmatpush.msk.msra.mxu3 %vm421_vm2, %v8183_v3  ;;  %8891 = vst [vmem:[#allocation38_spill] sm:$0xff] %v8190_v8 }
 0x68b   :  { %3632 = vmatpush.msra.mxu0 %v8187_v21  ;;  %3652 = vmatpush.msra.mxu1 %v8190_v8 }
 0x68c   :  { %3672 = vmatpush.msra.mxu2 %v8193_v38  ;;  %3692 = vmatpush.msra.mxu3 %v8196_v41 }
 0x6fc   :  { %v3254_v14 = vpop.f32.mrf.mxu0  ;;  %v3274_v60 = vpop.f32.mrf.mxu1 }
 0x6fd   :  { %v3317_v0 = vadd.f32 %v3254_v14, %v3171_v43  ;;  %v3318_v2 = vadd.f32 %v3274_v60, %v3191_v19  ;;  %v3231_v19 = vadd.f32 %v3230_v57, %v8884_v48 }
 0x6ff   :  { %v5863_v35 = vmul.f32 -1.442695, %v3317_v0  ;;  %v5864_v34 = vmul.f32 -1.442695, %v3318_v2 }
 0x701   :  { %6262 = vpow2.f32 %v5863_v35 }
 0x702   :  { %6264 = vpow2.f32 %v5864_v34 }
 0x703   :  { %v3294_v1 = vpop.f32.mrf.mxu2  ;;  %v3314_v44 = vpop.f32.mrf.mxu3 }
 0x704   :  { %v3319_v36 = vadd.f32 %v3294_v1, %v3211_v62  ;;  %v3320_v0 = vadd.f32 %v3314_v44, %v3231_v19 }
 0x706   :  { %v5865_v7 = vmul.f32 -1.442695, %v3319_v36 }
 0x707   :  { %v6263_v41 = vpop.eup %6262 }
 0x708   :  { %v6265_v38 = vpop.eup %6264  ;;  %v3330_v10 = vadd.f32 1.0, %v6263_v41  ;;  %6266 = vpow2.f32 %v5865_v7 }
 0x709   :  { %v3331_v30 = vadd.f32 1.0, %v6265_v38 }
 0x70a   :  { %6268 = vrcp.f32 %v3330_v10  ;;  %v3344_v1 = vand.u32 2147483648, %v3330_v10  ;;  %v3342_v38 = vand.u32 2147483647, %v3330_v10  ;;  %vm3338_vm15 = vweird.f32 %v3330_v10 }
 0x70b   :  { %6270 = vrcp.f32 %v3331_v30  ;;  %v3359_v41 = vand.u32 2147483648, %v3331_v30  ;;  %v3357_v32 = vand.u32 2147483647, %v3331_v30  ;;  %vm3353_vm5 = vweird.f32 %v3331_v30 }
 0x70c   :  { %vm3343_vm8 = vcmp.eq.f32.partialorder %v3342_v38, 8.507059e+37 }
 0x70d   :  { %vm3358_vm9 = vcmp.eq.f32.partialorder %v3357_v32, 8.507059e+37 }
 0x70e   :  { %v6267_v43 = vpop.eup %6266 }
 0x70f   :  { %v3332_v14 = vadd.f32 1.0, %v6267_v43  ;;  %v3345_v43 = vor.u32 1.1754944e-38, %v3344_v1 }
 0x710   :  { %v6269_v60 = vpop.eup %6268 }
 0x711   :  { %v6271_v37 = vpop.eup %6270  ;;  %v3334_v2 = vmul.f32 %v6269_v60, %v3330_v10  ;;  %6272 = vrcp.f32 %v3332_v14  ;;  %vm3339_vm13 = vweird.f32 %v6269_v60  ;;  %v3374_v1 = vand.u32 2147483648, %v3332_v14 }
 0x712   :  { %v3349_v35 = vmul.f32 %v6271_v37, %v3331_v30  ;;  %6274 = vtanh.f32 %v3320_v0  ;;  %vm3354_vm14 = vweird.f32 %v6271_v37  ;;  %vm3340_vm6 = vmor %vm3338_vm15, %vm3339_vm13  ;;  %vm3368_vm11 = vweird.f32 %v3332_v14 }
 0x713   :  { %v3335_v34 = vsub.f32 1.0, %v3334_v2  ;;  %vm3355_vm7 = vmor %vm3353_vm5, %vm3354_vm14  ;;  %v3360_v2 = vor.u32 1.1754944e-38, %v3359_v41  ;;  %v3375_v38 = vor.u32 1.1754944e-38, %v3374_v1 }
 0x714   :  { %v3350_v62 = vsub.f32 1.0, %v3349_v35 }
 0x715   :  { %v3336_v36 = vmul.f32 %v6269_v60, %v3335_v34 }
 0x716   :  { %v3351_v7 = vmul.f32 %v6271_v37, %v3350_v62 }
 0x717   :  { %v6273_v54 = vpop.eup %6272  ;;  %v3337_v57 = vadd.f32 %v6269_v60, %v3336_v36 }
 0x718   :  { %v3364_v44 = vmul.f32 %v6273_v54, %v3332_v14  ;;  %v3352_v19 = vadd.f32 %v6271_v37, %v3351_v7  ;;  %v6275_v0 = vpop.eup %6274  ;;  %vm3369_vm10 = vweird.f32 %v6273_v54 }
 0x719   :  { %v3341_v35 = vsel %vm3340_vm6, %v6269_v60, %v3337_v57  ;;  %v3372_v60 = vand.u32 2147483647, %v3332_v14  ;;  %vm3370_vm12 = vmor %vm3368_vm11, %vm3369_vm10 }
 0x71a   :  { %v3365_v48 = vsub.f32 1.0, %v3364_v44  ;;  %v3346_v34 = vsel %vm3343_vm8, %v3345_v43, %v3341_v35  ;;  %v3356_v8 = vsel %vm3355_vm7, %v6271_v37, %v3352_v19 }
 0x71b   :  { %v3361_v62 = vsel %vm3358_vm9, %v3360_v2, %v3356_v8  ;;  %v3380_v21 = vmul.f32 %v6275_v0, %v3346_v34  ;;  %vm3373_vm13 = vcmp.eq.f32.partialorder %v3372_v60, 8.507059e+37 }
 0x71c   :  { %v3366_v3 = vmul.f32 %v6273_v54, %v3365_v48  ;;  %v3379_v36 = vmul.f32 %v3361_v62, %v7977_v17  ;;  %v8251_v48 = vld [vmem:[#allocation16 + $0x28] sm:$0x3f]  ;;  %v8255_v17 = vld [vmem:[#allocation16 + $0x30] sm:$0x3f] }
 0x71e   :  { %v8204_v10 = vadd.f32 %v3380_v21, %v3379_v36  ;;  %v3367_v30 = vadd.f32 %v6273_v54, %v3366_v3 }
 0x720   :  { %6276 = vtanh.f32 %v8204_v10  ;;  %v3371_v41 = vsel %vm3370_vm12, %v6273_v54, %v3367_v30  ;;  %v8247_v54 = vld [vmem:[#allocation16 + $0x20] sm:$0x3f] }
 0x721   :  { %v3376_v32 = vsel %vm3373_vm13, %v3375_v38, %v3371_v41 }
 0x726   :  { %v6277_v37 = vpop.eup %6276 }
 0x727   :  { %v3383_v8 = vmul.f32 %v6277_v37, %v3376_v32 }
 0x729   :  { %5875 = vmatmul.msk.f32.vlgmr.msrb.gmra.mxu0 %vm417_vm3, %v3383_v8  ;;  %5877 = vmatmul.msk.f32.vlgmr.msrb.gmra.mxu1 %vm417_vm3, %v3383_v8 }
 0x72a   :  { %5879 = vmatmul.msk.f32.vlgmr.msrb.gmra.mxu2 %vm417_vm3, %v3383_v8  ;;  %5881 = vmatmul.msk.f32.vlgmr.msrb.gmra.mxu3 %vm417_vm3, %v3383_v8 }
 0x72b   :  { %5896 = vmatpush.msk.msrb.mxu0 %vm421_vm2, %v7984_v4  ;;  %5898 = vmatpush.msk.msrb.mxu1 %vm421_vm2, %v7988_v13  ;;  %v8259_v4 = vld [vmem:[#allocation16 + $0x38] sm:$0x3f]  ;;  %v8263_v13 = vld [vmem:[#allocation16] sm:$0xff] }
 0x72c   :  { %5900 = vmatpush.msk.msrb.mxu2 %vm421_vm2, %v7992_v42  ;;  %5902 = vmatpush.msk.msrb.mxu3 %vm421_vm2, %v7996_v63  ;;  %v8266_v42 = vld [vmem:[#allocation16 + $0x8] sm:$0xff]  ;;  %v8269_v63 = vld [vmem:[#allocation16 + $0x10] sm:$0xff] }
 0x72d   :  { %3794 = vmatpush.msrb.mxu0 %v8000_v40  ;;  %3814 = vmatpush.msrb.mxu1 %v8003_v39  ;;  %v8272_v40 = vld [vmem:[#allocation16 + $0x18] sm:$0xff]  ;;  %v3404_v39 = vpop.f32.mrf.mxu0 }
 0x72e   :  { %3834 = vmatpush.msrb.mxu2 %v8006_v25  ;;  %3854 = vmatpush.msrb.mxu3 %v8009_v50  ;;  %v3424_v25 = vpop.f32.mrf.mxu1  ;;  %v3405_v50 = vadd.f32 %v3404_v39, %v7379_v55 }
 0x731   :  { %5886 = vmatmul.msk.f32.vlgmr.msra.gmra.mxu0 %vm417_vm3, %v8131_v15  ;;  %5888 = vmatmul.msk.f32.vlgmr.msra.gmra.mxu1 %vm417_vm3, %v8131_v15 }
 0x732   :  { %5890 = vmatmul.msk.f32.vlgmr.msra.gmra.mxu2 %vm417_vm3, %v8131_v15  ;;  %5892 = vmatmul.msk.f32.vlgmr.msra.gmra.mxu3 %vm417_vm3, %v8131_v15  ;;  %v3464_v15 = vpop.f32.mrf.mxu3 }
 0x733   :  { %5904 = vmatpush.msk.msra.mxu0 %vm421_vm2, %v8020_v45  ;;  %5906 = vmatpush.msk.msra.mxu1 %vm421_vm2, %v8024_v31  ;;  %v3425_v45 = vadd.f32 %v3424_v25, %v7381_v56  ;;  %v3444_v31 = vpop.f32.mrf.mxu2  ;;  %v3465_v38 = vadd.f32 %v3464_v15, %v8873_v52 }
 0x734   :  { %5908 = vmatpush.msk.msra.mxu2 %vm421_vm2, %v8028_v26  ;;  %5910 = vmatpush.msk.msra.mxu3 %vm421_vm2, %v8032_v46  ;;  %v3445_v3 = vadd.f32 %v3444_v31, %v7385_v12 }
 0x735   :  { %3878 = vmatpush.msra.mxu0 %v8036_v24  ;;  %3898 = vmatpush.msra.mxu1 %v8039_v5 }
 0x736   :  { %3918 = vmatpush.msra.mxu2 %v8042_v18  ;;  %3938 = vmatpush.msra.mxu3 %v8045_v29 }
 0x739   :  { %5897 = vmatmul.msk.f32.vlgmr.msrb.gmra.mxu0 %vm417_vm3, %v3383_v8  ;;  %5899 = vmatmul.msk.f32.vlgmr.msrb.gmra.mxu1 %vm417_vm3, %v3383_v8 }
 0x73a   :  { %5901 = vmatmul.msk.f32.vlgmr.msrb.gmra.mxu2 %vm417_vm3, %v3383_v8  ;;  %5903 = vmatmul.msk.f32.vlgmr.msrb.gmra.mxu3 %vm417_vm3, %v3383_v8 }
 0x73b   :  { %5915 = vmatpush.msk.msrb.mxu0 %vm421_vm2, %v8247_v54  ;;  %5917 = vmatpush.msk.msrb.mxu1 %vm421_vm2, %v8251_v48 }
 0x73c   :  { %5919 = vmatpush.msk.msrb.mxu2 %vm421_vm2, %v8255_v17  ;;  %5921 = vmatpush.msk.msrb.mxu3 %vm421_vm2, %v8259_v4 }
 0x73d   :  { %4028 = vmatpush.msrb.mxu0 %v8263_v13  ;;  %4048 = vmatpush.msrb.mxu1 %v8266_v42 }
 0x73e   :  { %4068 = vmatpush.msrb.mxu2 %v8269_v63  ;;  %4088 = vmatpush.msrb.mxu3 %v8272_v40 }
 0x7a6   :  { %v3487_v26 = vpop.f32.mrf.mxu0  ;;  %v3507_v46 = vpop.f32.mrf.mxu1 }
 0x7a7   :  { %v3550_v24 = vadd.f32 %v3487_v26, %v3405_v50  ;;  %v3551_v5 = vadd.f32 %v3507_v46, %v3425_v45 }
 0x7a9   :  { %v5882_v18 = vmul.f32 -1.442695, %v3550_v24  ;;  %v5883_v29 = vmul.f32 -1.442695, %v3551_v5 }
 0x7ab   :  { %6278 = vpow2.f32 %v5882_v18 }
 0x7ac   :  { %6280 = vpow2.f32 %v5883_v29 }
 0x7ad   :  { %v3527_v21 = vpop.f32.mrf.mxu2  ;;  %v3547_v36 = vpop.f32.mrf.mxu3 }
 0x7ae   :  { %v3552_v14 = vadd.f32 %v3527_v21, %v3445_v3  ;;  %v3634_v7 = vpop.f32.mrf.mxu0  ;;  %v3654_v57 = vpop.f32.mrf.mxu1  ;;  %v3553_v8 = vadd.f32 %v3547_v36, %v3465_v38 }
 0x7af   :  { %v3701_v44 = vrot.slane %v3634_v7, 3  ;;  %v3702_v43 = vrot.slane %v3654_v57, 3 }
 0x7b0   :  { %v5884_v19 = vmul.f32 -1.442695, %v3552_v14 }
 0x7b1   :  { %v6279_v2 = vpop.eup %6278  ;;  %v3709_v35 = vadd.f32 %v3701_v44, %v7141_v47  ;;  %v3710_v0 = vadd.f32 %v3702_v43, %v7143_v49 }
 0x7b2   :  { %v6281_v34 = vpop.eup %6280  ;;  %v3563_v62 = vadd.f32 1.0, %v6279_v2  ;;  %6282 = vpow2.f32 %v5884_v19 }
 0x7b3   :  { %v3564_v30 = vadd.f32 1.0, %v6281_v34  ;;  %v5893_v1 = vmul.f32 -1.442695, %v3709_v35  ;;  %v5894_v60 = vmul.f32 -1.442695, %v3710_v0 }
 0x7b4   :  { %6284 = vrcp.f32 %v3563_v62  ;;  %v3575_v5 = vand.u32 2147483647, %v3563_v62  ;;  %v3577_v3 = vand.u32 2147483648, %v3563_v62  ;;  %vm3571_vm6 = vweird.f32 %v3563_v62 }
 0x7b5   :  { %6286 = vrcp.f32 %v3564_v30  ;;  %v3674_v41 = vpop.f32.mrf.mxu2  ;;  %v3694_v18 = vpop.f32.mrf.mxu3  ;;  %v3592_v7 = vand.u32 2147483648, %v3564_v30  ;;  %v3590_v57 = vand.u32 2147483647, %v3564_v30  ;;  %vm3586_vm5 = vweird.f32 %v3564_v30 }
 0x7b6   :  { %6288 = vpow2.f32 %v5893_v1  ;;  %v3703_v37 = vrot.slane %v3674_v41, 3  ;;  %v3704_v19 = vrot.slane %v3694_v18, 3  ;;  %vm3576_vm8 = vcmp.eq.f32.partialorder %v3575_v5, 8.507059e+37 }
 0x7b7   :  { %6290 = vpow2.f32 %v5894_v60  ;;  %v3578_v1 = vor.u32 1.1754944e-38, %v3577_v3  ;;  %v3593_v38 = vor.u32 1.1754944e-38, %v3592_v7  ;;  %vm3591_vm10 = vcmp.eq.f32.partialorder %v3590_v57, 8.507059e+37 }
 0x7b8   :  { %v6283_v32 = vpop.eup %6282  ;;  %v3711_v39 = vadd.f32 %v3703_v37, %v8874_v59 }
 0x7b9   :  { %v8282_v25 = vadd.f32 1.0, %v6283_v32  ;;  %v3712_v32 = vadd.f32 %v3704_v19, %v8875_v23 }
 0x7ba   :  { %v6285_v50 = vpop.eup %6284  ;;  %v5895_v45 = vmul.f32 -1.442695, %v3711_v39 }
 0x7bb   :  { %v6287_v31 = vpop.eup %6286  ;;  %v3567_v26 = vmul.f32 %v6285_v50, %v3563_v62  ;;  %6292 = vrcp.f32 %v8282_v25  ;;  %vm3572_vm14 = vweird.f32 %v6285_v50  ;;  %vm3601_vm13 = vweird.f32 %v8282_v25 }
 0x7bc   :  { %v6289_v46 = vpop.eup %6288  ;;  %v3582_v24 = vmul.f32 %v6287_v31, %v3564_v30  ;;  %6294 = vtanh.f32 %v3553_v8  ;;  %vm3587_vm15 = vweird.f32 %v6287_v31  ;;  %vm3573_vm7 = vmor %vm3571_vm6, %vm3572_vm14 }
 0x7bd   :  { %v6291_v29 = vpop.eup %6290  ;;  %v3568_v15 = vsub.f32 1.0, %v3567_v26  ;;  %v8285_v21 = vadd.f32 1.0, %v6289_v46  ;;  %6296 = vpow2.f32 %v5895_v45  ;;  %vm3588_vm9 = vmor %vm3586_vm5, %vm3587_vm15 }
 0x7be   :  { %v3583_v14 = vsub.f32 1.0, %v3582_v24  ;;  %v8287_v44 = vadd.f32 1.0, %v6291_v29 }
 0x7bf   :  { %v3569_v43 = vmul.f32 %v6285_v50, %v3568_v15  ;;  %6298 = vrcp.f32 %v8285_v21  ;;  %v3605_v15 = vand.u32 2147483647, %v8282_v25  ;;  %v3734_v57 = vand.u32 2147483647, %v8285_v21 }
 0x7c0   :  { %v3584_v2 = vmul.f32 %v6287_v31, %v3583_v14  ;;  %6300 = vrcp.f32 %v8287_v44  ;;  %v3736_v19 = vand.u32 2147483648, %v8285_v21  ;;  %vm3745_vm6 = vweird.f32 %v8287_v44 }
 0x7c1   :  { %v8291_v35 = vpop.eup %6292  ;;  %v3570_v0 = vadd.f32 %v6285_v50, %v3569_v43  ;;  %vm8320_vm5 = vcmp.eq.f32.partialorder %v3605_v15, 8.507059e+37 }
 0x7c2   :  { %v6295_v34 = vpop.eup %6294  ;;  %v3597_v36 = vmul.f32 %v8291_v35, %v8282_v25  ;;  %v3585_v60 = vadd.f32 %v6287_v31, %v3584_v2  ;;  %vm3602_vm11 = vweird.f32 %v8291_v35 }
 0x7c3   :  { %v6297_v41 = vpop.eup %6296  ;;  %v3574_v37 = vsel %vm3573_vm7, %v6285_v50, %v3570_v0  ;;  %v3772_v50 = vrot.slane %v8122_v28, 7  ;;  %v3751_v28 = vand.u32 2147483648, %v8287_v44  ;;  %vm8316_vm15 = vmor %vm3601_vm13, %vm3602_vm11  ;;  %vm3730_vm7 = vweird.f32 %v8285_v21 }
 0x7c4   :  { %v3598_v8 = vsub.f32 1.0, %v3597_v36  ;;  %v3579_v39 = vsel %vm3576_vm8, %v3578_v1, %v3574_v37  ;;  %v3589_v30 = vsel %vm3588_vm9, %v6287_v31, %v3585_v60  ;;  %v8296_v45 = vadd.f32 1.0, %v6297_v41  ;;  %v3836_v1 = vpop.f32.mrf.mxu2 }
 0x7c5   :  { %v6299_v62 = vpop.eup %6298  ;;  %v3594_v26 = vsel %vm3591_vm10, %v3593_v38, %v3589_v30  ;;  %v3613_v46 = vmul.f32 %v6295_v34, %v3579_v39  ;;  %v3607_v31 = vand.u32 2147483648, %v8282_v25  ;;  %v3749_v34 = vand.u32 2147483647, %v8287_v44 }
 0x7c6   :  { %v6301_v24 = vpop.eup %6300  ;;  %v3599_v5 = vmul.f32 %v8291_v35, %v3598_v8  ;;  %v3612_v18 = vmul.f32 %v3594_v26, %v8095_v20  ;;  %v3726_v29 = vmul.f32 %v6299_v62, %v8285_v21  ;;  %6302 = vrcp.f32 %v8296_v45 }
 0x7c7   :  { %v3741_v3 = vmul.f32 %v6301_v24, %v8287_v44  ;;  %6304 = vtanh.f32 %v3712_v32  ;;  %vm3731_vm12 = vweird.f32 %v6299_v62  ;;  %vm3746_vm14 = vweird.f32 %v6301_v24 }
 0x7c8   :  { %v8306_v14 = vadd.f32 %v3613_v46, %v3612_v18  ;;  %v3727_v7 = vsub.f32 1.0, %v3726_v29  ;;  %v3600_v20 = vadd.f32 %v8291_v35, %v3599_v5  ;;  %vm3732_vm8 = vmor %vm3730_vm7, %vm3731_vm12  ;;  %v3737_v37 = vor.u32 1.1754944e-38, %v3736_v19 }
 0x7c9   :  { %v3742_v43 = vsub.f32 1.0, %v3741_v3  ;;  %v3608_v39 = vor.u32 1.1754944e-38, %v3607_v31  ;;  %vm3747_vm9 = vmor %vm3745_vm6, %vm3746_vm14  ;;  %v3752_v30 = vor.u32 1.1754944e-38, %v3751_v28  ;;  %vm3735_vm10 = vcmp.eq.f32.partialorder %v3734_v57, 8.507059e+37 }
 0x7ca   :  { %6306 = vtanh.f32 %v8306_v14  ;;  %v3728_v2 = vmul.f32 %v6299_v62, %v3727_v7  ;;  %v3604_v25 = vsel %vm8316_vm15, %v8291_v35, %v3600_v20  ;;  %vm3750_vm11 = vcmp.eq.f32.partialorder %v3749_v34, 8.507059e+37 }
 0x7cb   :  { %v3743_v0 = vmul.f32 %v6301_v24, %v3742_v43  ;;  %v3609_v35 = vsel %vm8320_vm5, %v3608_v39, %v3604_v25  ;;  %vm3760_vm13 = vweird.f32 %v8296_v45  ;;  %v3764_v57 = vand.u32 2147483647, %v8296_v45 }
 0x7cc   :  { %v6303_v36 = vpop.eup %6302  ;;  %v3729_v41 = vadd.f32 %v6299_v62, %v3728_v2 }
 0x7cd   :  { %v3756_v38 = vmul.f32 %v6303_v36, %v8296_v45  ;;  %v3744_v32 = vadd.f32 %v6301_v24, %v3743_v0  ;;  %v6305_v8 = vpop.eup %6304  ;;  %vm3761_vm12 = vweird.f32 %v6303_v36  ;;  %vm3765_vm15 = vcmp.eq.f32.partialorder %v3764_v57, 8.507059e+37 }
 0x7ce   :  { %v3733_v26 = vsel %vm3732_vm8, %v6299_v62, %v3729_v41  ;;  %v3766_v62 = vand.u32 2147483648, %v8296_v45  ;;  %vm3762_vm14 = vmor %vm3760_vm13, %vm3761_vm12 }
 0x7cf   :  { %v3757_v44 = vsub.f32 1.0, %v3756_v38  ;;  %v3738_v46 = vsel %vm3735_vm10, %v3737_v37, %v3733_v26  ;;  %v3748_v5 = vsel %vm3747_vm9, %v6301_v24, %v3744_v32  ;;  %v8905_v32 = vld [vmem:[#allocation45_spill] sm:$0xff]  ;;  %v3856_v26 = vpop.f32.mrf.mxu3 }
 0x7d0   :  { %v6307_v21 = vpop.eup %6306  ;;  %v3753_v18 = vsel %vm3750_vm11, %v3752_v30, %v3748_v5  ;;  %v3775_v29 = vmul.f32 %v6305_v8, %v3738_v46  ;;  %v3767_v19 = vor.u32 1.1754944e-38, %v3766_v62  ;;  %v3837_v8 = vadd.f32 %v3836_v1, %v8905_v32 }
 0x7d1   :  { %v3758_v15 = vmul.f32 %v6303_v36, %v3757_v44  ;;  %v3774_v3 = vmul.f32 %v3772_v50, %v3753_v18  ;;  %v3616_v7 = vmul.f32 %v6307_v21, %v3609_v35 }
 0x7d3   :  { %v8333_v20 = vadd.f32 %v3775_v29, %v3774_v3  ;;  %v5525_v31 = vrot.slane %v3616_v7, 4  ;;  %v3759_v43 = vadd.f32 %v6303_v36, %v3758_v15  ;;  %v8906_v15 = vld [vmem:[#allocation46_spill] sm:$0xff] }
 0x7d4   :  { %v3857_v3 = vadd.f32 %v3856_v26, %v8906_v15 }
 0x7d5   :  { %6308 = vtanh.f32 %v8333_v20  ;;  %v8339_v24 = vsel %vm276_vm0, %v8127_v16, %v5525_v31  ;;  %v3763_v50 = vsel %vm3762_vm14, %v6303_v36, %v3759_v43  ;;  %v8369_v16 = vld [vmem:[#allocation7 + $0x20] sm:$0x3f]  ;;  %v8904_v36 = vld [vmem:[#allocation44_spill] sm:$0xff] }
 0x7d6   :  { %v3768_v2 = vsel %vm3765_vm15, %v3767_v19, %v3763_v50 }
 0x7db   :  { %v6309_v28 = vpop.eup %6308 }
 0x7dc   :  { %v3778_v0 = vmul.f32 %v6309_v28, %v3768_v2 }
 0x7de   :  { %v8343_v34 = vrot.slane %v3778_v0, 5 }
 0x7e0   :  { %5905 = vmatmul.msk.f32.vlgmr.msra.gmra.mxu0 %vm417_vm3, %v8343_v34  ;;  %5907 = vmatmul.msk.f32.vlgmr.msra.gmra.mxu1 %vm417_vm3, %v8343_v34 }
 0x7e1   :  { %5909 = vmatmul.msk.f32.vlgmr.msra.gmra.mxu2 %vm417_vm3, %v8343_v34  ;;  %5911 = vmatmul.msk.f32.vlgmr.msra.gmra.mxu3 %vm417_vm3, %v8343_v34 }
 0x7e2   :  { %5923 = vmatpush.msk.msra.mxu0 %vm421_vm2, %v8141_v22  ;;  %5925 = vmatpush.msk.msra.mxu1 %vm421_vm2, %v8145_v27  ;;  %v8898_v22 = vld [vmem:[#allocation36_spill] sm:$0xff]  ;;  %v8899_v27 = vld [vmem:[#allocation37_spill] sm:$0xff] }
 0x7e3   :  { %5927 = vmatpush.msk.msra.mxu2 %vm421_vm2, %v8149_v51  ;;  %5929 = vmatpush.msk.msra.mxu3 %vm421_vm2, %v8153_v61  ;;  %v8900_v51 = vld [vmem:[#allocation38_spill] sm:$0xff]  ;;  %v8901_v61 = vld [vmem:[#allocation40_spill] sm:$0xff] }
 0x7e4   :  { %4111 = vmatpush.msra.mxu0 %v8157_v6  ;;  %4131 = vmatpush.msra.mxu1 %v8160_v33  ;;  %v8902_v6 = vld [vmem:[#allocation47_spill] sm:$0xff]  ;;  %v3796_v33 = vpop.f32.mrf.mxu0 }
 0x7e5   :  { %4151 = vmatpush.msra.mxu2 %v8163_v58  ;;  %4171 = vmatpush.msra.mxu3 %v8166_v9  ;;  %v3816_v58 = vpop.f32.mrf.mxu1  ;;  %v8903_v9 = vld [vmem:[#allocation43_spill] sm:$0xff] }
 0x7e6   :  { %v3797_v45 = vadd.f32 %v3796_v33, %v8903_v9 }
 0x7e8   :  { %5916 = vmatmul.msk.f32.vlgmr.msrb.gmra.mxu0 %vm417_vm3, %v3616_v7  ;;  %5918 = vmatmul.msk.f32.vlgmr.msrb.gmra.mxu1 %vm417_vm3, %v3616_v7 }
 0x7e9   :  { %5920 = vmatmul.msk.f32.vlgmr.msrb.gmra.mxu2 %vm417_vm3, %v3616_v7  ;;  %5922 = vmatmul.msk.f32.vlgmr.msrb.gmra.mxu3 %vm417_vm3, %v3616_v7 }
 0x7ea   :  { %5934 = vmatpush.msk.msrb.mxu0 %vm421_vm2, %v8369_v16  ;;  %5936 = vmatpush.msk.msrb.mxu1 %vm421_vm2, %v8175_v11  ;;  %v3817_v11 = vadd.f32 %v3816_v58, %v8904_v36 }
 0x7eb   :  { %5938 = vmatpush.msk.msrb.mxu2 %vm421_vm2, %v8179_v53  ;;  %5940 = vmatpush.msk.msrb.mxu3 %vm421_vm2, %v8898_v22 }
 0x7ec   :  { %4258 = vmatpush.msrb.mxu0 %v8899_v27  ;;  %4278 = vmatpush.msrb.mxu1 %v8900_v51 }
 0x7ed   :  { %4298 = vmatpush.msrb.mxu2 %v8901_v61  ;;  %4318 = vmatpush.msrb.mxu3 %v8902_v6 }
 0x85d   :  { %v3880_v60 = vpop.f32.mrf.mxu0  ;;  %v3900_v53 = vpop.f32.mrf.mxu1 }
 0x85e   :  { %v3943_v41 = vadd.f32 %v3880_v60, %v3797_v45  ;;  %v3944_v25 = vadd.f32 %v3900_v53, %v3817_v11 }
 0x860   :  { %v5912_v38 = vmul.f32 -1.442695, %v3943_v41  ;;  %v5913_v37 = vmul.f32 -1.442695, %v3944_v25 }
 0x862   :  { %6310 = vpow2.f32 %v5912_v38 }
 0x863   :  { %6312 = vpow2.f32 %v5913_v37 }
 0x864   :  { %v3920_v39 = vpop.f32.mrf.mxu2  ;;  %v3940_v29 = vpop.f32.mrf.mxu3 }
 0x865   :  { %v3945_v30 = vadd.f32 %v3920_v39, %v3837_v8  ;;  %v3946_v43 = vadd.f32 %v3940_v29, %v3857_v3 }
 0x867   :  { %v5914_v44 = vmul.f32 -1.442695, %v3945_v30 }
 0x868   :  { %v6311_v46 = vpop.eup %6310 }
 0x869   :  { %v6313_v5 = vpop.eup %6312  ;;  %v3956_v21 = vadd.f32 1.0, %v6311_v46  ;;  %6314 = vpow2.f32 %v5914_v44 }
 0x86a   :  { %v3957_v18 = vadd.f32 1.0, %v6313_v5 }
 0x86b   :  { %6316 = vrcp.f32 %v3956_v21  ;;  %v3970_v2 = vand.u32 2147483648, %v3956_v21  ;;  %v3968_v27 = vand.u32 2147483647, %v3956_v21  ;;  %vm3964_vm6 = vweird.f32 %v3956_v21 }
 0x86c   :  { %6318 = vrcp.f32 %v3957_v18  ;;  %v3985_v0 = vand.u32 2147483648, %v3957_v18  ;;  %v3983_v61 = vand.u32 2147483647, %v3957_v18  ;;  %vm3979_vm7 = vweird.f32 %v3957_v18 }
 0x86d   :  { %v3971_v45 = vor.u32 1.1754944e-38, %v3970_v2  ;;  %vm3969_vm10 = vcmp.eq.f32.partialorder %v3968_v27, 8.507059e+37  ;;  %v8435_v2 = vld [vmem:[#allocation10 + $0x28] sm:$0x3f] }
 0x86e   :  { %v3986_v1 = vor.u32 1.1754944e-38, %v3985_v0  ;;  %vm3984_vm11 = vcmp.eq.f32.partialorder %v3983_v61, 8.507059e+37  ;;  %v8439_v0 = vld [vmem:[#allocation10 + $0x30] sm:$0x3f]  ;;  %v8450_v27 = vld [vmem:[#allocation10 + $0x8] sm:$0xff]  ;;  %v8456_v61 = vld [vmem:[#allocation10 + $0x18] sm:$0xff] }
 0x86f   :  { %v6315_v35 = vpop.eup %6314 }
 0x870   :  { %v3958_v7 = vadd.f32 1.0, %v6315_v35 }
 0x871   :  { %v6317_v31 = vpop.eup %6316 }
 0x872   :  { %v6319_v62 = vpop.eup %6318  ;;  %v3960_v57 = vmul.f32 %v6317_v31, %v3956_v21  ;;  %6320 = vrcp.f32 %v3958_v7  ;;  %vm3965_vm0 = vweird.f32 %v6317_v31  ;;  %v4000_v46 = vand.u32 2147483648, %v3958_v7 }
 0x873   :  { %v3975_v50 = vmul.f32 %v6319_v62, %v3957_v18  ;;  %6322 = vtanh.f32 %v3946_v43  ;;  %vm3980_vm5 = vweird.f32 %v6319_v62  ;;  %vm3966_vm8 = vmor %vm3964_vm6, %vm3965_vm0  ;;  %vm3994_vm13 = vweird.f32 %v3958_v7  ;;  %v8407_v43 = vld [vmem:[#allocation11 + $0x38] sm:$0x3f] }
 0x874   :  { %v3961_v19 = vsub.f32 1.0, %v3960_v57  ;;  %vm3981_vm9 = vmor %vm3979_vm7, %vm3980_vm5  ;;  %v3998_v5 = vand.u32 2147483647, %v3958_v7  ;;  %v4001_v18 = vor.u32 1.1754944e-38, %v4000_v46  ;;  %v8414_v57 = vld [vmem:[#allocation11 + $0x8] sm:$0xff] }
 0x875   :  { %v3976_v28 = vsub.f32 1.0, %v3975_v50  ;;  %v8417_v50 = vld [vmem:[#allocation11 + $0x10] sm:$0xff] }
 0x876   :  { %v3962_v22 = vmul.f32 %v6317_v31, %v3961_v19  ;;  %vm3999_vm15 = vcmp.eq.f32.partialorder %v3998_v5, 8.507059e+37  ;;  %v8420_v19 = vld [vmem:[#allocation11 + $0x18] sm:$0xff] }
 0x877   :  { %v3977_v51 = vmul.f32 %v6319_v62, %v3976_v28  ;;  %v8431_v28 = vld [vmem:[#allocation10 + $0x20] sm:$0x3f] }
 0x878   :  { %v6321_v6 = vpop.eup %6320  ;;  %v3963_v33 = vadd.f32 %v6317_v31, %v3962_v22  ;;  %v8443_v22 = vld [vmem:[#allocation10 + $0x38] sm:$0x3f] }
 0x879   :  { %v3990_v58 = vmul.f32 %v6321_v6, %v3958_v7  ;;  %v3978_v11 = vadd.f32 %v6319_v62, %v3977_v51  ;;  %v6323_v53 = vpop.eup %6322  ;;  %vm3995_vm12 = vweird.f32 %v6321_v6  ;;  %v8399_v7 = vld [vmem:[#allocation11 + $0x28] sm:$0x3f]  ;;  %v8453_v51 = vld [vmem:[#allocation10 + $0x10] sm:$0xff] }
 0x87a   :  { %v3967_v60 = vsel %vm3966_vm8, %v6317_v31, %v3963_v33  ;;  %vm3996_vm14 = vmor %vm3994_vm13, %vm3995_vm12  ;;  %v8403_v31 = vld [vmem:[#allocation11 + $0x30] sm:$0x3f]  ;;  %v4050_v33 = vpop.f32.mrf.mxu1 }
 0x87b   :  { %v3991_v41 = vsub.f32 1.0, %v3990_v58  ;;  %v3972_v25 = vsel %vm3969_vm10, %v3971_v45, %v3967_v60  ;;  %v3982_v38 = vsel %vm3981_vm9, %v6319_v62, %v3978_v11  ;;  %v8411_v62 = vld [vmem:[#allocation11] sm:$0xff]  ;;  %v4070_v58 = vpop.f32.mrf.mxu2 }
 0x87c   :  { %v3987_v37 = vsel %vm3984_vm11, %v3986_v1, %v3982_v38  ;;  %v4006_v8 = vmul.f32 %v6323_v53, %v3972_v25 }
 0x87d   :  { %v3992_v39 = vmul.f32 %v6321_v6, %v3991_v41  ;;  %v4005_v30 = vmul.f32 %v3987_v37, %v8204_v10  ;;  %v8395_v10 = vld [vmem:[#allocation11 + $0x20] sm:$0x3f] }
 0x87f   :  { %v8388_v26 = vadd.f32 %v4006_v8, %v4005_v30  ;;  %v3993_v44 = vadd.f32 %v6321_v6, %v3992_v39 }
 0x881   :  { %6324 = vtanh.f32 %v8388_v26  ;;  %v3997_v21 = vsel %vm3996_vm14, %v6321_v6, %v3993_v44  ;;  %v4030_v6 = vpop.f32.mrf.mxu0 }
 0x882   :  { %v4002_v35 = vsel %vm3999_vm15, %v4001_v18, %v3997_v21 }
 0x887   :  { %v6325_v29 = vpop.eup %6324 }
 0x888   :  { %v4009_v3 = vmul.f32 %v6325_v29, %v4002_v35 }
 0x88a   :  { %5924 = vmatmul.msk.f32.vlgmr.msra.gmra.mxu0 %vm417_vm3, %v4009_v3  ;;  %5926 = vmatmul.msk.f32.vlgmr.msra.gmra.mxu1 %vm417_vm3, %v4009_v3 }
 0x88b   :  { %5928 = vmatmul.msk.f32.vlgmr.msra.gmra.mxu2 %vm417_vm3, %v4009_v3  ;;  %5930 = vmatmul.msk.f32.vlgmr.msra.gmra.mxu3 %vm417_vm3, %v4009_v3 }
 0x88c   :  { %5945 = vmatpush.msk.msra.mxu0 %vm421_vm2, %v8395_v10  ;;  %5947 = vmatpush.msk.msra.mxu1 %vm421_vm2, %v8399_v7 }
 0x88d   :  { %5949 = vmatpush.msk.msra.mxu2 %vm421_vm2, %v8403_v31  ;;  %5951 = vmatpush.msk.msra.mxu3 %vm421_vm2, %v8407_v43 }
 0x88e   :  { %4420 = vmatpush.msra.mxu0 %v8411_v62  ;;  %4440 = vmatpush.msra.mxu1 %v8414_v57 }
 0x88f   :  { %4460 = vmatpush.msra.mxu2 %v8417_v50  ;;  %4480 = vmatpush.msra.mxu3 %v8420_v19 }
 0x892   :  { %5935 = vmatmul.msk.f32.vlgmr.msrb.gmra.mxu0 %vm417_vm3, %v8343_v34  ;;  %5937 = vmatmul.msk.f32.vlgmr.msrb.gmra.mxu1 %vm417_vm3, %v8343_v34 }
 0x893   :  { %5939 = vmatmul.msk.f32.vlgmr.msrb.gmra.mxu2 %vm417_vm3, %v8343_v34  ;;  %5941 = vmatmul.msk.f32.vlgmr.msrb.gmra.mxu3 %vm417_vm3, %v8343_v34  ;;  %v8447_v34 = vld [vmem:[#allocation10] sm:$0xff] }
 0x894   :  { %5953 = vmatpush.msk.msrb.mxu0 %vm421_vm2, %v8431_v28  ;;  %5955 = vmatpush.msk.msrb.mxu1 %vm421_vm2, %v8435_v2 }
 0x895   :  { %5957 = vmatpush.msk.msrb.mxu2 %vm421_vm2, %v8439_v0  ;;  %5959 = vmatpush.msk.msrb.mxu3 %vm421_vm2, %v8443_v22 }
 0x896   :  { %4504 = vmatpush.msrb.mxu0 %v8447_v34  ;;  %4524 = vmatpush.msrb.mxu1 %v8450_v27 }
 0x897   :  { %4544 = vmatpush.msrb.mxu2 %v8453_v51  ;;  %4564 = vmatpush.msrb.mxu3 %v8456_v61 }
 0x89a   :  { %5946 = vmatmul.msk.f32.vlgmr.msra.gmra.mxu0 %vm417_vm3, %v4009_v3  ;;  %5948 = vmatmul.msk.f32.vlgmr.msra.gmra.mxu1 %vm417_vm3, %v4009_v3 }
 0x89b   :  { %5950 = vmatmul.msk.f32.vlgmr.msra.gmra.mxu2 %vm417_vm3, %v4009_v3  ;;  %5952 = vmatmul.msk.f32.vlgmr.msra.gmra.mxu3 %vm417_vm3, %v4009_v3 }
 0x89c   :  { %5964 = vmatpush.msk.msra.mxu0 %vm421_vm2, %v8247_v54  ;;  %5966 = vmatpush.msk.msra.mxu1 %vm421_vm2, %v8251_v48  ;;  %v4031_v54 = vadd.f32 %v4030_v6, %v7379_v55  ;;  %v4051_v48 = vadd.f32 %v4050_v33, %v7381_v56 }
 0x89d   :  { %5968 = vmatpush.msk.msra.mxu2 %vm421_vm2, %v8255_v17  ;;  %5970 = vmatpush.msk.msra.mxu3 %vm421_vm2, %v8259_v4 }
 0x89e   :  { %4654 = vmatpush.msra.mxu0 %v8263_v13  ;;  %4674 = vmatpush.msra.mxu1 %v8266_v42  ;;  %v4090_v13 = vpop.f32.mrf.mxu3  ;;  %v4071_v42 = vadd.f32 %v4070_v58, %v7385_v12 }
 0x89f   :  { %4694 = vmatpush.msra.mxu2 %v8269_v63  ;;  %4714 = vmatpush.msra.mxu3 %v8272_v40  ;;  %v4091_v3 = vadd.f32 %v4090_v13, %v8873_v52 }
 0x907   :  { %v4113_v45 = vpop.f32.mrf.mxu0  ;;  %v4133_v17 = vpop.f32.mrf.mxu1 }
 0x908   :  { %v4176_v11 = vadd.f32 %v4113_v45, %v4031_v54  ;;  %v4177_v1 = vadd.f32 %v4133_v17, %v4051_v48 }
 0x90a   :  { %v5931_v4 = vmul.f32 -1.442695, %v4176_v11  ;;  %v5932_v60 = vmul.f32 -1.442695, %v4177_v1 }
 0x90c   :  { %6326 = vpow2.f32 %v5931_v4 }
 0x90d   :  { %6328 = vpow2.f32 %v5932_v60 }
 0x90e   :  { %v4153_v63 = vpop.f32.mrf.mxu2  ;;  %v4173_v5 = vpop.f32.mrf.mxu3 }
 0x90f   :  { %v4178_v40 = vadd.f32 %v4153_v63, %v4071_v42  ;;  %v4260_v53 = vpop.f32.mrf.mxu0  ;;  %v4280_v41 = vpop.f32.mrf.mxu1  ;;  %v4179_v54 = vadd.f32 %v4173_v5, %v4091_v3 }
 0x910   :  { %v4327_v25 = vrot.slane %v4260_v53, 2  ;;  %v4328_v38 = vrot.slane %v4280_v41, 2 }
 0x911   :  { %v5933_v37 = vmul.f32 -1.442695, %v4178_v40 }
 0x912   :  { %v6327_v8 = vpop.eup %6326  ;;  %v4335_v39 = vadd.f32 %v4327_v25, %v7141_v47  ;;  %v4336_v30 = vadd.f32 %v4328_v38, %v7143_v49 }
 0x913   :  { %v6329_v44 = vpop.eup %6328  ;;  %v4189_v46 = vadd.f32 1.0, %v6327_v8  ;;  %6330 = vpow2.f32 %v5933_v37 }
 0x914   :  { %v4190_v21 = vadd.f32 1.0, %v6329_v44  ;;  %v5942_v18 = vmul.f32 -1.442695, %v4335_v39  ;;  %v5943_v29 = vmul.f32 -1.442695, %v4336_v30 }
 0x915   :  { %6332 = vrcp.f32 %v4189_v46  ;;  %v4201_v42 = vand.u32 2147483647, %v4189_v46  ;;  %v4203_v53 = vand.u32 2147483648, %v4189_v46  ;;  %vm4197_vm7 = vweird.f32 %v4189_v46 }
 0x916   :  { %6334 = vrcp.f32 %v4190_v21  ;;  %v4300_v35 = vpop.f32.mrf.mxu2  ;;  %v4320_v13 = vpop.f32.mrf.mxu3  ;;  %v4218_v38 = vand.u32 2147483648, %v4190_v21  ;;  %v4216_v37 = vand.u32 2147483647, %v4190_v21  ;;  %vm4212_vm6 = vweird.f32 %v4190_v21 }
 0x917   :  { %6336 = vpow2.f32 %v5942_v18  ;;  %v4329_v6 = vrot.slane %v4300_v35, 2  ;;  %v4330_v30 = vrot.slane %v4320_v13, 2  ;;  %vm4202_vm9 = vcmp.eq.f32.partialorder %v4201_v42, 8.507059e+37 }
 0x918   :  { %6338 = vpow2.f32 %v5943_v29  ;;  %v4204_v3 = vor.u32 1.1754944e-38, %v4203_v53  ;;  %vm4217_vm11 = vcmp.eq.f32.partialorder %v4216_v37, 8.507059e+37 }
 0x919   :  { %v6331_v33 = vpop.eup %6330  ;;  %v4337_v48 = vadd.f32 %v4329_v6, %v8874_v59 }
 0x91a   :  { %v8482_v58 = vadd.f32 1.0, %v6331_v33 }
 0x91b   :  { %v6333_v45 = vpop.eup %6332  ;;  %v5944_v17 = vmul.f32 -1.442695, %v4337_v48 }
 0x91c   :  { %v6335_v11 = vpop.eup %6334  ;;  %v4193_v1 = vmul.f32 %v6333_v45, %v4189_v46  ;;  %6340 = vrcp.f32 %v8482_v58  ;;  %vm4198_vm0 = vweird.f32 %v6333_v45  ;;  %vm4227_vm14 = vweird.f32 %v8482_v58 }
 0x91d   :  { %v6337_v4 = vpop.eup %6336  ;;  %v4208_v60 = vmul.f32 %v6335_v11, %v4190_v21  ;;  %6342 = vtanh.f32 %v4179_v54  ;;  %vm4213_vm5 = vweird.f32 %v6335_v11  ;;  %vm4199_vm8 = vmor %vm4197_vm7, %vm4198_vm0  ;;  %v4219_v54 = vor.u32 1.1754944e-38, %v4218_v38 }
 0x91e   :  { %v6339_v63 = vpop.eup %6338  ;;  %v4194_v40 = vsub.f32 1.0, %v4193_v1  ;;  %v8485_v41 = vadd.f32 1.0, %v6337_v4  ;;  %6344 = vpow2.f32 %v5944_v17  ;;  %vm4214_vm10 = vmor %vm4212_vm6, %vm4213_vm5  ;;  %v4338_v17 = vadd.f32 %v4330_v30, %v8875_v23 }
 0x91f   :  { %v4209_v25 = vsub.f32 1.0, %v4208_v60  ;;  %v8487_v8 = vadd.f32 1.0, %v6339_v63  ;;  %v4231_v38 = vand.u32 2147483647, %v8482_v58 }
 0x920   :  { %v4195_v39 = vmul.f32 %v6333_v45, %v4194_v40  ;;  %6346 = vrcp.f32 %v8485_v41  ;;  %vm4356_vm7 = vweird.f32 %v8485_v41 }
 0x921   :  { %v4210_v44 = vmul.f32 %v6335_v11, %v4209_v25  ;;  %6348 = vrcp.f32 %v8487_v8  ;;  %vm8520_vm5 = vcmp.eq.f32.partialorder %v4231_v38, 8.507059e+37  ;;  %vm4371_vm6 = vweird.f32 %v8487_v8 }
 0x922   :  { %v8491_v5 = vpop.eup %6340  ;;  %v4196_v18 = vadd.f32 %v6333_v45, %v4195_v39 }
 0x923   :  { %v6343_v29 = vpop.eup %6342  ;;  %v4223_v35 = vmul.f32 %v8491_v5, %v8482_v58  ;;  %v4211_v6 = vadd.f32 %v6335_v11, %v4210_v44  ;;  %v4360_v44 = vand.u32 2147483647, %v8485_v41  ;;  %vm4228_vm12 = vweird.f32 %v8491_v5 }
 0x924   :  { %v6345_v33 = vpop.eup %6344  ;;  %v4200_v48 = vsel %vm4199_vm8, %v6333_v45, %v4196_v18  ;;  %v4398_v45 = vrot.slane %v8333_v20, 7  ;;  %v4377_v20 = vand.u32 2147483648, %v8487_v8  ;;  %vm8516_vm0 = vmor %vm4227_vm14, %vm4228_vm12  ;;  %vm5538_vm12 = vcmask 1044480  }
 0x925   :  { %v4224_v1 = vsub.f32 1.0, %v4223_v35  ;;  %v4205_v4 = vsel %vm4202_vm9, %v4204_v3, %v4200_v48  ;;  %v4215_v21 = vsel %vm4214_vm10, %v6335_v11, %v4211_v6  ;;  %v8496_v60 = vadd.f32 1.0, %v6345_v33 }
 0x926   :  { %v6347_v46 = vpop.eup %6346  ;;  %v4220_v13 = vsel %vm4217_vm11, %v4219_v54, %v4215_v21  ;;  %v4239_v63 = vmul.f32 %v6343_v29, %v4205_v4  ;;  %v4233_v11 = vand.u32 2147483648, %v8482_v58  ;;  %v4362_v29 = vand.u32 2147483648, %v8485_v41 }
 0x927   :  { %v6349_v40 = vpop.eup %6348  ;;  %v4225_v42 = vmul.f32 %v8491_v5, %v4224_v1  ;;  %v4238_v53 = vmul.f32 %v4220_v13, %v8306_v14  ;;  %v4352_v25 = vmul.f32 %v6347_v46, %v8485_v41  ;;  %6350 = vrcp.f32 %v8496_v60 }
 0x928   :  { %v4367_v37 = vmul.f32 %v6349_v40, %v8487_v8  ;;  %6352 = vtanh.f32 %v4338_v17  ;;  %vm4357_vm13 = vweird.f32 %v6347_v46  ;;  %vm4372_vm15 = vweird.f32 %v6349_v40 }
 0x929   :  { %v8506_v39 = vadd.f32 %v4239_v63, %v4238_v53  ;;  %v4353_v30 = vsub.f32 1.0, %v4352_v25  ;;  %v4226_v14 = vadd.f32 %v8491_v5, %v4225_v42  ;;  %v4375_v6 = vand.u32 2147483647, %v8487_v8  ;;  %vm4358_vm8 = vmor %vm4356_vm7, %vm4357_vm13 }
 0x92a   :  { %v4368_v18 = vsub.f32 1.0, %v4367_v37  ;;  %v4363_v4 = vor.u32 1.1754944e-38, %v4362_v29  ;;  %v4234_v63 = vor.u32 1.1754944e-38, %v4233_v11  ;;  %vm4373_vm9 = vmor %vm4371_vm6, %vm4372_vm15  ;;  %v4378_v42 = vor.u32 1.1754944e-38, %v4377_v20 }
 0x92b   :  { %6354 = vtanh.f32 %v8506_v39  ;;  %v4354_v35 = vmul.f32 %v6347_v46, %v4353_v30  ;;  %v4230_v58 = vsel %vm8516_vm0, %v8491_v5, %v4226_v14  ;;  %vm4361_vm10 = vcmp.eq.f32.partialorder %v4360_v44, 8.507059e+37 }
 0x92c   :  { %v4369_v3 = vmul.f32 %v6349_v40, %v4368_v18  ;;  %vm4376_vm11 = vcmp.eq.f32.partialorder %v4375_v6, 8.507059e+37  ;;  %v4235_v5 = vsel %vm8520_vm5, %v4234_v63, %v4230_v58  ;;  %vm4386_vm14 = vweird.f32 %v8496_v60  ;;  %v8564_v58 = vld [vmem:[#allocation14 + $0x38] sm:$0x3f]  ;;  %v6543_v63 = vld [vmem:[#allocation7 + $0x28] sm:$0x3f] }
 0x92d   :  { %v6351_v33 = vpop.eup %6350  ;;  %v4355_v17 = vadd.f32 %v6347_v46, %v4354_v35  ;;  %v4390_v44 = vand.u32 2147483647, %v8496_v60 }
 0x92e   :  { %v4382_v1 = vmul.f32 %v6351_v33, %v8496_v60  ;;  %v4370_v21 = vadd.f32 %v6349_v40, %v4369_v3  ;;  %v6353_v13 = vpop.eup %6352  ;;  %vm4387_vm13 = vweird.f32 %v6351_v33 }
 0x92f   :  { %v4359_v53 = vsel %vm4358_vm8, %v6347_v46, %v4355_v17  ;;  %v4392_v46 = vand.u32 2147483648, %v8496_v60  ;;  %vm4388_vm15 = vmor %vm4386_vm14, %vm4387_vm13  ;;  %vm4391_vm0 = vcmp.eq.f32.partialorder %v4390_v44, 8.507059e+37  ;;  %v8556_v60 = vld [vmem:[#allocation14 + $0x28] sm:$0x3f] }
 0x930   :  { %v4383_v8 = vsub.f32 1.0, %v4382_v1  ;;  %v4364_v25 = vsel %vm4361_vm10, %v4363_v4, %v4359_v53  ;;  %v4374_v38 = vsel %vm4373_vm9, %v6349_v40, %v4370_v21  ;;  %v8568_v1 = vld [vmem:[#allocation14] sm:$0xff]  ;;  %v8571_v4 = vld [vmem:[#allocation14 + $0x8] sm:$0xff]  ;;  %v8574_v21 = vld [vmem:[#allocation14 + $0x10] sm:$0xff] }
 0x931   :  { %v6355_v41 = vpop.eup %6354  ;;  %v4379_v37 = vsel %vm4376_vm11, %v4378_v42, %v4374_v38  ;;  %v4401_v30 = vmul.f32 %v6353_v13, %v4364_v25  ;;  %v4393_v3 = vor.u32 1.1754944e-38, %v4392_v46  ;;  %v8577_v13 = vld [vmem:[#allocation14 + $0x18] sm:$0xff]  ;;  %v6544_v42 = vld [vmem:[#allocation7 + $0x30] sm:$0x3f]  ;;  %v6545_v53 = vld [vmem:[#allocation7 + $0x38] sm:$0x3f] }
 0x932   :  { %v4384_v14 = vmul.f32 %v6351_v33, %v4383_v8  ;;  %v4400_v18 = vmul.f32 %v4398_v45, %v4379_v37  ;;  %v4242_v29 = vmul.f32 %v6355_v41, %v4235_v5  ;;  %v6546_v8 = vld [vmem:[#allocation7] sm:$0xff]  ;;  %v6547_v25 = vld [vmem:[#allocation7 + $0x8] sm:$0xff]  ;;  %v6548_v38 = vld [vmem:[#allocation7 + $0x10] sm:$0xff]  ;;  %v4422_v37 = vpop.f32.mrf.mxu0 }
 0x933   :  { %v6549_v41 = vld [vmem:[#allocation7 + $0x18] sm:$0xff] }
 0x934   :  { %v8533_v11 = vadd.f32 %v4401_v30, %v4400_v18  ;;  %v5527_v35 = vrot.slane %v4242_v29, 3  ;;  %v4385_v20 = vadd.f32 %v6351_v33, %v4384_v14  ;;  %v4442_v30 = vpop.f32.mrf.mxu1  ;;  %v4462_v14 = vpop.f32.mrf.mxu2 }
 0x935   :  { %v4443_v5 = vadd.f32 %v4442_v30, %v8904_v36 }
 0x936   :  { %6356 = vtanh.f32 %v8533_v11  ;;  %v8538_v40 = vsel %vm5538_vm12, %v8339_v24, %v5527_v35  ;;  %v4389_v45 = vsel %vm4388_vm15, %v6351_v33, %v4385_v20  ;;  %v8552_v24 = vld [vmem:[#allocation14 + $0x20] sm:$0x3f]  ;;  %v8560_v33 = vld [vmem:[#allocation14 + $0x30] sm:$0x3f] }
 0x937   :  { %v4394_v54 = vsel %vm4391_vm0, %v4393_v3, %v4389_v45  ;;  %v4463_v45 = vadd.f32 %v4462_v14, %v8905_v32 }
 0x93c   :  { %v6357_v6 = vpop.eup %6356 }
 0x93d   :  { %v4404_v48 = vmul.f32 %v6357_v6, %v4394_v54  ;;  %v4482_v54 = vpop.f32.mrf.mxu3 }
 0x93f   :  { %v8542_v17 = vrot.slane %v4404_v48, 6 }
 0x941   :  { %5954 = vmatmul.msk.f32.vlgmr.msrb.gmra.mxu0 %vm417_vm3, %v8542_v17  ;;  %5956 = vmatmul.msk.f32.vlgmr.msrb.gmra.mxu1 %vm417_vm3, %v8542_v17 }
 0x942   :  { %5958 = vmatmul.msk.f32.vlgmr.msrb.gmra.mxu2 %vm417_vm3, %v8542_v17  ;;  %5960 = vmatmul.msk.f32.vlgmr.msrb.gmra.mxu3 %vm417_vm3, %v8542_v17 }
 0x943   :  { %5972 = vmatpush.msk.msrb.mxu0 %vm421_vm2, %v8552_v24  ;;  %5974 = vmatpush.msk.msrb.mxu1 %vm421_vm2, %v8556_v60 }
 0x944   :  { %5976 = vmatpush.msk.msrb.mxu2 %vm421_vm2, %v8560_v33  ;;  %5978 = vmatpush.msk.msrb.mxu3 %vm421_vm2, %v8564_v58 }
 0x945   :  { %4737 = vmatpush.msrb.mxu0 %v8568_v1  ;;  %4757 = vmatpush.msrb.mxu1 %v8571_v4 }
 0x946   :  { %4777 = vmatpush.msrb.mxu2 %v8574_v21  ;;  %4797 = vmatpush.msrb.mxu3 %v8577_v13 }
 0x949   :  { %5965 = vmatmul.msk.f32.vlgmr.msra.gmra.mxu0 %vm417_vm3, %v4242_v29  ;;  %5967 = vmatmul.msk.f32.vlgmr.msra.gmra.mxu1 %vm417_vm3, %v4242_v29 }
 0x94a   :  { %5969 = vmatmul.msk.f32.vlgmr.msra.gmra.mxu2 %vm417_vm3, %v4242_v29  ;;  %5971 = vmatmul.msk.f32.vlgmr.msra.gmra.mxu3 %vm417_vm3, %v4242_v29 }
 0x94b   :  { %5983 = vmatpush.msk.msra.mxu0 %vm421_vm2, %v8369_v16  ;;  %5985 = vmatpush.msk.msra.mxu1 %vm421_vm2, %v6543_v63  ;;  %v4423_v16 = vadd.f32 %v4422_v37, %v8903_v9 }
 0x94c   :  { %5987 = vmatpush.msk.msra.mxu2 %vm421_vm2, %v6544_v42  ;;  %5989 = vmatpush.msk.msra.mxu3 %vm421_vm2, %v6545_v53 }
 0x94d   :  { %4884 = vmatpush.msra.mxu0 %v6546_v8  ;;  %4904 = vmatpush.msra.mxu1 %v6547_v25 }
 0x94e   :  { %4924 = vmatpush.msra.mxu2 %v6548_v38  ;;  %4944 = vmatpush.msra.mxu3 %v6549_v41  ;;  %v4483_v41 = vadd.f32 %v4482_v54, %v8906_v15 }
 0x9be   :  { %v4506_v18 = vpop.f32.mrf.mxu0  ;;  %v4526_v29 = vpop.f32.mrf.mxu1 }
 0x9bf   :  { %v4569_v35 = vadd.f32 %v4506_v18, %v4423_v16  ;;  %v4570_v20 = vadd.f32 %v4526_v29, %v4443_v5 }
 0x9c1   :  { %v5961_v46 = vmul.f32 -1.442695, %v4569_v35  ;;  %v5962_v44 = vmul.f32 -1.442695, %v4570_v20 }
 0x9c3   :  { %6358 = vpow2.f32 %v5961_v46 }
 0x9c4   :  { %6360 = vpow2.f32 %v5962_v44 }
 0x9c5   :  { %v4546_v3 = vpop.f32.mrf.mxu2  ;;  %v4566_v25 = vpop.f32.mrf.mxu3 }
 0x9c6   :  { %v4571_v6 = vadd.f32 %v4546_v3, %v4463_v45  ;;  %v4572_v16 = vadd.f32 %v4566_v25, %v4483_v41 }
 0x9c8   :  { %v5963_v48 = vmul.f32 -1.442695, %v4571_v6 }
 0x9c9   :  { %v6359_v63 = vpop.eup %6358 }
 0x9ca   :  { %v6361_v42 = vpop.eup %6360  ;;  %v4582_v53 = vadd.f32 1.0, %v6359_v63  ;;  %6362 = vpow2.f32 %v5963_v48 }
 0x9cb   :  { %v4583_v8 = vadd.f32 1.0, %v6361_v42 }
 0x9cc   :  { %6364 = vrcp.f32 %v4582_v53  ;;  %v4596_v20 = vand.u32 2147483648, %v4582_v53  ;;  %v4594_v45 = vand.u32 2147483647, %v4582_v53  ;;  %vm4590_vm7 = vweird.f32 %v4582_v53 }
 0x9cd   :  { %6366 = vrcp.f32 %v4583_v8  ;;  %v4611_v46 = vand.u32 2147483648, %v4583_v8  ;;  %v4609_v6 = vand.u32 2147483647, %v4583_v8  ;;  %vm4605_vm8 = vweird.f32 %v4583_v8 }
 0x9ce   :  { %v4597_v42 = vor.u32 1.1754944e-38, %v4596_v20  ;;  %vm4595_vm11 = vcmp.eq.f32.partialorder %v4594_v45, 8.507059e+37 }
 0x9cf   :  { %vm4610_vm12 = vcmp.eq.f32.partialorder %v4609_v6, 8.507059e+37 }
 0x9d0   :  { %v6363_v38 = vpop.eup %6362 }
 0x9d1   :  { %v4584_v37 = vadd.f32 1.0, %v6363_v38  ;;  %v4612_v38 = vor.u32 1.1754944e-38, %v4611_v46 }
 0x9d2   :  { %v6365_v30 = vpop.eup %6364 }
 0x9d3   :  { %v6367_v5 = vpop.eup %6366  ;;  %v4586_v14 = vmul.f32 %v6365_v30, %v4582_v53  ;;  %6368 = vrcp.f32 %v4584_v37  ;;  %vm4591_vm5 = vweird.f32 %v6365_v30  ;;  %v4626_v20 = vand.u32 2147483648, %v4584_v37 }
 0x9d4   :  { %v4601_v18 = vmul.f32 %v6367_v5, %v4583_v8  ;;  %6370 = vtanh.f32 %v4572_v16  ;;  %vm4606_vm6 = vweird.f32 %v6367_v5  ;;  %vm4592_vm9 = vmor %vm4590_vm7, %vm4591_vm5  ;;  %vm4620_vm14 = vweird.f32 %v4584_v37 }
 0x9d5   :  { %v4587_v29 = vsub.f32 1.0, %v4586_v14  ;;  %vm4607_vm10 = vmor %vm4605_vm8, %vm4606_vm6  ;;  %v4627_v45 = vor.u32 1.1754944e-38, %v4626_v20 }
 0x9d6   :  { %v4602_v35 = vsub.f32 1.0, %v4601_v18 }
 0x9d7   :  { %v4588_v44 = vmul.f32 %v6365_v30, %v4587_v29 }
 0x9d8   :  { %v4603_v3 = vmul.f32 %v6367_v5, %v4602_v35 }
 0x9d9   :  { %v6369_v48 = vpop.eup %6368  ;;  %v4589_v54 = vadd.f32 %v6365_v30, %v4588_v44 }
 0x9da   :  { %v4616_v63 = vmul.f32 %v6369_v48, %v4584_v37  ;;  %v4604_v25 = vadd.f32 %v6367_v5, %v4603_v3  ;;  %v6371_v16 = vpop.eup %6370  ;;  %vm4621_vm13 = vweird.f32 %v6369_v48 }
 0x9db   :  { %v4593_v41 = vsel %vm4592_vm9, %v6365_v30, %v4589_v54  ;;  %v4624_v30 = vand.u32 2147483647, %v4584_v37  ;;  %vm4622_vm15 = vmor %vm4620_vm14, %vm4621_vm13 }
 0x9dc   :  { %v4617_v14 = vsub.f32 1.0, %v4616_v63  ;;  %v4598_v18 = vsel %vm4595_vm11, %v4597_v42, %v4593_v41  ;;  %v4608_v29 = vsel %vm4607_vm10, %v6367_v5, %v4604_v25 }
 0x9dd   :  { %v4613_v35 = vsel %vm4610_vm12, %v4612_v38, %v4608_v29  ;;  %v4632_v15 = vmul.f32 %v6371_v16, %v4598_v18  ;;  %vm4625_vm0 = vcmp.eq.f32.partialorder %v4624_v30, 8.507059e+37 }
 0x9de   :  { %v4618_v32 = vmul.f32 %v6369_v48, %v4617_v14  ;;  %v4631_v44 = vmul.f32 %v4613_v35, %v8388_v26  ;;  %v6552_v26 = vld [vmem:[#allocation16 + $0x30] sm:$0x3f] }
 0x9e0   :  { %v8594_v53 = vadd.f32 %v4632_v15, %v4631_v44  ;;  %v4619_v8 = vadd.f32 %v6369_v48, %v4618_v32  ;;  %v6550_v32 = vld [vmem:[#allocation16 + $0x20] sm:$0x3f]  ;;  %v6551_v15 = vld [vmem:[#allocation16 + $0x28] sm:$0x3f] }
 0x9e2   :  { %6372 = vtanh.f32 %v8594_v53  ;;  %v4623_v46 = vsel %vm4622_vm15, %v6369_v48, %v4619_v8 }
 0x9e3   :  { %v4628_v3 = vsel %vm4625_vm0, %v4627_v45, %v4623_v46 }
 0x9e8   :  { %v6373_v5 = vpop.eup %6372 }
 0x9e9   :  { %v4635_v6 = vmul.f32 %v6373_v5, %v4628_v3 }
 0x9eb   :  { %5973 = vmatmul.msk.f32.vlgmr.msrb.gmra.mxu0 %vm417_vm3, %v4635_v6  ;;  %5975 = vmatmul.msk.f32.vlgmr.msrb.gmra.mxu1 %vm417_vm3, %v4635_v6 }
 0x9ec   :  { %5977 = vmatmul.msk.f32.vlgmr.msrb.gmra.mxu2 %vm417_vm3, %v4635_v6  ;;  %5979 = vmatmul.msk.f32.vlgmr.msrb.gmra.mxu3 %vm417_vm3, %v4635_v6 }
 0x9ed   :  { %5994 = vmatpush.msk.msrb.mxu0 %vm421_vm2, %v8395_v10  ;;  %5996 = vmatpush.msk.msrb.mxu1 %vm421_vm2, %v8399_v7  ;;  %v6553_v10 = vld [vmem:[#allocation16 + $0x38] sm:$0x3f]  ;;  %v6554_v7 = vld [vmem:[#allocation16] sm:$0xff] }
 0x9ee   :  { %5998 = vmatpush.msk.msrb.mxu2 %vm421_vm2, %v8403_v31  ;;  %6000 = vmatpush.msk.msrb.mxu3 %vm421_vm2, %v8407_v43  ;;  %v6555_v31 = vld [vmem:[#allocation16 + $0x8] sm:$0xff]  ;;  %v6556_v43 = vld [vmem:[#allocation16 + $0x10] sm:$0xff] }
 0x9ef   :  { %5046 = vmatpush.msrb.mxu0 %v8411_v62  ;;  %5066 = vmatpush.msrb.mxu1 %v8414_v57  ;;  %v6557_v62 = vld [vmem:[#allocation16 + $0x18] sm:$0xff]  ;;  %v4656_v57 = vpop.f32.mrf.mxu0 }
 0x9f0   :  { %5086 = vmatpush.msrb.mxu2 %v8417_v50  ;;  %5106 = vmatpush.msrb.mxu3 %v8420_v19  ;;  %v4676_v50 = vpop.f32.mrf.mxu1  ;;  %v4657_v19 = vadd.f32 %v4656_v57, %v7379_v55 }
 0x9f3   :  { %5984 = vmatmul.msk.f32.vlgmr.msra.gmra.mxu0 %vm417_vm3, %v8542_v17  ;;  %5986 = vmatmul.msk.f32.vlgmr.msra.gmra.mxu1 %vm417_vm3, %v8542_v17 }
 0x9f4   :  { %5988 = vmatmul.msk.f32.vlgmr.msra.gmra.mxu2 %vm417_vm3, %v8542_v17  ;;  %5990 = vmatmul.msk.f32.vlgmr.msra.gmra.mxu3 %vm417_vm3, %v8542_v17  ;;  %v4716_v17 = vpop.f32.mrf.mxu3 }
 0x9f5   :  { %6002 = vmatpush.msk.msra.mxu0 %vm421_vm2, %v8431_v28  ;;  %6004 = vmatpush.msk.msra.mxu1 %vm421_vm2, %v8435_v2  ;;  %v4677_v28 = vadd.f32 %v4676_v50, %v7381_v56  ;;  %v4696_v2 = vpop.f32.mrf.mxu2  ;;  %v4717_v45 = vadd.f32 %v4716_v17, %v8873_v52 }
 0x9f6   :  { %6006 = vmatpush.msk.msra.mxu2 %vm421_vm2, %v8439_v0  ;;  %6008 = vmatpush.msk.msra.mxu3 %vm421_vm2, %v8443_v22  ;;  %v4697_v37 = vadd.f32 %v4696_v2, %v7385_v12 }
 0x9f7   :  { %5130 = vmatpush.msra.mxu0 %v8447_v34  ;;  %5150 = vmatpush.msra.mxu1 %v8450_v27 }
 0x9f8   :  { %5170 = vmatpush.msra.mxu2 %v8453_v51  ;;  %5190 = vmatpush.msra.mxu3 %v8456_v61 }
 0x9fb   :  { %5995 = vmatmul.msk.f32.vlgmr.msrb.gmra.mxu0 %vm417_vm3, %v4635_v6  ;;  %5997 = vmatmul.msk.f32.vlgmr.msrb.gmra.mxu1 %vm417_vm3, %v4635_v6 }
 0x9fc   :  { %5999 = vmatmul.msk.f32.vlgmr.msrb.gmra.mxu2 %vm417_vm3, %v4635_v6  ;;  %6001 = vmatmul.msk.f32.vlgmr.msrb.gmra.mxu3 %vm417_vm3, %v4635_v6 }
 0x9fd   :  { %6013 = vmatpush.msk.msrb.mxu0 %vm421_vm2, %v6550_v32  ;;  %6015 = vmatpush.msk.msrb.mxu1 %vm421_vm2, %v6551_v15 }
 0x9fe   :  { %6017 = vmatpush.msk.msrb.mxu2 %vm421_vm2, %v6552_v26  ;;  %6019 = vmatpush.msk.msrb.mxu3 %vm421_vm2, %v6553_v10 }
 0x9ff   :  { %5280 = vmatpush.msrb.mxu0 %v6554_v7  ;;  %5300 = vmatpush.msrb.mxu1 %v6555_v31 }
 0xa00   :  { %5320 = vmatpush.msrb.mxu2 %v6556_v43  ;;  %5340 = vmatpush.msrb.mxu3 %v6557_v62 }
 0xa68   :  { %v4739_v0 = vpop.f32.mrf.mxu0  ;;  %v4759_v22 = vpop.f32.mrf.mxu1 }
 0xa69   :  { %v4802_v34 = vadd.f32 %v4739_v0, %v4657_v19  ;;  %v4803_v27 = vadd.f32 %v4759_v22, %v4677_v28 }
 0xa6b   :  { %v5980_v51 = vmul.f32 -1.442695, %v4802_v34  ;;  %v5981_v61 = vmul.f32 -1.442695, %v4803_v27 }
 0xa6d   :  { %6374 = vpow2.f32 %v5980_v51 }
 0xa6e   :  { %6376 = vpow2.f32 %v5981_v61 }
 0xa6f   :  { %v4779_v48 = vpop.f32.mrf.mxu2  ;;  %v4799_v44 = vpop.f32.mrf.mxu3 }
 0xa70   :  { %v4804_v54 = vadd.f32 %v4779_v48, %v4697_v37  ;;  %v4886_v63 = vpop.f32.mrf.mxu0  ;;  %v4906_v42 = vpop.f32.mrf.mxu1  ;;  %v4805_v6 = vadd.f32 %v4799_v44, %v4717_v45 }
 0xa71   :  { %v4953_v25 = vrot.slane %v4886_v63, 1  ;;  %v4954_v38 = vrot.slane %v4906_v42, 1 }
 0xa72   :  { %v5982_v41 = vmul.f32 -1.442695, %v4804_v54 }
 0xa73   :  { %v6375_v16 = vpop.eup %6374  ;;  %v4961_v14 = vadd.f32 %v4953_v25, %v7141_v47  ;;  %v4962_v18 = vadd.f32 %v4954_v38, %v7143_v49 }
 0xa74   :  { %v6377_v29 = vpop.eup %6376  ;;  %v4815_v35 = vadd.f32 1.0, %v6375_v16  ;;  %6378 = vpow2.f32 %v5982_v41 }
 0xa75   :  { %v4816_v8 = vadd.f32 1.0, %v6377_v29  ;;  %v5991_v20 = vmul.f32 -1.442695, %v4961_v14  ;;  %v5992_v30 = vmul.f32 -1.442695, %v4962_v18 }
 0xa76   :  { %6380 = vrcp.f32 %v4815_v35  ;;  %v4827_v43 = vand.u32 2147483647, %v4815_v35  ;;  %v4829_v19 = vand.u32 2147483648, %v4815_v35  ;;  %vm4823_vm8 = vweird.f32 %v4815_v35 }
 0xa77   :  { %6382 = vrcp.f32 %v4816_v8  ;;  %v4926_v46 = vpop.f32.mrf.mxu2  ;;  %v4946_v62 = vpop.f32.mrf.mxu3  ;;  %v4844_v2 = vand.u32 2147483648, %v4816_v8  ;;  %v4842_v0 = vand.u32 2147483647, %v4816_v8  ;;  %vm4838_vm7 = vweird.f32 %v4816_v8 }
 0xa78   :  { %6384 = vpow2.f32 %v5991_v20  ;;  %v4955_v5 = vrot.slane %v4926_v46, 1  ;;  %v4956_v27 = vrot.slane %v4946_v62, 1  ;;  %vm4828_vm10 = vcmp.eq.f32.partialorder %v4827_v43, 8.507059e+37 }
 0xa79   :  { %6386 = vpow2.f32 %v5992_v30  ;;  %v4830_v54 = vor.u32 1.1754944e-38, %v4829_v19  ;;  %v4845_v25 = vor.u32 1.1754944e-38, %v4844_v2  ;;  %vm4843_vm12 = vcmp.eq.f32.partialorder %v4842_v0, 8.507059e+37 }
 0xa7a   :  { %v6379_v3 = vpop.eup %6378  ;;  %v4963_v47 = vadd.f32 %v4955_v5, %v8874_v59  ;;  %v4964_v41 = vadd.f32 %v4956_v27, %v8875_v23  ;;  %v5024_v5 = vrot.slane %v8533_v11, 7 }
 0xa7b   :  { %v8648_v49 = vadd.f32 1.0, %v6379_v3 }
 0xa7c   :  { %v6381_v32 = vpop.eup %6380  ;;  %v5993_v15 = vmul.f32 -1.442695, %v4963_v47 }
 0xa7d   :  { %v6383_v26 = vpop.eup %6382  ;;  %v4819_v10 = vmul.f32 %v6381_v32, %v4815_v35  ;;  %6388 = vrcp.f32 %v8648_v49  ;;  %vm4824_vm5 = vweird.f32 %v6381_v32  ;;  %v4857_v23 = vand.u32 2147483647, %v8648_v49 }
 0xa7e   :  { %v6385_v7 = vpop.eup %6384  ;;  %v4834_v31 = vmul.f32 %v6383_v26, %v4816_v8  ;;  %6390 = vtanh.f32 %v4805_v6  ;;  %vm4839_vm6 = vweird.f32 %v6383_v26  ;;  %vm4825_vm9 = vmor %vm4823_vm8, %vm4824_vm5  ;;  %v4859_v3 = vand.u32 2147483648, %v8648_v49 }
 0xa7f   :  { %v6387_v57 = vpop.eup %6386  ;;  %v4820_v50 = vsub.f32 1.0, %v4819_v10  ;;  %v8651_v28 = vadd.f32 1.0, %v6385_v7  ;;  %6392 = vpow2.f32 %v5993_v15  ;;  %vm4840_vm11 = vmor %vm4838_vm7, %vm4839_vm6  ;;  %vm4853_vm15 = vweird.f32 %v8648_v49 }
 0xa80   :  { %v4835_v59 = vsub.f32 1.0, %v4834_v31  ;;  %v8653_v22 = vadd.f32 1.0, %v6387_v57  ;;  %vm8686_vm6 = vcmp.eq.f32.partialorder %v4857_v23, 8.507059e+37  ;;  %v4860_v27 = vor.u32 1.1754944e-38, %v4859_v3  ;;  %v8915_v3 = vld [vmem:[#allocation45_spill] sm:$0xff] }
 0xa81   :  { %v4821_v34 = vmul.f32 %v6381_v32, %v4820_v50  ;;  %6394 = vrcp.f32 %v8651_v28  ;;  %v4986_v15 = vand.u32 2147483647, %v8651_v28  ;;  %v4988_v10 = vand.u32 2147483648, %v8651_v28 }
 0xa82   :  { %v4836_v51 = vmul.f32 %v6383_v26, %v4835_v59  ;;  %6396 = vrcp.f32 %v8653_v22  ;;  %v5003_v11 = vand.u32 2147483648, %v8653_v22  ;;  %v5001_v43 = vand.u32 2147483647, %v8653_v22 }
 0xa83   :  { %v8657_v61 = vpop.eup %6388  ;;  %v4822_v17 = vadd.f32 %v6381_v32, %v4821_v34  ;;  %vm4997_vm7 = vweird.f32 %v8653_v22  ;;  %vm4982_vm8 = vweird.f32 %v8651_v28  ;;  %v4989_v2 = vor.u32 1.1754944e-38, %v4988_v10 }
 0xa84   :  { %v6391_v37 = vpop.eup %6390  ;;  %v4849_v48 = vmul.f32 %v8657_v61, %v8648_v49  ;;  %v4837_v63 = vadd.f32 %v6383_v26, %v4836_v51  ;;  %vm4854_vm13 = vweird.f32 %v8657_v61  ;;  %v5004_v51 = vor.u32 1.1754944e-38, %v5003_v11 }
 0xa85   :  { %v6393_v42 = vpop.eup %6392  ;;  %v4826_v38 = vsel %vm4825_vm9, %v6381_v32, %v4822_v17  ;;  %vm8682_vm5 = vmor %vm4853_vm15, %vm4854_vm13 }
 0xa86   :  { %v4850_v16 = vsub.f32 1.0, %v4849_v48  ;;  %v4831_v14 = vsel %vm4828_vm10, %v4830_v54, %v4826_v38  ;;  %v4841_v18 = vsel %vm4840_vm11, %v6383_v26, %v4837_v63  ;;  %v8662_v29 = vadd.f32 1.0, %v6393_v42 }
 0xa87   :  { %v6395_v35 = vpop.eup %6394  ;;  %v4846_v44 = vsel %vm4843_vm12, %v4845_v25, %v4841_v18  ;;  %v4865_v8 = vmul.f32 %v6391_v37, %v4831_v14  ;;  %vm4987_vm11 = vcmp.eq.f32.partialorder %v4986_v15, 8.507059e+37  ;;  %vm5002_vm12 = vcmp.eq.f32.partialorder %v5001_v43, 8.507059e+37  ;;  %v8916_v43 = vld [vmem:[#allocation46_spill] sm:$0xff] }
 0xa88   :  { %v6397_v20 = vpop.eup %6396  ;;  %v4851_v30 = vmul.f32 %v8657_v61, %v4850_v16  ;;  %v4864_v46 = vmul.f32 %v4846_v44, %v8506_v39  ;;  %v4978_v45 = vmul.f32 %v6395_v35, %v8651_v28  ;;  %6398 = vrcp.f32 %v8662_v29 }
 0xa89   :  { %v4993_v6 = vmul.f32 %v6397_v20, %v8653_v22  ;;  %6400 = vtanh.f32 %v4964_v41  ;;  %vm4983_vm14 = vweird.f32 %v6395_v35  ;;  %vm4998_vm0 = vweird.f32 %v6397_v20 }
 0xa8a   :  { %v8672_v47 = vadd.f32 %v4865_v8, %v4864_v46  ;;  %v4979_v32 = vsub.f32 1.0, %v4978_v45  ;;  %v4852_v39 = vadd.f32 %v8657_v61, %v4851_v30  ;;  %vm4984_vm9 = vmor %vm4982_vm8, %vm4983_vm14  ;;  %v5018_v18 = vand.u32 2147483648, %v8662_v29 }
 0xa8b   :  { %v4994_v26 = vsub.f32 1.0, %v4993_v6  ;;  %vm4999_vm10 = vmor %vm4997_vm7, %vm4998_vm0  ;;  %vm5012_vm14 = vweird.f32 %v8662_v29  ;;  %v5016_v44 = vand.u32 2147483647, %v8662_v29 }
 0xa8c   :  { %6402 = vtanh.f32 %v8672_v47  ;;  %v4980_v7 = vmul.f32 %v6395_v35, %v4979_v32  ;;  %v4856_v49 = vsel %vm8682_vm5, %v8657_v61, %v4852_v39  ;;  %v5108_v39 = vpop.f32.mrf.mxu3 }
 0xa8d   :  { %v4995_v31 = vmul.f32 %v6397_v20, %v4994_v26  ;;  %v4861_v61 = vsel %vm8686_vm6, %v4860_v27, %v4856_v49  ;;  %vm5017_vm0 = vcmp.eq.f32.partialorder %v5016_v44, 8.507059e+37 }
 0xa8e   :  { %v6399_v62 = vpop.eup %6398  ;;  %v4981_v19 = vadd.f32 %v6395_v35, %v4980_v7 }
 0xa8f   :  { %v5008_v59 = vmul.f32 %v6399_v62, %v8662_v29  ;;  %v4996_v0 = vadd.f32 %v6397_v20, %v4995_v31  ;;  %v6401_v34 = vpop.eup %6400  ;;  %vm5013_vm13 = vweird.f32 %v6399_v62 }
 0xa90   :  { %v4985_v17 = vsel %vm4984_vm9, %v6395_v35, %v4981_v19  ;;  %vm5014_vm15 = vmor %vm5012_vm14, %vm5013_vm13 }
 0xa91   :  { %v5009_v22 = vsub.f32 1.0, %v5008_v59  ;;  %v4990_v37 = vsel %vm4987_vm11, %v4989_v2, %v4985_v17  ;;  %v5000_v48 = vsel %vm4999_vm10, %v6397_v20, %v4996_v0  ;;  %v5019_v20 = vor.u32 1.1754944e-38, %v5018_v18 }
 0xa92   :  { %v6403_v28 = vpop.eup %6402  ;;  %v5005_v54 = vsel %vm5002_vm12, %v5004_v51, %v5000_v48  ;;  %v5027_v63 = vmul.f32 %v6401_v34, %v4990_v37 }
 0xa93   :  { %v5010_v42 = vmul.f32 %v6399_v62, %v5009_v22  ;;  %v5026_v25 = vmul.f32 %v5024_v5, %v5005_v54  ;;  %v4868_v38 = vmul.f32 %v6403_v28, %v4861_v61 }
 0xa95   :  { %v8699_v41 = vadd.f32 %v5027_v63, %v5026_v25  ;;  %v5529_v16 = vrot.slane %v4868_v38, 2  ;;  %v5011_v14 = vadd.f32 %v6399_v62, %v5010_v42 }
 0xa97   :  { %6404 = vtanh.f32 %v8699_v41  ;;  %v8705_v35 = vsel %vm421_vm2, %v8538_v40, %v5529_v16  ;;  %v5015_v8 = vsel %vm5014_vm15, %v6399_v62, %v5011_v14  ;;  %v5048_v40 = vpop.f32.mrf.mxu0  ;;  %v5109_v62 = vadd.f32 %v5108_v39, %v8916_v43 }
 0xa98   :  { %v5020_v46 = vsel %vm5017_vm0, %v5019_v20, %v5015_v8 }
 0xa9d   :  { %v6405_v30 = vpop.eup %6404 }
 0xa9e   :  { %v5030_v45 = vmul.f32 %v6405_v30, %v5020_v46 }
 0xaa0   :  { %v8709_v5 = vrot.slane %v5030_v45, 7 }
 0xaa2   :  { %6003 = vmatmul.msk.f32.vlgmr.msra.gmra.mxu0 %vm417_vm3, %v8709_v5  ;;  %6005 = vmatmul.msk.f32.vlgmr.msra.gmra.mxu1 %vm417_vm3, %v8709_v5 }
 0xaa3   :  { %6007 = vmatmul.msk.f32.vlgmr.msra.gmra.mxu2 %vm417_vm3, %v8709_v5  ;;  %6009 = vmatmul.msk.f32.vlgmr.msra.gmra.mxu3 %vm417_vm3, %v8709_v5 }
 0xaa4   :  { %6021 = vmatpush.msk.msra.mxu0 %vm421_vm2, %v8552_v24  ;;  %6023 = vmatpush.msk.msra.mxu1 %vm421_vm2, %v8556_v60  ;;  %v5068_v24 = vpop.f32.mrf.mxu1  ;;  %v5049_v60 = vadd.f32 %v5048_v40, %v8903_v9 }
 0xaa5   :  { %6025 = vmatpush.msk.msra.mxu2 %vm421_vm2, %v8560_v33  ;;  %6027 = vmatpush.msk.msra.mxu3 %vm421_vm2, %v8564_v58  ;;  %v5069_v33 = vadd.f32 %v5068_v24, %v8904_v36  ;;  %v5088_v58 = vpop.f32.mrf.mxu2  ;;  %v5508_v24 = vrot.slane %v8699_v41, 7 }
 0xaa6   :  { %5363 = vmatpush.msra.mxu0 %v8568_v1  ;;  %5383 = vmatpush.msra.mxu1 %v8571_v4  ;;  %v5089_v6 = vadd.f32 %v5088_v58, %v8915_v3 }
 0xaa7   :  { %5403 = vmatpush.msra.mxu2 %v8574_v21  ;;  %5423 = vmatpush.msra.mxu3 %v8577_v13 }
 0xaaa   :  { %6014 = vmatmul.msk.f32.vlgmr.msrb.gmra.mxu0 %vm417_vm3, %v4868_v38  ;;  %6016 = vmatmul.msk.f32.vlgmr.msrb.gmra.mxu1 %vm417_vm3, %v4868_v38 }
 0xaab   :  { %6018 = vmatmul.msk.f32.vlgmr.msrb.gmra.mxu2 %vm417_vm3, %v4868_v38  ;;  %6020 = vmatmul.msk.f32.vlgmr.msrb.gmra.mxu3 %vm417_vm3, %v4868_v38 }
 0xb1f   :  { %v5132_v1 = vpop.f32.mrf.mxu0  ;;  %v5152_v4 = vpop.f32.mrf.mxu1 }
 0xb20   :  { %v5195_v21 = vadd.f32 %v5132_v1, %v5049_v60  ;;  %v5196_v29 = vadd.f32 %v5152_v4, %v5069_v33 }
 0xb22   :  { %v6010_v13 = vmul.f32 -1.442695, %v5195_v21  ;;  %v6011_v23 = vmul.f32 -1.442695, %v5196_v29 }
 0xb24   :  { %6406 = vpow2.f32 %v6010_v13 }
 0xb25   :  { %6408 = vpow2.f32 %v6011_v23 }
 0xb26   :  { %v5172_v32 = vpop.f32.mrf.mxu2  ;;  %v5192_v7 = vpop.f32.mrf.mxu3 }
 0xb27   :  { %v5197_v15 = vadd.f32 %v5172_v32, %v5089_v6  ;;  %v5198_v19 = vadd.f32 %v5192_v7, %v5109_v62  ;;  %v5282_v41 = vpop.f32.mrf.mxu0  ;;  %v5302_v23 = vpop.f32.mrf.mxu1 }
 0xb28   :  { %v5283_v3 = vadd.f32 %v5282_v41, %v7379_v55  ;;  %v5303_v6 = vadd.f32 %v5302_v23, %v7381_v56 }
 0xb29   :  { %v6012_v26 = vmul.f32 -1.442695, %v5197_v15 }
 0xb2a   :  { %v6407_v10 = vpop.eup %6406 }
 0xb2b   :  { %v6409_v11 = vpop.eup %6408  ;;  %v5208_v9 = vadd.f32 1.0, %v6407_v10  ;;  %6410 = vpow2.f32 %v6012_v26 }
 0xb2c   :  { %v5209_v36 = vadd.f32 1.0, %v6409_v11 }
 0xb2d   :  { %6412 = vrcp.f32 %v5208_v9  ;;  %v5222_v27 = vand.u32 2147483648, %v5208_v9  ;;  %v5220_v22 = vand.u32 2147483647, %v5208_v9  ;;  %vm5216_vm7 = vweird.f32 %v5208_v9 }
 0xb2e   :  { %6414 = vrcp.f32 %v5209_v36  ;;  %v5237_v51 = vand.u32 2147483648, %v5209_v36  ;;  %v5235_v48 = vand.u32 2147483647, %v5209_v36  ;;  %vm5231_vm8 = vweird.f32 %v5209_v36  ;;  %v5322_v32 = vpop.f32.mrf.mxu2  ;;  %v5342_v43 = vpop.f32.mrf.mxu3 }
 0xb2f   :  { %v5223_v61 = vor.u32 1.1754944e-38, %v5222_v27  ;;  %vm5221_vm11 = vcmp.eq.f32.partialorder %v5220_v22, 8.507059e+37 }
 0xb30   :  { %v5238_v25 = vor.u32 1.1754944e-38, %v5237_v51  ;;  %vm5236_vm12 = vcmp.eq.f32.partialorder %v5235_v48, 8.507059e+37 }
 0xb31   :  { %v6411_v31 = vpop.eup %6410 }
 0xb32   :  { %v5210_v57 = vadd.f32 1.0, %v6411_v31 }
 0xb33   :  { %v6413_v50 = vpop.eup %6412 }
 0xb34   :  { %v6415_v49 = vpop.eup %6414  ;;  %v5212_v59 = vmul.f32 %v6413_v50, %v5208_v9  ;;  %6416 = vrcp.f32 %v5210_v57  ;;  %vm5217_vm5 = vweird.f32 %v6413_v50  ;;  %v5252_v60 = vand.u32 2147483648, %v5210_v57 }
 0xb35   :  { %v5227_v2 = vmul.f32 %v6415_v49, %v5209_v36  ;;  %6418 = vtanh.f32 %v5198_v19  ;;  %vm5232_vm6 = vweird.f32 %v6415_v49  ;;  %vm5218_vm9 = vmor %vm5216_vm7, %vm5217_vm5  ;;  %vm5246_vm14 = vweird.f32 %v5210_v57  ;;  %v5545_v19 = vld [vmem:[#allocation19 + $0x8] sm:$0x3f] }
 0xb36   :  { %v5213_v0 = vsub.f32 1.0, %v5212_v59  ;;  %vm5233_vm10 = vmor %vm5231_vm8, %vm5232_vm6  ;;  %v5250_v58 = vand.u32 2147483647, %v5210_v57  ;;  %v5253_v21 = vor.u32 1.1754944e-38, %v5252_v60  ;;  %v5323_v36 = vadd.f32 %v5322_v32, %v7385_v12  ;;  %6032 = vmatpush.msk.msrb.mxu0 %vm421_vm2, %v5545_v19 }
 0xb37   :  { %v5228_v34 = vsub.f32 1.0, %v5227_v2  ;;  %v5343_v12 = vadd.f32 %v5342_v43, %v8873_v52 }
 0xb38   :  { %v5214_v17 = vmul.f32 %v6413_v50, %v5213_v0  ;;  %vm5251_vm0 = vcmp.eq.f32.partialorder %v5250_v58, 8.507059e+37 }
 0xb39   :  { %v5229_v37 = vmul.f32 %v6415_v49, %v5228_v34 }
 0xb3a   :  { %v6417_v28 = vpop.eup %6416  ;;  %v5215_v54 = vadd.f32 %v6413_v50, %v5214_v17 }
 0xb3b   :  { %v5242_v63 = vmul.f32 %v6417_v28, %v5210_v57  ;;  %v5230_v42 = vadd.f32 %v6415_v49, %v5229_v37  ;;  %v6419_v16 = vpop.eup %6418  ;;  %vm5247_vm13 = vweird.f32 %v6417_v28 }
 0xb3c   :  { %v5219_v38 = vsel %vm5218_vm9, %v6413_v50, %v5215_v54  ;;  %vm5248_vm15 = vmor %vm5246_vm14, %vm5247_vm13  ;;  %vm5505_vm13 = vcmask 108544  }
 0xb3d   :  { %v5243_v14 = vsub.f32 1.0, %v5242_v63  ;;  %v5224_v18 = vsel %vm5221_vm11, %v5223_v61, %v5219_v38  ;;  %v5234_v44 = vsel %vm5233_vm10, %v6415_v49, %v5230_v42  ;;  %v5544_v49 = vld [vmem:[#allocation19] sm:$0xff] }
 0xb3e   :  { %v5239_v8 = vsel %vm5236_vm12, %v5238_v25, %v5234_v44  ;;  %v5258_v20 = vmul.f32 %v6419_v16, %v5224_v18  ;;  %5571 = vmatpush.msrb.mxu0 %v5544_v49 }
 0xb3f   :  { %v5244_v30 = vmul.f32 %v6417_v28, %v5243_v14  ;;  %v5257_v46 = vmul.f32 %v5239_v8, %v8594_v53 }
 0xb41   :  { %v5259_v45 = vadd.f32 %v5258_v20, %v5257_v46  ;;  %v5245_v40 = vadd.f32 %v6417_v28, %v5244_v30 }
 0xb43   :  { %6420 = vtanh.f32 %v5259_v45  ;;  %v5511_v33 = vrot.slane %v5259_v45, 7  ;;  %v5249_v4 = vsel %vm5248_vm15, %v6417_v28, %v5245_v40 }
 0xb44   :  { %v5254_v13 = vsel %vm5251_vm0, %v5253_v21, %v5249_v4 }
 0xb45   :  { %v8742_v1 = vsel %vm5501_vm1, %v5508_v24, %v5511_v33 }
 0xb49   :  { %v6421_v29 = vpop.eup %6420 }
 0xb4a   :  { %v8744_v53 = vmul.f32 %v6421_v29, %v5254_v13 }
 0xb4c   :  { %6022 = vmatmul.msk.f32.vlgmr.msra.gmra.mxu0 %vm417_vm3, %v8744_v53  ;;  %6024 = vmatmul.msk.f32.vlgmr.msra.gmra.mxu1 %vm417_vm3, %v8744_v53  ;;  %v5496_v32 = vrot.slane %v8744_v53, 7 }
 0xb4d   :  { %6026 = vmatmul.msk.f32.vlgmr.msra.gmra.mxu2 %vm417_vm3, %v8744_v53  ;;  %6028 = vmatmul.msk.f32.vlgmr.msra.gmra.mxu3 %vm417_vm3, %v8744_v53 }
 0xbc9   :  { %v5365_v15 = vpop.f32.mrf.mxu0  ;;  %v5385_v39 = vpop.f32.mrf.mxu1 }
 0xbca   :  { %v5428_v26 = vadd.f32 %v5365_v15, %v5283_v3  ;;  %v5429_v10 = vadd.f32 %v5385_v39, %v5303_v6 }
 0xbcc   :  { %v6029_v11 = vmul.f32 -1.442695, %v5428_v26  ;;  %v6030_v9 = vmul.f32 -1.442695, %v5429_v10  ;;  %v5502_v10 = vsel %vm5501_vm1, %v8709_v5, %v5496_v32 }
 0xbce   :  { %6422 = vpow2.f32 %v6029_v11 }
 0xbcf   :  { %6424 = vpow2.f32 %v6030_v9 }
 0xbd0   :  { %v5405_v7 = vpop.f32.mrf.mxu2  ;;  %v5425_v59 = vpop.f32.mrf.mxu3 }
 0xbd1   :  { %v5430_v31 = vadd.f32 %v5405_v7, %v5323_v36  ;;  %v5431_v27 = vadd.f32 %v5425_v59, %v5343_v12 }
 0xbd3   :  { %v6031_v62 = vmul.f32 -1.442695, %v5430_v31 }
 0xbd4   :  { %v6423_v57 = vpop.eup %6422 }
 0xbd5   :  { %v6425_v50 = vpop.eup %6424  ;;  %v5441_v55 = vadd.f32 1.0, %v6423_v57  ;;  %6426 = vpow2.f32 %v6031_v62 }
 0xbd6   :  { %v5442_v56 = vadd.f32 1.0, %v6425_v50 }
 0xbd7   :  { %6428 = vrcp.f32 %v5441_v55  ;;  %v5455_v28 = vand.u32 2147483648, %v5441_v55  ;;  %v5453_v61 = vand.u32 2147483647, %v5441_v55  ;;  %vm5449_vm6 = vweird.f32 %v5441_v55 }
 0xbd8   :  { %6430 = vrcp.f32 %v5442_v56  ;;  %v5470_v54 = vand.u32 2147483648, %v5442_v56  ;;  %v5468_v25 = vand.u32 2147483647, %v5442_v56  ;;  %vm5464_vm7 = vweird.f32 %v5442_v56 }
 0xbd9   :  { %v5456_v14 = vor.u32 1.1754944e-38, %v5455_v28  ;;  %vm5454_vm10 = vcmp.eq.f32.partialorder %v5453_v61, 8.507059e+37 }
 0xbda   :  { %v5471_v44 = vor.u32 1.1754944e-38, %v5470_v54  ;;  %vm5469_vm11 = vcmp.eq.f32.partialorder %v5468_v25, 8.507059e+37 }
 0xbdb   :  { %v6427_v2 = vpop.eup %6426 }
 0xbdc   :  { %v5443_v0 = vadd.f32 1.0, %v6427_v2 }
 0xbdd   :  { %v6429_v34 = vpop.eup %6428 }
 0xbde   :  { %v6431_v51 = vpop.eup %6430  ;;  %v5445_v17 = vmul.f32 %v6429_v34, %v5441_v55  ;;  %6432 = vrcp.f32 %v5443_v0  ;;  %vm5450_vm2 = vweird.f32 %v6429_v34  ;;  %v5485_v21 = vand.u32 2147483648, %v5443_v0 }
 0xbdf   :  { %v5460_v22 = vmul.f32 %v6431_v51, %v5442_v56  ;;  %6434 = vtanh.f32 %v5431_v27  ;;  %vm5465_vm5 = vweird.f32 %v6431_v51  ;;  %vm5451_vm8 = vmor %vm5449_vm6, %vm5450_vm2  ;;  %vm5479_vm14 = vweird.f32 %v5443_v0 }
 0xbe0   :  { %v5446_v37 = vsub.f32 1.0, %v5445_v17  ;;  %vm5466_vm9 = vmor %vm5464_vm7, %vm5465_vm5  ;;  %v5483_v13 = vand.u32 2147483647, %v5443_v0  ;;  %v5486_v3 = vor.u32 1.1754944e-38, %v5485_v21  ;;  %vm5541_vm2 = vcmask 1046528  }
 0xbe1   :  { %v5461_v48 = vsub.f32 1.0, %v5460_v22 }
 0xbe2   :  { %v5447_v63 = vmul.f32 %v6429_v34, %v5446_v37  ;;  %vm5484_vm0 = vcmp.eq.f32.partialorder %v5483_v13, 8.507059e+37 }
 0xbe3   :  { %v5462_v42 = vmul.f32 %v6431_v51, %v5461_v48 }
 0xbe4   :  { %v6433_v38 = vpop.eup %6432  ;;  %v5448_v52 = vadd.f32 %v6429_v34, %v5447_v63 }
 0xbe5   :  { %v5475_v16 = vmul.f32 %v6433_v38, %v5443_v0  ;;  %v5463_v18 = vadd.f32 %v6431_v51, %v5462_v42  ;;  %v6435_v20 = vpop.eup %6434  ;;  %vm5480_vm12 = vweird.f32 %v6433_v38 }
 0xbe6   :  { %v5452_v8 = vsel %vm5451_vm8, %v6429_v34, %v5448_v52  ;;  %vm5481_vm15 = vmor %vm5479_vm14, %vm5480_vm12 }
 0xbe7   :  { %v5476_v30 = vsub.f32 1.0, %v5475_v16  ;;  %v5457_v46 = vsel %vm5454_vm10, %v5456_v14, %v5452_v8  ;;  %v5467_v45 = vsel %vm5466_vm9, %v6431_v51, %v5463_v18 }
 0xbe8   :  { %v5472_v40 = vsel %vm5469_vm11, %v5471_v44, %v5467_v45  ;;  %v5491_v24 = vmul.f32 %v6435_v20, %v5457_v46 }
 0xbe9   :  { %v5477_v60 = vmul.f32 %v6433_v38, %v5476_v30  ;;  %v5490_v33 = vmul.f32 %v5472_v40, %v8672_v47 }
 0xbeb   :  { %v5492_v58 = vadd.f32 %v5491_v24, %v5490_v33  ;;  %v5478_v4 = vadd.f32 %v6433_v38, %v5477_v60 }
 0xbed   :  { %6436 = vtanh.f32 %v5492_v58  ;;  %v5514_v29 = vrot.slane %v5492_v58, 6  ;;  %v5482_v23 = vsel %vm5481_vm15, %v6433_v38, %v5478_v4 }
 0xbee   :  { %v5487_v47 = vsel %vm5484_vm0, %v5486_v3, %v5482_v23 }
 0xbef   :  { %v5517_v41 = vsel %vm5503_vm4, %v8742_v1, %v5514_v29 }
 0xbf0   :  { %5518 = vst.msk [vmem:[#allocation25] sm:$0x7] %vm5505_vm13, %v5517_v41 }
 0xbf3   :  { %v6437_v6 = vpop.eup %6436 }
 0xbf4   :  { %v5494_v15 = vmul.f32 %v6437_v6, %v5487_v47 }
 0xbf6   :  { %v5531_v39 = vrot.slane %v5494_v15, 1  ;;  %v5499_v26 = vrot.slane %v5494_v15, 6 }
 0xbf8   :  { %v5542_v11 = vsel %vm5541_vm2, %v8705_v35, %v5531_v39  ;;  %v5504_v1 = vsel %vm5503_vm4, %v5502_v10, %v5499_v26  ;;  %v6053_v35 = vld [vmem:[#allocation20] ss:$0 sm:$0xff] }
 0xbf9   :  { %v5543_v9 = vmax.f32 %v5542_v11, 0.0  ;;  %5506 = vst.msk [vmem:[#allocation23] sm:$0x7] %vm5505_vm13, %v5504_v1 }
 0xbfa   :  { %5599 = dma.vmem_to_hbm [thread:$0]  %s5595_s21, 64, %s5597_s19, [#allocation24]  }
 0xbfb   :  { %6033 = vmatmul.msk.f32.vlgmr.msrb.gmra.mxu0 %vm417_vm3, %v5543_v9  ;;  %5610 = dma.vmem_to_hbm [thread:$0]  %s5606_s8, 64, %s5608_s9, [#allocation24]  }
 0xc78   :  { %v5573_v5 = vpop.f32.mrf.mxu0 }
 0xc79   :  { %v5574_v53 = vadd.f32 %v6053_v35, %v5573_v5 }
 0xc7b   :  { %v5576_v36 = vmax.f32 %v5574_v53, 0.0 }
 0xc7d   :  { %5577 = vst [vmem:[#allocation22] sm:$0xff] %v5576_v36 }
 0xc7e   :  { %5588 = dma.vmem_to_hbm [thread:$0]  %s5584_s23, 128, %s5586_s26, [#allocation4]  }
 0xc7f   :  { %6932 = dma.done.wait [#allocation4], 128  }
 0xc80   :  { %6933 = vsyncadd [#allocation4], 4294967168 }
 0xc81   :  { %6934 = dma.done.wait [#allocation24], 128  }
 0xc82   :  { %6935 = vsyncadd [#allocation24], 4294967168 }
 0xc83   :  { %5623 = vsyncpa [#allocation3], 1 }
 0xc84   :  { %5624 = vsyncpa [#allocation6], 1 }
 0xc85   :  { %5625 = vsyncpa [#allocation9], 1 }
 0xc86   :  { %5626 = vsyncpa [#allocation12], 1 }
 0xc87   :  { %5627 = vsyncpa [#allocation15], 1 }
 0xc88   :  { %5628 = vsyncpa [#allocation18], 1 }
 0xc89   :  { %5629 = vsyncpa [#allocation21], 1 }
 0xc8a   :  { %5630 = vsyncpa [#allocation4], 1 }
 0xc8b   :  { %5631 = vsyncpa [#allocation24], 1 }

</bundles_post_ra>
